<compile_context>
chip_gen: v7x
topology: tpu7x:2x2x1
jax: 0.10.0
libtpu: 0.0.40
codegen_flags: <defaults>
</compile_context>

<pallas_src>
import numpy as np

import jax
import jax.numpy as jnp
from jax.experimental import pallas as pl
from jax.experimental.pallas import tpu as pltpu

EPS = 1e-5  # PyTorch InstanceNorm2d default


# ---------------------------------------------------------------------------
# Static layer plan (geometry only)
# ---------------------------------------------------------------------------
def build_plan(n_downsample, n_res, input_dim, dim, H, W):
    plan = []

    def add(K, s, p, cin, cout, h, w, relu):
        ho = (h + 2 * p - K) // s + 1
        wo = (w + 2 * p - K) // s + 1
        plan.append(dict(K=K, s=s, p=p, cin=cin, cout=cout,
                         h_in=h, w_in=w, h_out=ho, w_out=wo, relu=relu))
        return ho, wo

    h, w, c = H, W, input_dim
    h, w = add(7, 1, 3, c, dim, h, w, True)
    c = dim
    for _ in range(n_downsample):
        h, w = add(4, 2, 1, c, 2 * c, h, w, True)
        c = 2 * c
    for _ in range(n_res):
        h, w = add(3, 1, 1, c, c, h, w, True)    # ResBlock conv1 (+ReLU)
        h, w = add(3, 1, 1, c, c, h, w, False)   # ResBlock conv2 (no act)
    return plan


def init_params(key, plan):
    params = []
    keys = jax.random.split(key, len(plan))
    for k, cfg in zip(keys, plan):
        kw, kb = jax.random.split(k)
        K, cin, cout = cfg["K"], cfg["cin"], cfg["cout"]
        fan_in = K * K * cin
        w = jax.random.normal(kw, (K, K, cin, cout), jnp.float32) / float(np.sqrt(fan_in))
        b = 0.01 * jax.random.normal(kb, (cout,), jnp.float32)
        params.append((w, b))  # weight layout HWIO
    return params


# ---------------------------------------------------------------------------
# Parameter packing: fold reflect padding + im2col + stride into constants
# ---------------------------------------------------------------------------
def _reflect(t, n):
    if t < 0:
        return -t
    if t >= n:
        return 2 * n - 2 - t
    return t


def pack_params(params, plan):
    Rs, Ms, biases, t_keys, widths = [], [], [], [], []
    for (w, b), cfg in zip(params, plan):
        K, s, p = cfg["K"], cfg["s"], cfg["p"]
        Hi, Wi, Ho, Wo = cfg["h_in"], cfg["w_in"], cfg["h_out"], cfg["w_out"]
        cin, cout = cfg["cin"], cfg["cout"]

        # Row selection (+ reflect pad + stride): R[di][i, reflect(i*s+di-p)] = 1
        R = np.zeros((K, Ho, Hi), np.float32)
        for di in range(K):
            for i in range(Ho):
                R[di, i, _reflect(i * s + di - p, Hi)] = 1.0

        # Column map (+ reflect pad + stride): A[dj, reflect(j*s+dj-p), j] = 1
        A = np.zeros((K, Wi, Wo), np.float32)
        for dj in range(K):
            for j in range(Wo):
                A[dj, _reflect(j * s + dj - p, Wi), j] = 1.0

        # M[di, w*cin+ci, j*cout+co] = sum_dj A[dj,w,j] * W[di,dj,ci,co]
        M = jnp.einsum("awj,daco->dwcjo", jnp.asarray(A), w)
        M = M.reshape(K, Wi * cin, Wo * cout)

        Rs.append(jnp.asarray(R))
        Ms.append(M.astype(jnp.bfloat16))           # bf16 weights (review item)
        biases.append(jnp.tile(b, Wo))               # row-flat layout bias
        widths.append(Wo * cout)
        t_keys.append((cout, Ho * Wo))

    assert len(set(widths)) == 1, "fused kernel assumes constant W*C lane width"
    width = widths[0]
    bias_all = jnp.stack(biases).astype(jnp.float32)  # (L, width)

    # Distinct channel-averaging matrices for instance norm.
    uniq, t_idx = [], []
    for key_ in t_keys:
        if key_ not in uniq:
            uniq.append(key_)
        t_idx.append(uniq.index(key_))
    lane = np.arange(width)
    t_all = np.stack([
        ((lane[:, None] % c) == (lane[None, :] % c)).astype(np.float32) / float(hw)
        for (c, hw) in uniq
    ])
    return dict(R=Rs, M=Ms, bias=bias_all, T=jnp.asarray(t_all), t_idx=tuple(t_idx))


# ---------------------------------------------------------------------------
# Fused Pallas kernel (whole encoder, one batch element per grid step)
# ---------------------------------------------------------------------------
def _make_kernel(plan, t_idx, n_pre, n_res):
    L = len(plan)

    def kernel(*refs):
        x_ref = refs[0]
        r_refs = refs[1:1 + L]
        m_refs = refs[1 + L:1 + 2 * L]
        b_ref = refs[1 + 2 * L]
        t_ref = refs[2 + 2 * L]
        o_ref = refs[3 + 2 * L]
        f32 = jnp.float32

        def conv_in_block(l, act):
            cfg = plan[l]
            width = cfg["w_out"] * cfg["cout"]
            z = jnp.zeros((cfg["h_out"], width), f32)
            # conv = sum over kernel rows of (row-select matmul) @ (col/weight matmul)
            for di in range(cfg["K"]):
                rows = jnp.dot(r_refs[l][di], act, preferred_element_type=f32)
                z = z + jnp.dot(rows, m_refs[l][di], preferred_element_type=f32)
            z = z + b_ref[l:l + 1, :]
            # InstanceNorm2d (biased variance). Channels are interleaved along
            # lanes with period cout; the constant matrix T averages each
            # channel group and broadcasts the stat back to every lane.
            T = t_ref[t_idx[l]]
            m = jnp.sum(jnp.dot(z, T, preferred_element_type=f32),
                        axis=0, keepdims=True)
            ex2 = jnp.sum(jnp.dot(z * z, T, preferred_element_type=f32),
                          axis=0, keepdims=True)
            var = jnp.maximum(ex2 - m * m, 0.0)
            z = (z - m) * jax.lax.rsqrt(var + EPS)
            if cfg["relu"]:
                z = jnp.maximum(z, 0.0)
            return z

        act = x_ref[0]                       # (H, W*Cin) row-flat activation
        for l in range(n_pre):               # stem + downsampling convs
            act = conv_in_block(l, act)
        for r in range(n_res):               # ResBlocks
            resid = act
            act = conv_in_block(n_pre + 2 * r, act)
            act = conv_in_block(n_pre + 2 * r + 1, act) + resid
        o_ref[0] = act                       # (Hf, Wf*Cf), 128-lane store

    return kernel


def content_encoder_forward(x_nhwc, packed, plan, n_pre, n_res):
    N, H, W, Cin = x_nhwc.shape
    width = packed["bias"].shape[1]
    Hf, Wf, Cf = plan[-1]["h_out"], plan[-1]["w_out"], plan[-1]["cout"]

    x_rf = x_nhwc.reshape(N, H, W * Cin)     # row-flat layout (layout glue only)
    kernel = _make_kernel(plan, packed["t_idx"], n_pre, n_res)

    in_specs = [pl.BlockSpec((1, H, W * Cin), lambda n: (n, 0, 0))]
    for R in packed["R"]:
        in_specs.append(pl.BlockSpec(R.shape, lambda n: (0, 0, 0)))
    for M in packed["M"]:
        in_specs.append(pl.BlockSpec(M.shape, lambda n: (0, 0, 0)))
    in_specs.append(pl.BlockSpec(packed["bias"].shape, lambda n: (0, 0)))
    in_specs.append(pl.BlockSpec(packed["T"].shape, lambda n: (0, 0, 0)))

    out = pl.pallas_call(
        kernel,
        out_shape=jax.ShapeDtypeStruct((N, Hf, width), jnp.float32),
        grid=(N,),
        in_specs=in_specs,
        out_specs=pl.BlockSpec((1, Hf, width), lambda n: (n, 0, 0)),
        compiler_params=pltpu.CompilerParams(dimension_semantics=("parallel",)),
    )(x_rf, *packed["R"], *packed["M"], packed["bias"], packed["T"])

    return out.reshape(N, Hf, Wf, Cf)        # back to NHWC (layout glue only)


# ---------------------------------------------------------------------------
# Pure-JAX reference (same bf16-rounded weights) for in-script validation
# ---------------------------------------------------------------------------
def reference_forward(x, params, plan, n_pre, n_res):
    def block(h, l):
        cfg = plan[l]
        w = params[l][0].astype(jnp.bfloat16).astype(jnp.float32)
        b = params[l][1]
        p, s = cfg["p"], cfg["s"]
        hp = jnp.pad(h, ((0, 0), (p, p), (p, p), (0, 0)), mode="reflect")
        y = jax.lax.conv_general_dilated(
            hp, w, (s, s), "VALID",
            dimension_numbers=("NHWC", "HWIO", "NHWC"),
            precision=jax.lax.Precision.HIGHEST)
        y = y + b
        mu = jnp.mean(y, axis=(1, 2), keepdims=True)
        var = jnp.mean((y - mu) ** 2, axis=(1, 2), keepdims=True)
        y = (y - mu) * jax.lax.rsqrt(var + EPS)
        if cfg["relu"]:
            y = jnp.maximum(y, 0.0)
        return y

    h = x
    for l in range(n_pre):
        h = block(h, l)
    for r in range(n_res):
        resid = h
        h = block(h, n_pre + 2 * r)
        h = block(h, n_pre + 2 * r + 1) + resid
    return h


if __name__ == "__main__":
    n_downsample, n_res = 2, 2
    input_dim, dim = 4, 8
    N, H, W = 2, 16, 16

    key = jax.random.PRNGKey(0)
    kx, kp = jax.random.split(key)
    # NHWC layout; the PyTorch-equivalent input would be (N, 4, 16, 16) NCHW.
    x = jax.random.normal(kx, (N, H, W, input_dim), jnp.float32)

    plan = build_plan(n_downsample, n_res, input_dim, dim, H, W)
    n_pre = 1 + n_downsample
    params = init_params(kp, plan)
    packed = pack_params(params, plan)

    out = content_encoder_forward(x, packed, plan, n_pre, n_res)
    out = jax.block_until_ready(out)

    expected = (N, H // (2 ** n_downsample), W // (2 ** n_downsample),
                dim * (2 ** n_downsample))
    assert out.shape == expected, (out.shape, expected)
    assert bool(jnp.all(jnp.isfinite(out)))

    ref = reference_forward(x, params, plan, n_pre, n_res)
    err = float(jnp.max(jnp.abs(out - ref)))
    assert err < 1e-1, f"max abs diff vs reference: {err}"

    print("KERNEL_OK")
</pallas_src>

<mosaic_0001>
module attributes {stable_mosaic.version = 11 : i64} {
  func.func @kernel(%arg0: i32, %arg1: memref<1x16x64xf32, #tpu.memory_space<vmem>>, %arg2: memref<7x16x16xf32, #tpu.memory_space<vmem>>, %arg3: memref<4x8x16xf32, #tpu.memory_space<vmem>>, %arg4: memref<4x4x8xf32, #tpu.memory_space<vmem>>, %arg5: memref<3x4x4xf32, #tpu.memory_space<vmem>>, %arg6: memref<3x4x4xf32, #tpu.memory_space<vmem>>, %arg7: memref<3x4x4xf32, #tpu.memory_space<vmem>>, %arg8: memref<3x4x4xf32, #tpu.memory_space<vmem>>, %arg9: memref<7x64x128xbf16, #tpu.memory_space<vmem>>, %arg10: memref<4x128x128xbf16, #tpu.memory_space<vmem>>, %arg11: memref<4x128x128xbf16, #tpu.memory_space<vmem>>, %arg12: memref<3x128x128xbf16, #tpu.memory_space<vmem>>, %arg13: memref<3x128x128xbf16, #tpu.memory_space<vmem>>, %arg14: memref<3x128x128xbf16, #tpu.memory_space<vmem>>, %arg15: memref<3x128x128xbf16, #tpu.memory_space<vmem>>, %arg16: memref<7x128xf32, #tpu.memory_space<vmem>>, %arg17: memref<3x128x128xf32, #tpu.memory_space<vmem>>, %arg18: memref<1x4x128xf32, #tpu.memory_space<vmem>>) attributes {dimension_semantics = [#tpu.dimension_semantics<parallel>], iteration_bounds = array<i64: 2>, scalar_prefetch = 0 : i64, scratch_operands = 0 : i64, tpu.core_type = #tpu.core_type<tc>, window_params = [{transform_indices = @transform_0, window_bounds = array<i64: 1, 16, 64>}, {pipeline_mode = #tpu.pipeline_mode<synchronous>, transform_indices = @transform_1, window_bounds = array<i64: 7, 16, 16>}, {pipeline_mode = #tpu.pipeline_mode<synchronous>, transform_indices = @transform_2, window_bounds = array<i64: 4, 8, 16>}, {pipeline_mode = #tpu.pipeline_mode<synchronous>, transform_indices = @transform_3, window_bounds = array<i64: 4, 4, 8>}, {pipeline_mode = #tpu.pipeline_mode<synchronous>, transform_indices = @transform_4, window_bounds = array<i64: 3, 4, 4>}, {pipeline_mode = #tpu.pipeline_mode<synchronous>, transform_indices = @transform_5, window_bounds = array<i64: 3, 4, 4>}, {pipeline_mode = #tpu.pipeline_mode<synchronous>, transform_indices = @transform_6, window_bounds = array<i64: 3, 4, 4>}, {pipeline_mode = #tpu.pipeline_mode<synchronous>, transform_indices = @transform_7, window_bounds = array<i64: 3, 4, 4>}, {pipeline_mode = #tpu.pipeline_mode<synchronous>, transform_indices = @transform_8, window_bounds = array<i64: 7, 64, 128>}, {pipeline_mode = #tpu.pipeline_mode<synchronous>, transform_indices = @transform_9, window_bounds = array<i64: 4, 128, 128>}, {pipeline_mode = #tpu.pipeline_mode<synchronous>, transform_indices = @transform_10, window_bounds = array<i64: 4, 128, 128>}, {pipeline_mode = #tpu.pipeline_mode<synchronous>, transform_indices = @transform_11, window_bounds = array<i64: 3, 128, 128>}, {pipeline_mode = #tpu.pipeline_mode<synchronous>, transform_indices = @transform_12, window_bounds = array<i64: 3, 128, 128>}, {pipeline_mode = #tpu.pipeline_mode<synchronous>, transform_indices = @transform_13, window_bounds = array<i64: 3, 128, 128>}, {pipeline_mode = #tpu.pipeline_mode<synchronous>, transform_indices = @transform_14, window_bounds = array<i64: 3, 128, 128>}, {pipeline_mode = #tpu.pipeline_mode<synchronous>, transform_indices = @transform_15, window_bounds = array<i64: 7, 128>}, {pipeline_mode = #tpu.pipeline_mode<synchronous>, transform_indices = @transform_16, window_bounds = array<i64: 3, 128, 128>}, {transform_indices = @transform_17, window_bounds = array<i64: 1, 4, 128>}]} {
    %c0 = arith.constant 0 : index
    %c0_0 = arith.constant 0 : index
    %c0_1 = arith.constant 0 : index
    %0 = vector.load %arg1[%c0, %c0_0, %c0_1] : memref<1x16x64xf32, #tpu.memory_space<vmem>>, vector<1x16x64xf32>
    %1 = vector.shape_cast %0 : vector<1x16x64xf32> to vector<16x64xf32>
    %cst = arith.constant 0.000000e+00 : f32
    %2 = vector.broadcast %cst : f32 to vector<16x128xf32>
    %c0_2 = arith.constant 0 : index
    %c0_3 = arith.constant 0 : index
    %c0_4 = arith.constant 0 : index
    %3 = vector.load %arg2[%c0_2, %c0_3, %c0_4] : memref<7x16x16xf32, #tpu.memory_space<vmem>>, vector<1x16x16xf32>
    %4 = vector.shape_cast %3 : vector<1x16x16xf32> to vector<16x16xf32>
    %cst_5 = arith.constant dense<0.000000e+00> : vector<16x64xf32>
    %5 = tpu.matmul %4, %1, %cst_5 {dimension_numbers = #tpu.dot_dimension_numbers<[1], [0], [0], [1], [0, 0, 1, 1], [], []>} : vector<16x16xf32>, vector<16x64xf32>, vector<16x64xf32> -> vector<16x64xf32>
    %c0_6 = arith.constant 0 : index
    %c0_7 = arith.constant 0 : index
    %c0_8 = arith.constant 0 : index
    %6 = vector.load %arg9[%c0_6, %c0_7, %c0_8] : memref<7x64x128xbf16, #tpu.memory_space<vmem>>, vector<1x64x128xbf16>
    %7 = vector.shape_cast %6 : vector<1x64x128xbf16> to vector<64x128xbf16>
    %cst_9 = arith.constant dense<0.000000e+00> : vector<16x128xf32>
    %8 = tpu.matmul %5, %7, %cst_9 {dimension_numbers = #tpu.dot_dimension_numbers<[1], [0], [0], [1], [0, 0, 1, 1], [], []>} : vector<16x64xf32>, vector<64x128xbf16>, vector<16x128xf32> -> vector<16x128xf32>
    %9 = arith.addf %2, %8 : vector<16x128xf32>
    %c1 = arith.constant 1 : index
    %c0_10 = arith.constant 0 : index
    %c0_11 = arith.constant 0 : index
    %10 = vector.load %arg2[%c1, %c0_10, %c0_11] : memref<7x16x16xf32, #tpu.memory_space<vmem>>, vector<1x16x16xf32>
    %11 = vector.shape_cast %10 : vector<1x16x16xf32> to vector<16x16xf32>
    %cst_12 = arith.constant dense<0.000000e+00> : vector<16x64xf32>
    %12 = tpu.matmul %11, %1, %cst_12 {dimension_numbers = #tpu.dot_dimension_numbers<[1], [0], [0], [1], [0, 0, 1, 1], [], []>} : vector<16x16xf32>, vector<16x64xf32>, vector<16x64xf32> -> vector<16x64xf32>
    %c1_13 = arith.constant 1 : index
    %c0_14 = arith.constant 0 : index
    %c0_15 = arith.constant 0 : index
    %13 = vector.load %arg9[%c1_13, %c0_14, %c0_15] : memref<7x64x128xbf16, #tpu.memory_space<vmem>>, vector<1x64x128xbf16>
    %14 = vector.shape_cast %13 : vector<1x64x128xbf16> to vector<64x128xbf16>
    %cst_16 = arith.constant dense<0.000000e+00> : vector<16x128xf32>
    %15 = tpu.matmul %12, %14, %cst_16 {dimension_numbers = #tpu.dot_dimension_numbers<[1], [0], [0], [1], [0, 0, 1, 1], [], []>} : vector<16x64xf32>, vector<64x128xbf16>, vector<16x128xf32> -> vector<16x128xf32>
    %16 = arith.addf %9, %15 : vector<16x128xf32>
    %c2 = arith.constant 2 : index
    %c0_17 = arith.constant 0 : index
    %c0_18 = arith.constant 0 : index
    %17 = vector.load %arg2[%c2, %c0_17, %c0_18] : memref<7x16x16xf32, #tpu.memory_space<vmem>>, vector<1x16x16xf32>
    %18 = vector.shape_cast %17 : vector<1x16x16xf32> to vector<16x16xf32>
    %cst_19 = arith.constant dense<0.000000e+00> : vector<16x64xf32>
    %19 = tpu.matmul %18, %1, %cst_19 {dimension_numbers = #tpu.dot_dimension_numbers<[1], [0], [0], [1], [0, 0, 1, 1], [], []>} : vector<16x16xf32>, vector<16x64xf32>, vector<16x64xf32> -> vector<16x64xf32>
    %c2_20 = arith.constant 2 : index
    %c0_21 = arith.constant 0 : index
    %c0_22 = arith.constant 0 : index
    %20 = vector.load %arg9[%c2_20, %c0_21, %c0_22] : memref<7x64x128xbf16, #tpu.memory_space<vmem>>, vector<1x64x128xbf16>
    %21 = vector.shape_cast %20 : vector<1x64x128xbf16> to vector<64x128xbf16>
    %cst_23 = arith.constant dense<0.000000e+00> : vector<16x128xf32>
    %22 = tpu.matmul %19, %21, %cst_23 {dimension_numbers = #tpu.dot_dimension_numbers<[1], [0], [0], [1], [0, 0, 1, 1], [], []>} : vector<16x64xf32>, vector<64x128xbf16>, vector<16x128xf32> -> vector<16x128xf32>
    %23 = arith.addf %16, %22 : vector<16x128xf32>
    %c3 = arith.constant 3 : index
    %c0_24 = arith.constant 0 : index
    %c0_25 = arith.constant 0 : index
    %24 = vector.load %arg2[%c3, %c0_24, %c0_25] : memref<7x16x16xf32, #tpu.memory_space<vmem>>, vector<1x16x16xf32>
    %25 = vector.shape_cast %24 : vector<1x16x16xf32> to vector<16x16xf32>
    %cst_26 = arith.constant dense<0.000000e+00> : vector<16x64xf32>
    %26 = tpu.matmul %25, %1, %cst_26 {dimension_numbers = #tpu.dot_dimension_numbers<[1], [0], [0], [1], [0, 0, 1, 1], [], []>} : vector<16x16xf32>, vector<16x64xf32>, vector<16x64xf32> -> vector<16x64xf32>
    %c3_27 = arith.constant 3 : index
    %c0_28 = arith.constant 0 : index
    %c0_29 = arith.constant 0 : index
    %27 = vector.load %arg9[%c3_27, %c0_28, %c0_29] : memref<7x64x128xbf16, #tpu.memory_space<vmem>>, vector<1x64x128xbf16>
    %28 = vector.shape_cast %27 : vector<1x64x128xbf16> to vector<64x128xbf16>
    %cst_30 = arith.constant dense<0.000000e+00> : vector<16x128xf32>
    %29 = tpu.matmul %26, %28, %cst_30 {dimension_numbers = #tpu.dot_dimension_numbers<[1], [0], [0], [1], [0, 0, 1, 1], [], []>} : vector<16x64xf32>, vector<64x128xbf16>, vector<16x128xf32> -> vector<16x128xf32>
    %30 = arith.addf %23, %29 : vector<16x128xf32>
    %c4 = arith.constant 4 : index
    %c0_31 = arith.constant 0 : index
    %c0_32 = arith.constant 0 : index
    %31 = vector.load %arg2[%c4, %c0_31, %c0_32] : memref<7x16x16xf32, #tpu.memory_space<vmem>>, vector<1x16x16xf32>
    %32 = vector.shape_cast %31 : vector<1x16x16xf32> to vector<16x16xf32>
    %cst_33 = arith.constant dense<0.000000e+00> : vector<16x64xf32>
    %33 = tpu.matmul %32, %1, %cst_33 {dimension_numbers = #tpu.dot_dimension_numbers<[1], [0], [0], [1], [0, 0, 1, 1], [], []>} : vector<16x16xf32>, vector<16x64xf32>, vector<16x64xf32> -> vector<16x64xf32>
    %c4_34 = arith.constant 4 : index
    %c0_35 = arith.constant 0 : index
    %c0_36 = arith.constant 0 : index
    %34 = vector.load %arg9[%c4_34, %c0_35, %c0_36] : memref<7x64x128xbf16, #tpu.memory_space<vmem>>, vector<1x64x128xbf16>
    %35 = vector.shape_cast %34 : vector<1x64x128xbf16> to vector<64x128xbf16>
    %cst_37 = arith.constant dense<0.000000e+00> : vector<16x128xf32>
    %36 = tpu.matmul %33, %35, %cst_37 {dimension_numbers = #tpu.dot_dimension_numbers<[1], [0], [0], [1], [0, 0, 1, 1], [], []>} : vector<16x64xf32>, vector<64x128xbf16>, vector<16x128xf32> -> vector<16x128xf32>
    %37 = arith.addf %30, %36 : vector<16x128xf32>
    %c5 = arith.constant 5 : index
    %c0_38 = arith.constant 0 : index
    %c0_39 = arith.constant 0 : index
    %38 = vector.load %arg2[%c5, %c0_38, %c0_39] : memref<7x16x16xf32, #tpu.memory_space<vmem>>, vector<1x16x16xf32>
    %39 = vector.shape_cast %38 : vector<1x16x16xf32> to vector<16x16xf32>
    %cst_40 = arith.constant dense<0.000000e+00> : vector<16x64xf32>
    %40 = tpu.matmul %39, %1, %cst_40 {dimension_numbers = #tpu.dot_dimension_numbers<[1], [0], [0], [1], [0, 0, 1, 1], [], []>} : vector<16x16xf32>, vector<16x64xf32>, vector<16x64xf32> -> vector<16x64xf32>
    %c5_41 = arith.constant 5 : index
    %c0_42 = arith.constant 0 : index
    %c0_43 = arith.constant 0 : index
    %41 = vector.load %arg9[%c5_41, %c0_42, %c0_43] : memref<7x64x128xbf16, #tpu.memory_space<vmem>>, vector<1x64x128xbf16>
    %42 = vector.shape_cast %41 : vector<1x64x128xbf16> to vector<64x128xbf16>
    %cst_44 = arith.constant dense<0.000000e+00> : vector<16x128xf32>
    %43 = tpu.matmul %40, %42, %cst_44 {dimension_numbers = #tpu.dot_dimension_numbers<[1], [0], [0], [1], [0, 0, 1, 1], [], []>} : vector<16x64xf32>, vector<64x128xbf16>, vector<16x128xf32> -> vector<16x128xf32>
    %44 = arith.addf %37, %43 : vector<16x128xf32>
    %c6 = arith.constant 6 : index
    %c0_45 = arith.constant 0 : index
    %c0_46 = arith.constant 0 : index
    %45 = vector.load %arg2[%c6, %c0_45, %c0_46] : memref<7x16x16xf32, #tpu.memory_space<vmem>>, vector<1x16x16xf32>
    %46 = vector.shape_cast %45 : vector<1x16x16xf32> to vector<16x16xf32>
    %cst_47 = arith.constant dense<0.000000e+00> : vector<16x64xf32>
    %47 = tpu.matmul %46, %1, %cst_47 {dimension_numbers = #tpu.dot_dimension_numbers<[1], [0], [0], [1], [0, 0, 1, 1], [], []>} : vector<16x16xf32>, vector<16x64xf32>, vector<16x64xf32> -> vector<16x64xf32>
    %c6_48 = arith.constant 6 : index
    %c0_49 = arith.constant 0 : index
    %c0_50 = arith.constant 0 : index
    %48 = vector.load %arg9[%c6_48, %c0_49, %c0_50] : memref<7x64x128xbf16, #tpu.memory_space<vmem>>, vector<1x64x128xbf16>
    %49 = vector.shape_cast %48 : vector<1x64x128xbf16> to vector<64x128xbf16>
    %cst_51 = arith.constant dense<0.000000e+00> : vector<16x128xf32>
    %50 = tpu.matmul %47, %49, %cst_51 {dimension_numbers = #tpu.dot_dimension_numbers<[1], [0], [0], [1], [0, 0, 1, 1], [], []>} : vector<16x64xf32>, vector<64x128xbf16>, vector<16x128xf32> -> vector<16x128xf32>
    %51 = arith.addf %44, %50 : vector<16x128xf32>
    %c0_52 = arith.constant 0 : index
    %c0_53 = arith.constant 0 : index
    %52 = vector.load %arg16[%c0_52, %c0_53] : memref<7x128xf32, #tpu.memory_space<vmem>>, vector<1x128xf32>
    %53 = vector.broadcast %52 : vector<1x128xf32> to vector<16x128xf32>
    %54 = arith.addf %51, %53 : vector<16x128xf32>
    %c0_54 = arith.constant 0 : index
    %c0_55 = arith.constant 0 : index
    %c0_56 = arith.constant 0 : index
    %55 = vector.load %arg17[%c0_54, %c0_55, %c0_56] : memref<3x128x128xf32, #tpu.memory_space<vmem>>, vector<1x128x128xf32>
    %56 = vector.shape_cast %55 : vector<1x128x128xf32> to vector<128x128xf32>
    %cst_57 = arith.constant dense<0.000000e+00> : vector<16x128xf32>
    %57 = tpu.matmul %54, %56, %cst_57 {dimension_numbers = #tpu.dot_dimension_numbers<[1], [0], [0], [1], [0, 0, 1, 1], [], []>} : vector<16x128xf32>, vector<128x128xf32>, vector<16x128xf32> -> vector<16x128xf32>
    %cst_58 = arith.constant dense<0.000000e+00> : vector<128xf32>
    %58 = vector.multi_reduction <add>, %57, %cst_58 [0] : vector<16x128xf32> to vector<128xf32>
    %59 = vector.shape_cast %58 : vector<128xf32> to vector<1x128xf32>
    %60 = arith.mulf %54, %54 : vector<16x128xf32>
    %cst_59 = arith.constant dense<0.000000e+00> : vector<16x128xf32>
    %61 = tpu.matmul %60, %56, %cst_59 {dimension_numbers = #tpu.dot_dimension_numbers<[1], [0], [0], [1], [0, 0, 1, 1], [], []>} : vector<16x128xf32>, vector<128x128xf32>, vector<16x128xf32> -> vector<16x128xf32>
    %cst_60 = arith.constant dense<0.000000e+00> : vector<128xf32>
    %62 = vector.multi_reduction <add>, %61, %cst_60 [0] : vector<16x128xf32> to vector<128xf32>
    %63 = vector.shape_cast %62 : vector<128xf32> to vector<1x128xf32>
    %64 = arith.mulf %59, %59 : vector<1x128xf32>
    %65 = arith.subf %63, %64 : vector<1x128xf32>
    %cst_61 = arith.constant 0.000000e+00 : f32
    %66 = vector.broadcast %cst_61 : f32 to vector<1x128xf32>
    %67 = arith.maximumf %65, %66 : vector<1x128xf32>
    %68 = vector.broadcast %59 : vector<1x128xf32> to vector<16x128xf32>
    %69 = arith.subf %54, %68 : vector<16x128xf32>
    %cst_62 = arith.constant 9.99999974E-6 : f32
    %70 = vector.broadcast %cst_62 : f32 to vector<1x128xf32>
    %71 = arith.addf %67, %70 : vector<1x128xf32>
    %72 = math.rsqrt %71 : vector<1x128xf32>
    %73 = vector.broadcast %72 : vector<1x128xf32> to vector<16x128xf32>
    %74 = arith.mulf %69, %73 : vector<16x128xf32>
    %cst_63 = arith.constant 0.000000e+00 : f32
    %75 = vector.broadcast %cst_63 : f32 to vector<16x128xf32>
    %76 = arith.maximumf %74, %75 : vector<16x128xf32>
    %cst_64 = arith.constant 0.000000e+00 : f32
    %77 = vector.broadcast %cst_64 : f32 to vector<8x128xf32>
    %c0_65 = arith.constant 0 : index
    %c0_66 = arith.constant 0 : index
    %c0_67 = arith.constant 0 : index
    %78 = vector.load %arg3[%c0_65, %c0_66, %c0_67] : memref<4x8x16xf32, #tpu.memory_space<vmem>>, vector<1x8x16xf32>
    %79 = vector.shape_cast %78 : vector<1x8x16xf32> to vector<8x16xf32>
    %cst_68 = arith.constant dense<0.000000e+00> : vector<8x128xf32>
    %80 = tpu.matmul %79, %76, %cst_68 {dimension_numbers = #tpu.dot_dimension_numbers<[1], [0], [0], [1], [0, 0, 1, 1], [], []>} : vector<8x16xf32>, vector<16x128xf32>, vector<8x128xf32> -> vector<8x128xf32>
    %c0_69 = arith.constant 0 : index
    %c0_70 = arith.constant 0 : index
    %c0_71 = arith.constant 0 : index
    %81 = vector.load %arg10[%c0_69, %c0_70, %c0_71] : memref<4x128x128xbf16, #tpu.memory_space<vmem>>, vector<1x128x128xbf16>
    %82 = vector.shape_cast %81 : vector<1x128x128xbf16> to vector<128x128xbf16>
    %cst_72 = arith.constant dense<0.000000e+00> : vector<8x128xf32>
    %83 = tpu.matmul %80, %82, %cst_72 {dimension_numbers = #tpu.dot_dimension_numbers<[1], [0], [0], [1], [0, 0, 1, 1], [], []>} : vector<8x128xf32>, vector<128x128xbf16>, vector<8x128xf32> -> vector<8x128xf32>
    %84 = arith.addf %77, %83 : vector<8x128xf32>
    %c1_73 = arith.constant 1 : index
    %c0_74 = arith.constant 0 : index
    %c0_75 = arith.constant 0 : index
    %85 = vector.load %arg3[%c1_73, %c0_74, %c0_75] : memref<4x8x16xf32, #tpu.memory_space<vmem>>, vector<1x8x16xf32>
    %86 = vector.shape_cast %85 : vector<1x8x16xf32> to vector<8x16xf32>
    %cst_76 = arith.constant dense<0.000000e+00> : vector<8x128xf32>
    %87 = tpu.matmul %86, %76, %cst_76 {dimension_numbers = #tpu.dot_dimension_numbers<[1], [0], [0], [1], [0, 0, 1, 1], [], []>} : vector<8x16xf32>, vector<16x128xf32>, vector<8x128xf32> -> vector<8x128xf32>
    %c1_77 = arith.constant 1 : index
    %c0_78 = arith.constant 0 : index
    %c0_79 = arith.constant 0 : index
    %88 = vector.load %arg10[%c1_77, %c0_78, %c0_79] : memref<4x128x128xbf16, #tpu.memory_space<vmem>>, vector<1x128x128xbf16>
    %89 = vector.shape_cast %88 : vector<1x128x128xbf16> to vector<128x128xbf16>
    %cst_80 = arith.constant dense<0.000000e+00> : vector<8x128xf32>
    %90 = tpu.matmul %87, %89, %cst_80 {dimension_numbers = #tpu.dot_dimension_numbers<[1], [0], [0], [1], [0, 0, 1, 1], [], []>} : vector<8x128xf32>, vector<128x128xbf16>, vector<8x128xf32> -> vector<8x128xf32>
    %91 = arith.addf %84, %90 : vector<8x128xf32>
    %c2_81 = arith.constant 2 : index
    %c0_82 = arith.constant 0 : index
    %c0_83 = arith.constant 0 : index
    %92 = vector.load %arg3[%c2_81, %c0_82, %c0_83] : memref<4x8x16xf32, #tpu.memory_space<vmem>>, vector<1x8x16xf32>
    %93 = vector.shape_cast %92 : vector<1x8x16xf32> to vector<8x16xf32>
    %cst_84 = arith.constant dense<0.000000e+00> : vector<8x128xf32>
    %94 = tpu.matmul %93, %76, %cst_84 {dimension_numbers = #tpu.dot_dimension_numbers<[1], [0], [0], [1], [0, 0, 1, 1], [], []>} : vector<8x16xf32>, vector<16x128xf32>, vector<8x128xf32> -> vector<8x128xf32>
    %c2_85 = arith.constant 2 : index
    %c0_86 = arith.constant 0 : index
    %c0_87 = arith.constant 0 : index
    %95 = vector.load %arg10[%c2_85, %c0_86, %c0_87] : memref<4x128x128xbf16, #tpu.memory_space<vmem>>, vector<1x128x128xbf16>
    %96 = vector.shape_cast %95 : vector<1x128x128xbf16> to vector<128x128xbf16>
    %cst_88 = arith.constant dense<0.000000e+00> : vector<8x128xf32>
    %97 = tpu.matmul %94, %96, %cst_88 {dimension_numbers = #tpu.dot_dimension_numbers<[1], [0], [0], [1], [0, 0, 1, 1], [], []>} : vector<8x128xf32>, vector<128x128xbf16>, vector<8x128xf32> -> vector<8x128xf32>
    %98 = arith.addf %91, %97 : vector<8x128xf32>
    %c3_89 = arith.constant 3 : index
    %c0_90 = arith.constant 0 : index
    %c0_91 = arith.constant 0 : index
    %99 = vector.load %arg3[%c3_89, %c0_90, %c0_91] : memref<4x8x16xf32, #tpu.memory_space<vmem>>, vector<1x8x16xf32>
    %100 = vector.shape_cast %99 : vector<1x8x16xf32> to vector<8x16xf32>
    %cst_92 = arith.constant dense<0.000000e+00> : vector<8x128xf32>
    %101 = tpu.matmul %100, %76, %cst_92 {dimension_numbers = #tpu.dot_dimension_numbers<[1], [0], [0], [1], [0, 0, 1, 1], [], []>} : vector<8x16xf32>, vector<16x128xf32>, vector<8x128xf32> -> vector<8x128xf32>
    %c3_93 = arith.constant 3 : index
    %c0_94 = arith.constant 0 : index
    %c0_95 = arith.constant 0 : index
    %102 = vector.load %arg10[%c3_93, %c0_94, %c0_95] : memref<4x128x128xbf16, #tpu.memory_space<vmem>>, vector<1x128x128xbf16>
    %103 = vector.shape_cast %102 : vector<1x128x128xbf16> to vector<128x128xbf16>
    %cst_96 = arith.constant dense<0.000000e+00> : vector<8x128xf32>
    %104 = tpu.matmul %101, %103, %cst_96 {dimension_numbers = #tpu.dot_dimension_numbers<[1], [0], [0], [1], [0, 0, 1, 1], [], []>} : vector<8x128xf32>, vector<128x128xbf16>, vector<8x128xf32> -> vector<8x128xf32>
    %105 = arith.addf %98, %104 : vector<8x128xf32>
    %c1_97 = arith.constant 1 : index
    %c0_98 = arith.constant 0 : index
    %106 = vector.load %arg16[%c1_97, %c0_98] : memref<7x128xf32, #tpu.memory_space<vmem>>, vector<1x128xf32>
    %107 = vector.broadcast %106 : vector<1x128xf32> to vector<8x128xf32>
    %108 = arith.addf %105, %107 : vector<8x128xf32>
    %c1_99 = arith.constant 1 : index
    %c0_100 = arith.constant 0 : index
    %c0_101 = arith.constant 0 : index
    %109 = vector.load %arg17[%c1_99, %c0_100, %c0_101] : memref<3x128x128xf32, #tpu.memory_space<vmem>>, vector<1x128x128xf32>
    %110 = vector.shape_cast %109 : vector<1x128x128xf32> to vector<128x128xf32>
    %cst_102 = arith.constant dense<0.000000e+00> : vector<8x128xf32>
    %111 = tpu.matmul %108, %110, %cst_102 {dimension_numbers = #tpu.dot_dimension_numbers<[1], [0], [0], [1], [0, 0, 1, 1], [], []>} : vector<8x128xf32>, vector<128x128xf32>, vector<8x128xf32> -> vector<8x128xf32>
    %cst_103 = arith.constant dense<0.000000e+00> : vector<128xf32>
    %112 = vector.multi_reduction <add>, %111, %cst_103 [0] : vector<8x128xf32> to vector<128xf32>
    %113 = vector.shape_cast %112 : vector<128xf32> to vector<1x128xf32>
    %114 = arith.mulf %108, %108 : vector<8x128xf32>
    %cst_104 = arith.constant dense<0.000000e+00> : vector<8x128xf32>
    %115 = tpu.matmul %114, %110, %cst_104 {dimension_numbers = #tpu.dot_dimension_numbers<[1], [0], [0], [1], [0, 0, 1, 1], [], []>} : vector<8x128xf32>, vector<128x128xf32>, vector<8x128xf32> -> vector<8x128xf32>
    %cst_105 = arith.constant dense<0.000000e+00> : vector<128xf32>
    %116 = vector.multi_reduction <add>, %115, %cst_105 [0] : vector<8x128xf32> to vector<128xf32>
    %117 = vector.shape_cast %116 : vector<128xf32> to vector<1x128xf32>
    %118 = arith.mulf %113, %113 : vector<1x128xf32>
    %119 = arith.subf %117, %118 : vector<1x128xf32>
    %cst_106 = arith.constant 0.000000e+00 : f32
    %120 = vector.broadcast %cst_106 : f32 to vector<1x128xf32>
    %121 = arith.maximumf %119, %120 : vector<1x128xf32>
    %122 = vector.broadcast %113 : vector<1x128xf32> to vector<8x128xf32>
    %123 = arith.subf %108, %122 : vector<8x128xf32>
    %cst_107 = arith.constant 9.99999974E-6 : f32
    %124 = vector.broadcast %cst_107 : f32 to vector<1x128xf32>
    %125 = arith.addf %121, %124 : vector<1x128xf32>
    %126 = math.rsqrt %125 : vector<1x128xf32>
    %127 = vector.broadcast %126 : vector<1x128xf32> to vector<8x128xf32>
    %128 = arith.mulf %123, %127 : vector<8x128xf32>
    %cst_108 = arith.constant 0.000000e+00 : f32
    %129 = vector.broadcast %cst_108 : f32 to vector<8x128xf32>
    %130 = arith.maximumf %128, %129 : vector<8x128xf32>
    %cst_109 = arith.constant 0.000000e+00 : f32
    %131 = vector.broadcast %cst_109 : f32 to vector<4x128xf32>
    %c0_110 = arith.constant 0 : index
    %c0_111 = arith.constant 0 : index
    %c0_112 = arith.constant 0 : index
    %132 = vector.load %arg4[%c0_110, %c0_111, %c0_112] : memref<4x4x8xf32, #tpu.memory_space<vmem>>, vector<1x4x8xf32>
    %133 = vector.shape_cast %132 : vector<1x4x8xf32> to vector<4x8xf32>
    %cst_113 = arith.constant dense<0.000000e+00> : vector<4x128xf32>
    %134 = tpu.matmul %133, %130, %cst_113 {dimension_numbers = #tpu.dot_dimension_numbers<[1], [0], [0], [1], [0, 0, 1, 1], [], []>} : vector<4x8xf32>, vector<8x128xf32>, vector<4x128xf32> -> vector<4x128xf32>
    %c0_114 = arith.constant 0 : index
    %c0_115 = arith.constant 0 : index
    %c0_116 = arith.constant 0 : index
    %135 = vector.load %arg11[%c0_114, %c0_115, %c0_116] : memref<4x128x128xbf16, #tpu.memory_space<vmem>>, vector<1x128x128xbf16>
    %136 = vector.shape_cast %135 : vector<1x128x128xbf16> to vector<128x128xbf16>
    %cst_117 = arith.constant dense<0.000000e+00> : vector<4x128xf32>
    %137 = tpu.matmul %134, %136, %cst_117 {dimension_numbers = #tpu.dot_dimension_numbers<[1], [0], [0], [1], [0, 0, 1, 1], [], []>} : vector<4x128xf32>, vector<128x128xbf16>, vector<4x128xf32> -> vector<4x128xf32>
    %138 = arith.addf %131, %137 : vector<4x128xf32>
    %c1_118 = arith.constant 1 : index
    %c0_119 = arith.constant 0 : index
    %c0_120 = arith.constant 0 : index
    %139 = vector.load %arg4[%c1_118, %c0_119, %c0_120] : memref<4x4x8xf32, #tpu.memory_space<vmem>>, vector<1x4x8xf32>
    %140 = vector.shape_cast %139 : vector<1x4x8xf32> to vector<4x8xf32>
    %cst_121 = arith.constant dense<0.000000e+00> : vector<4x128xf32>
    %141 = tpu.matmul %140, %130, %cst_121 {dimension_numbers = #tpu.dot_dimension_numbers<[1], [0], [0], [1], [0, 0, 1, 1], [], []>} : vector<4x8xf32>, vector<8x128xf32>, vector<4x128xf32> -> vector<4x128xf32>
    %c1_122 = arith.constant 1 : index
    %c0_123 = arith.constant 0 : index
    %c0_124 = arith.constant 0 : index
    %142 = vector.load %arg11[%c1_122, %c0_123, %c0_124] : memref<4x128x128xbf16, #tpu.memory_space<vmem>>, vector<1x128x128xbf16>
    %143 = vector.shape_cast %142 : vector<1x128x128xbf16> to vector<128x128xbf16>
    %cst_125 = arith.constant dense<0.000000e+00> : vector<4x128xf32>
    %144 = tpu.matmul %141, %143, %cst_125 {dimension_numbers = #tpu.dot_dimension_numbers<[1], [0], [0], [1], [0, 0, 1, 1], [], []>} : vector<4x128xf32>, vector<128x128xbf16>, vector<4x128xf32> -> vector<4x128xf32>
    %145 = arith.addf %138, %144 : vector<4x128xf32>
    %c2_126 = arith.constant 2 : index
    %c0_127 = arith.constant 0 : index
    %c0_128 = arith.constant 0 : index
    %146 = vector.load %arg4[%c2_126, %c0_127, %c0_128] : memref<4x4x8xf32, #tpu.memory_space<vmem>>, vector<1x4x8xf32>
    %147 = vector.shape_cast %146 : vector<1x4x8xf32> to vector<4x8xf32>
    %cst_129 = arith.constant dense<0.000000e+00> : vector<4x128xf32>
    %148 = tpu.matmul %147, %130, %cst_129 {dimension_numbers = #tpu.dot_dimension_numbers<[1], [0], [0], [1], [0, 0, 1, 1], [], []>} : vector<4x8xf32>, vector<8x128xf32>, vector<4x128xf32> -> vector<4x128xf32>
    %c2_130 = arith.constant 2 : index
    %c0_131 = arith.constant 0 : index
    %c0_132 = arith.constant 0 : index
    %149 = vector.load %arg11[%c2_130, %c0_131, %c0_132] : memref<4x128x128xbf16, #tpu.memory_space<vmem>>, vector<1x128x128xbf16>
    %150 = vector.shape_cast %149 : vector<1x128x128xbf16> to vector<128x128xbf16>
    %cst_133 = arith.constant dense<0.000000e+00> : vector<4x128xf32>
    %151 = tpu.matmul %148, %150, %cst_133 {dimension_numbers = #tpu.dot_dimension_numbers<[1], [0], [0], [1], [0, 0, 1, 1], [], []>} : vector<4x128xf32>, vector<128x128xbf16>, vector<4x128xf32> -> vector<4x128xf32>
    %152 = arith.addf %145, %151 : vector<4x128xf32>
    %c3_134 = arith.constant 3 : index
    %c0_135 = arith.constant 0 : index
    %c0_136 = arith.constant 0 : index
    %153 = vector.load %arg4[%c3_134, %c0_135, %c0_136] : memref<4x4x8xf32, #tpu.memory_space<vmem>>, vector<1x4x8xf32>
    %154 = vector.shape_cast %153 : vector<1x4x8xf32> to vector<4x8xf32>
    %cst_137 = arith.constant dense<0.000000e+00> : vector<4x128xf32>
    %155 = tpu.matmul %154, %130, %cst_137 {dimension_numbers = #tpu.dot_dimension_numbers<[1], [0], [0], [1], [0, 0, 1, 1], [], []>} : vector<4x8xf32>, vector<8x128xf32>, vector<4x128xf32> -> vector<4x128xf32>
    %c3_138 = arith.constant 3 : index
    %c0_139 = arith.constant 0 : index
    %c0_140 = arith.constant 0 : index
    %156 = vector.load %arg11[%c3_138, %c0_139, %c0_140] : memref<4x128x128xbf16, #tpu.memory_space<vmem>>, vector<1x128x128xbf16>
    %157 = vector.shape_cast %156 : vector<1x128x128xbf16> to vector<128x128xbf16>
    %cst_141 = arith.constant dense<0.000000e+00> : vector<4x128xf32>
    %158 = tpu.matmul %155, %157, %cst_141 {dimension_numbers = #tpu.dot_dimension_numbers<[1], [0], [0], [1], [0, 0, 1, 1], [], []>} : vector<4x128xf32>, vector<128x128xbf16>, vector<4x128xf32> -> vector<4x128xf32>
    %159 = arith.addf %152, %158 : vector<4x128xf32>
    %c2_142 = arith.constant 2 : index
    %c0_143 = arith.constant 0 : index
    %160 = vector.load %arg16[%c2_142, %c0_143] : memref<7x128xf32, #tpu.memory_space<vmem>>, vector<1x128xf32>
    %161 = vector.broadcast %160 : vector<1x128xf32> to vector<4x128xf32>
    %162 = arith.addf %159, %161 : vector<4x128xf32>
    %c2_144 = arith.constant 2 : index
    %c0_145 = arith.constant 0 : index
    %c0_146 = arith.constant 0 : index
    %163 = vector.load %arg17[%c2_144, %c0_145, %c0_146] : memref<3x128x128xf32, #tpu.memory_space<vmem>>, vector<1x128x128xf32>
    %164 = vector.shape_cast %163 : vector<1x128x128xf32> to vector<128x128xf32>
    %cst_147 = arith.constant dense<0.000000e+00> : vector<4x128xf32>
    %165 = tpu.matmul %162, %164, %cst_147 {dimension_numbers = #tpu.dot_dimension_numbers<[1], [0], [0], [1], [0, 0, 1, 1], [], []>} : vector<4x128xf32>, vector<128x128xf32>, vector<4x128xf32> -> vector<4x128xf32>
    %cst_148 = arith.constant dense<0.000000e+00> : vector<128xf32>
    %166 = vector.multi_reduction <add>, %165, %cst_148 [0] : vector<4x128xf32> to vector<128xf32>
    %167 = vector.shape_cast %166 : vector<128xf32> to vector<1x128xf32>
    %168 = arith.mulf %162, %162 : vector<4x128xf32>
    %cst_149 = arith.constant dense<0.000000e+00> : vector<4x128xf32>
    %169 = tpu.matmul %168, %164, %cst_149 {dimension_numbers = #tpu.dot_dimension_numbers<[1], [0], [0], [1], [0, 0, 1, 1], [], []>} : vector<4x128xf32>, vector<128x128xf32>, vector<4x128xf32> -> vector<4x128xf32>
    %cst_150 = arith.constant dense<0.000000e+00> : vector<128xf32>
    %170 = vector.multi_reduction <add>, %169, %cst_150 [0] : vector<4x128xf32> to vector<128xf32>
    %171 = vector.shape_cast %170 : vector<128xf32> to vector<1x128xf32>
    %172 = arith.mulf %167, %167 : vector<1x128xf32>
    %173 = arith.subf %171, %172 : vector<1x128xf32>
    %cst_151 = arith.constant 0.000000e+00 : f32
    %174 = vector.broadcast %cst_151 : f32 to vector<1x128xf32>
    %175 = arith.maximumf %173, %174 : vector<1x128xf32>
    %176 = vector.broadcast %167 : vector<1x128xf32> to vector<4x128xf32>
    %177 = arith.subf %162, %176 : vector<4x128xf32>
    %cst_152 = arith.constant 9.99999974E-6 : f32
    %178 = vector.broadcast %cst_152 : f32 to vector<1x128xf32>
    %179 = arith.addf %175, %178 : vector<1x128xf32>
    %180 = math.rsqrt %179 : vector<1x128xf32>
    %181 = vector.broadcast %180 : vector<1x128xf32> to vector<4x128xf32>
    %182 = arith.mulf %177, %181 : vector<4x128xf32>
    %cst_153 = arith.constant 0.000000e+00 : f32
    %183 = vector.broadcast %cst_153 : f32 to vector<4x128xf32>
    %184 = arith.maximumf %182, %183 : vector<4x128xf32>
    %cst_154 = arith.constant 0.000000e+00 : f32
    %185 = vector.broadcast %cst_154 : f32 to vector<4x128xf32>
    %c0_155 = arith.constant 0 : index
    %c0_156 = arith.constant 0 : index
    %c0_157 = arith.constant 0 : index
    %186 = vector.load %arg5[%c0_155, %c0_156, %c0_157] : memref<3x4x4xf32, #tpu.memory_space<vmem>>, vector<1x4x4xf32>
    %187 = vector.shape_cast %186 : vector<1x4x4xf32> to vector<4x4xf32>
    %cst_158 = arith.constant dense<0.000000e+00> : vector<4x128xf32>
    %188 = tpu.matmul %187, %184, %cst_158 {dimension_numbers = #tpu.dot_dimension_numbers<[1], [0], [0], [1], [0, 0, 1, 1], [], []>} : vector<4x4xf32>, vector<4x128xf32>, vector<4x128xf32> -> vector<4x128xf32>
    %c0_159 = arith.constant 0 : index
    %c0_160 = arith.constant 0 : index
    %c0_161 = arith.constant 0 : index
    %189 = vector.load %arg12[%c0_159, %c0_160, %c0_161] : memref<3x128x128xbf16, #tpu.memory_space<vmem>>, vector<1x128x128xbf16>
    %190 = vector.shape_cast %189 : vector<1x128x128xbf16> to vector<128x128xbf16>
    %cst_162 = arith.constant dense<0.000000e+00> : vector<4x128xf32>
    %191 = tpu.matmul %188, %190, %cst_162 {dimension_numbers = #tpu.dot_dimension_numbers<[1], [0], [0], [1], [0, 0, 1, 1], [], []>} : vector<4x128xf32>, vector<128x128xbf16>, vector<4x128xf32> -> vector<4x128xf32>
    %192 = arith.addf %185, %191 : vector<4x128xf32>
    %c1_163 = arith.constant 1 : index
    %c0_164 = arith.constant 0 : index
    %c0_165 = arith.constant 0 : index
    %193 = vector.load %arg5[%c1_163, %c0_164, %c0_165] : memref<3x4x4xf32, #tpu.memory_space<vmem>>, vector<1x4x4xf32>
    %194 = vector.shape_cast %193 : vector<1x4x4xf32> to vector<4x4xf32>
    %cst_166 = arith.constant dense<0.000000e+00> : vector<4x128xf32>
    %195 = tpu.matmul %194, %184, %cst_166 {dimension_numbers = #tpu.dot_dimension_numbers<[1], [0], [0], [1], [0, 0, 1, 1], [], []>} : vector<4x4xf32>, vector<4x128xf32>, vector<4x128xf32> -> vector<4x128xf32>
    %c1_167 = arith.constant 1 : index
    %c0_168 = arith.constant 0 : index
    %c0_169 = arith.constant 0 : index
    %196 = vector.load %arg12[%c1_167, %c0_168, %c0_169] : memref<3x128x128xbf16, #tpu.memory_space<vmem>>, vector<1x128x128xbf16>
    %197 = vector.shape_cast %196 : vector<1x128x128xbf16> to vector<128x128xbf16>
    %cst_170 = arith.constant dense<0.000000e+00> : vector<4x128xf32>
    %198 = tpu.matmul %195, %197, %cst_170 {dimension_numbers = #tpu.dot_dimension_numbers<[1], [0], [0], [1], [0, 0, 1, 1], [], []>} : vector<4x128xf32>, vector<128x128xbf16>, vector<4x128xf32> -> vector<4x128xf32>
    %199 = arith.addf %192, %198 : vector<4x128xf32>
    %c2_171 = arith.constant 2 : index
    %c0_172 = arith.constant 0 : index
    %c0_173 = arith.constant 0 : index
    %200 = vector.load %arg5[%c2_171, %c0_172, %c0_173] : memref<3x4x4xf32, #tpu.memory_space<vmem>>, vector<1x4x4xf32>
    %201 = vector.shape_cast %200 : vector<1x4x4xf32> to vector<4x4xf32>
    %cst_174 = arith.constant dense<0.000000e+00> : vector<4x128xf32>
    %202 = tpu.matmul %201, %184, %cst_174 {dimension_numbers = #tpu.dot_dimension_numbers<[1], [0], [0], [1], [0, 0, 1, 1], [], []>} : vector<4x4xf32>, vector<4x128xf32>, vector<4x128xf32> -> vector<4x128xf32>
    %c2_175 = arith.constant 2 : index
    %c0_176 = arith.constant 0 : index
    %c0_177 = arith.constant 0 : index
    %203 = vector.load %arg12[%c2_175, %c0_176, %c0_177] : memref<3x128x128xbf16, #tpu.memory_space<vmem>>, vector<1x128x128xbf16>
    %204 = vector.shape_cast %203 : vector<1x128x128xbf16> to vector<128x128xbf16>
    %cst_178 = arith.constant dense<0.000000e+00> : vector<4x128xf32>
    %205 = tpu.matmul %202, %204, %cst_178 {dimension_numbers = #tpu.dot_dimension_numbers<[1], [0], [0], [1], [0, 0, 1, 1], [], []>} : vector<4x128xf32>, vector<128x128xbf16>, vector<4x128xf32> -> vector<4x128xf32>
    %206 = arith.addf %199, %205 : vector<4x128xf32>
    %c3_179 = arith.constant 3 : index
    %c0_180 = arith.constant 0 : index
    %207 = vector.load %arg16[%c3_179, %c0_180] : memref<7x128xf32, #tpu.memory_space<vmem>>, vector<1x128xf32>
    %208 = vector.broadcast %207 : vector<1x128xf32> to vector<4x128xf32>
    %209 = arith.addf %206, %208 : vector<4x128xf32>
    %c2_181 = arith.constant 2 : index
    %c0_182 = arith.constant 0 : index
    %c0_183 = arith.constant 0 : index
    %210 = vector.load %arg17[%c2_181, %c0_182, %c0_183] : memref<3x128x128xf32, #tpu.memory_space<vmem>>, vector<1x128x128xf32>
    %211 = vector.shape_cast %210 : vector<1x128x128xf32> to vector<128x128xf32>
    %cst_184 = arith.constant dense<0.000000e+00> : vector<4x128xf32>
    %212 = tpu.matmul %209, %211, %cst_184 {dimension_numbers = #tpu.dot_dimension_numbers<[1], [0], [0], [1], [0, 0, 1, 1], [], []>} : vector<4x128xf32>, vector<128x128xf32>, vector<4x128xf32> -> vector<4x128xf32>
    %cst_185 = arith.constant dense<0.000000e+00> : vector<128xf32>
    %213 = vector.multi_reduction <add>, %212, %cst_185 [0] : vector<4x128xf32> to vector<128xf32>
    %214 = vector.shape_cast %213 : vector<128xf32> to vector<1x128xf32>
    %215 = arith.mulf %209, %209 : vector<4x128xf32>
    %cst_186 = arith.constant dense<0.000000e+00> : vector<4x128xf32>
    %216 = tpu.matmul %215, %211, %cst_186 {dimension_numbers = #tpu.dot_dimension_numbers<[1], [0], [0], [1], [0, 0, 1, 1], [], []>} : vector<4x128xf32>, vector<128x128xf32>, vector<4x128xf32> -> vector<4x128xf32>
    %cst_187 = arith.constant dense<0.000000e+00> : vector<128xf32>
    %217 = vector.multi_reduction <add>, %216, %cst_187 [0] : vector<4x128xf32> to vector<128xf32>
    %218 = vector.shape_cast %217 : vector<128xf32> to vector<1x128xf32>
    %219 = arith.mulf %214, %214 : vector<1x128xf32>
    %220 = arith.subf %218, %219 : vector<1x128xf32>
    %cst_188 = arith.constant 0.000000e+00 : f32
    %221 = vector.broadcast %cst_188 : f32 to vector<1x128xf32>
    %222 = arith.maximumf %220, %221 : vector<1x128xf32>
    %223 = vector.broadcast %214 : vector<1x128xf32> to vector<4x128xf32>
    %224 = arith.subf %209, %223 : vector<4x128xf32>
    %cst_189 = arith.constant 9.99999974E-6 : f32
    %225 = vector.broadcast %cst_189 : f32 to vector<1x128xf32>
    %226 = arith.addf %222, %225 : vector<1x128xf32>
    %227 = math.rsqrt %226 : vector<1x128xf32>
    %228 = vector.broadcast %227 : vector<1x128xf32> to vector<4x128xf32>
    %229 = arith.mulf %224, %228 : vector<4x128xf32>
    %cst_190 = arith.constant 0.000000e+00 : f32
    %230 = vector.broadcast %cst_190 : f32 to vector<4x128xf32>
    %231 = arith.maximumf %229, %230 : vector<4x128xf32>
    %cst_191 = arith.constant 0.000000e+00 : f32
    %232 = vector.broadcast %cst_191 : f32 to vector<4x128xf32>
    %c0_192 = arith.constant 0 : index
    %c0_193 = arith.constant 0 : index
    %c0_194 = arith.constant 0 : index
    %233 = vector.load %arg6[%c0_192, %c0_193, %c0_194] : memref<3x4x4xf32, #tpu.memory_space<vmem>>, vector<1x4x4xf32>
    %234 = vector.shape_cast %233 : vector<1x4x4xf32> to vector<4x4xf32>
    %cst_195 = arith.constant dense<0.000000e+00> : vector<4x128xf32>
    %235 = tpu.matmul %234, %231, %cst_195 {dimension_numbers = #tpu.dot_dimension_numbers<[1], [0], [0], [1], [0, 0, 1, 1], [], []>} : vector<4x4xf32>, vector<4x128xf32>, vector<4x128xf32> -> vector<4x128xf32>
    %c0_196 = arith.constant 0 : index
    %c0_197 = arith.constant 0 : index
    %c0_198 = arith.constant 0 : index
    %236 = vector.load %arg13[%c0_196, %c0_197, %c0_198] : memref<3x128x128xbf16, #tpu.memory_space<vmem>>, vector<1x128x128xbf16>
    %237 = vector.shape_cast %236 : vector<1x128x128xbf16> to vector<128x128xbf16>
    %cst_199 = arith.constant dense<0.000000e+00> : vector<4x128xf32>
    %238 = tpu.matmul %235, %237, %cst_199 {dimension_numbers = #tpu.dot_dimension_numbers<[1], [0], [0], [1], [0, 0, 1, 1], [], []>} : vector<4x128xf32>, vector<128x128xbf16>, vector<4x128xf32> -> vector<4x128xf32>
    %239 = arith.addf %232, %238 : vector<4x128xf32>
    %c1_200 = arith.constant 1 : index
    %c0_201 = arith.constant 0 : index
    %c0_202 = arith.constant 0 : index
    %240 = vector.load %arg6[%c1_200, %c0_201, %c0_202] : memref<3x4x4xf32, #tpu.memory_space<vmem>>, vector<1x4x4xf32>
    %241 = vector.shape_cast %240 : vector<1x4x4xf32> to vector<4x4xf32>
    %cst_203 = arith.constant dense<0.000000e+00> : vector<4x128xf32>
    %242 = tpu.matmul %241, %231, %cst_203 {dimension_numbers = #tpu.dot_dimension_numbers<[1], [0], [0], [1], [0, 0, 1, 1], [], []>} : vector<4x4xf32>, vector<4x128xf32>, vector<4x128xf32> -> vector<4x128xf32>
    %c1_204 = arith.constant 1 : index
    %c0_205 = arith.constant 0 : index
    %c0_206 = arith.constant 0 : index
    %243 = vector.load %arg13[%c1_204, %c0_205, %c0_206] : memref<3x128x128xbf16, #tpu.memory_space<vmem>>, vector<1x128x128xbf16>
    %244 = vector.shape_cast %243 : vector<1x128x128xbf16> to vector<128x128xbf16>
    %cst_207 = arith.constant dense<0.000000e+00> : vector<4x128xf32>
    %245 = tpu.matmul %242, %244, %cst_207 {dimension_numbers = #tpu.dot_dimension_numbers<[1], [0], [0], [1], [0, 0, 1, 1], [], []>} : vector<4x128xf32>, vector<128x128xbf16>, vector<4x128xf32> -> vector<4x128xf32>
    %246 = arith.addf %239, %245 : vector<4x128xf32>
    %c2_208 = arith.constant 2 : index
    %c0_209 = arith.constant 0 : index
    %c0_210 = arith.constant 0 : index
    %247 = vector.load %arg6[%c2_208, %c0_209, %c0_210] : memref<3x4x4xf32, #tpu.memory_space<vmem>>, vector<1x4x4xf32>
    %248 = vector.shape_cast %247 : vector<1x4x4xf32> to vector<4x4xf32>
    %cst_211 = arith.constant dense<0.000000e+00> : vector<4x128xf32>
    %249 = tpu.matmul %248, %231, %cst_211 {dimension_numbers = #tpu.dot_dimension_numbers<[1], [0], [0], [1], [0, 0, 1, 1], [], []>} : vector<4x4xf32>, vector<4x128xf32>, vector<4x128xf32> -> vector<4x128xf32>
    %c2_212 = arith.constant 2 : index
    %c0_213 = arith.constant 0 : index
    %c0_214 = arith.constant 0 : index
    %250 = vector.load %arg13[%c2_212, %c0_213, %c0_214] : memref<3x128x128xbf16, #tpu.memory_space<vmem>>, vector<1x128x128xbf16>
    %251 = vector.shape_cast %250 : vector<1x128x128xbf16> to vector<128x128xbf16>
    %cst_215 = arith.constant dense<0.000000e+00> : vector<4x128xf32>
    %252 = tpu.matmul %249, %251, %cst_215 {dimension_numbers = #tpu.dot_dimension_numbers<[1], [0], [0], [1], [0, 0, 1, 1], [], []>} : vector<4x128xf32>, vector<128x128xbf16>, vector<4x128xf32> -> vector<4x128xf32>
    %253 = arith.addf %246, %252 : vector<4x128xf32>
    %c4_216 = arith.constant 4 : index
    %c0_217 = arith.constant 0 : index
    %254 = vector.load %arg16[%c4_216, %c0_217] : memref<7x128xf32, #tpu.memory_space<vmem>>, vector<1x128xf32>
    %255 = vector.broadcast %254 : vector<1x128xf32> to vector<4x128xf32>
    %256 = arith.addf %253, %255 : vector<4x128xf32>
    %c2_218 = arith.constant 2 : index
    %c0_219 = arith.constant 0 : index
    %c0_220 = arith.constant 0 : index
    %257 = vector.load %arg17[%c2_218, %c0_219, %c0_220] : memref<3x128x128xf32, #tpu.memory_space<vmem>>, vector<1x128x128xf32>
    %258 = vector.shape_cast %257 : vector<1x128x128xf32> to vector<128x128xf32>
    %cst_221 = arith.constant dense<0.000000e+00> : vector<4x128xf32>
    %259 = tpu.matmul %256, %258, %cst_221 {dimension_numbers = #tpu.dot_dimension_numbers<[1], [0], [0], [1], [0, 0, 1, 1], [], []>} : vector<4x128xf32>, vector<128x128xf32>, vector<4x128xf32> -> vector<4x128xf32>
    %cst_222 = arith.constant dense<0.000000e+00> : vector<128xf32>
    %260 = vector.multi_reduction <add>, %259, %cst_222 [0] : vector<4x128xf32> to vector<128xf32>
    %261 = vector.shape_cast %260 : vector<128xf32> to vector<1x128xf32>
    %262 = arith.mulf %256, %256 : vector<4x128xf32>
    %cst_223 = arith.constant dense<0.000000e+00> : vector<4x128xf32>
    %263 = tpu.matmul %262, %258, %cst_223 {dimension_numbers = #tpu.dot_dimension_numbers<[1], [0], [0], [1], [0, 0, 1, 1], [], []>} : vector<4x128xf32>, vector<128x128xf32>, vector<4x128xf32> -> vector<4x128xf32>
    %cst_224 = arith.constant dense<0.000000e+00> : vector<128xf32>
    %264 = vector.multi_reduction <add>, %263, %cst_224 [0] : vector<4x128xf32> to vector<128xf32>
    %265 = vector.shape_cast %264 : vector<128xf32> to vector<1x128xf32>
    %266 = arith.mulf %261, %261 : vector<1x128xf32>
    %267 = arith.subf %265, %266 : vector<1x128xf32>
    %cst_225 = arith.constant 0.000000e+00 : f32
    %268 = vector.broadcast %cst_225 : f32 to vector<1x128xf32>
    %269 = arith.maximumf %267, %268 : vector<1x128xf32>
    %270 = vector.broadcast %261 : vector<1x128xf32> to vector<4x128xf32>
    %271 = arith.subf %256, %270 : vector<4x128xf32>
    %cst_226 = arith.constant 9.99999974E-6 : f32
    %272 = vector.broadcast %cst_226 : f32 to vector<1x128xf32>
    %273 = arith.addf %269, %272 : vector<1x128xf32>
    %274 = math.rsqrt %273 : vector<1x128xf32>
    %275 = vector.broadcast %274 : vector<1x128xf32> to vector<4x128xf32>
    %276 = arith.mulf %271, %275 : vector<4x128xf32>
    %277 = arith.addf %276, %184 : vector<4x128xf32>
    %cst_227 = arith.constant 0.000000e+00 : f32
    %278 = vector.broadcast %cst_227 : f32 to vector<4x128xf32>
    %c0_228 = arith.constant 0 : index
    %c0_229 = arith.constant 0 : index
    %c0_230 = arith.constant 0 : index
    %279 = vector.load %arg7[%c0_228, %c0_229, %c0_230] : memref<3x4x4xf32, #tpu.memory_space<vmem>>, vector<1x4x4xf32>
    %280 = vector.shape_cast %279 : vector<1x4x4xf32> to vector<4x4xf32>
    %cst_231 = arith.constant dense<0.000000e+00> : vector<4x128xf32>
    %281 = tpu.matmul %280, %277, %cst_231 {dimension_numbers = #tpu.dot_dimension_numbers<[1], [0], [0], [1], [0, 0, 1, 1], [], []>} : vector<4x4xf32>, vector<4x128xf32>, vector<4x128xf32> -> vector<4x128xf32>
    %c0_232 = arith.constant 0 : index
    %c0_233 = arith.constant 0 : index
    %c0_234 = arith.constant 0 : index
    %282 = vector.load %arg14[%c0_232, %c0_233, %c0_234] : memref<3x128x128xbf16, #tpu.memory_space<vmem>>, vector<1x128x128xbf16>
    %283 = vector.shape_cast %282 : vector<1x128x128xbf16> to vector<128x128xbf16>
    %cst_235 = arith.constant dense<0.000000e+00> : vector<4x128xf32>
    %284 = tpu.matmul %281, %283, %cst_235 {dimension_numbers = #tpu.dot_dimension_numbers<[1], [0], [0], [1], [0, 0, 1, 1], [], []>} : vector<4x128xf32>, vector<128x128xbf16>, vector<4x128xf32> -> vector<4x128xf32>
    %285 = arith.addf %278, %284 : vector<4x128xf32>
    %c1_236 = arith.constant 1 : index
    %c0_237 = arith.constant 0 : index
    %c0_238 = arith.constant 0 : index
    %286 = vector.load %arg7[%c1_236, %c0_237, %c0_238] : memref<3x4x4xf32, #tpu.memory_space<vmem>>, vector<1x4x4xf32>
    %287 = vector.shape_cast %286 : vector<1x4x4xf32> to vector<4x4xf32>
    %cst_239 = arith.constant dense<0.000000e+00> : vector<4x128xf32>
    %288 = tpu.matmul %287, %277, %cst_239 {dimension_numbers = #tpu.dot_dimension_numbers<[1], [0], [0], [1], [0, 0, 1, 1], [], []>} : vector<4x4xf32>, vector<4x128xf32>, vector<4x128xf32> -> vector<4x128xf32>
    %c1_240 = arith.constant 1 : index
    %c0_241 = arith.constant 0 : index
    %c0_242 = arith.constant 0 : index
    %289 = vector.load %arg14[%c1_240, %c0_241, %c0_242] : memref<3x128x128xbf16, #tpu.memory_space<vmem>>, vector<1x128x128xbf16>
    %290 = vector.shape_cast %289 : vector<1x128x128xbf16> to vector<128x128xbf16>
    %cst_243 = arith.constant dense<0.000000e+00> : vector<4x128xf32>
    %291 = tpu.matmul %288, %290, %cst_243 {dimension_numbers = #tpu.dot_dimension_numbers<[1], [0], [0], [1], [0, 0, 1, 1], [], []>} : vector<4x128xf32>, vector<128x128xbf16>, vector<4x128xf32> -> vector<4x128xf32>
    %292 = arith.addf %285, %291 : vector<4x128xf32>
    %c2_244 = arith.constant 2 : index
    %c0_245 = arith.constant 0 : index
    %c0_246 = arith.constant 0 : index
    %293 = vector.load %arg7[%c2_244, %c0_245, %c0_246] : memref<3x4x4xf32, #tpu.memory_space<vmem>>, vector<1x4x4xf32>
    %294 = vector.shape_cast %293 : vector<1x4x4xf32> to vector<4x4xf32>
    %cst_247 = arith.constant dense<0.000000e+00> : vector<4x128xf32>
    %295 = tpu.matmul %294, %277, %cst_247 {dimension_numbers = #tpu.dot_dimension_numbers<[1], [0], [0], [1], [0, 0, 1, 1], [], []>} : vector<4x4xf32>, vector<4x128xf32>, vector<4x128xf32> -> vector<4x128xf32>
    %c2_248 = arith.constant 2 : index
    %c0_249 = arith.constant 0 : index
    %c0_250 = arith.constant 0 : index
    %296 = vector.load %arg14[%c2_248, %c0_249, %c0_250] : memref<3x128x128xbf16, #tpu.memory_space<vmem>>, vector<1x128x128xbf16>
    %297 = vector.shape_cast %296 : vector<1x128x128xbf16> to vector<128x128xbf16>
    %cst_251 = arith.constant dense<0.000000e+00> : vector<4x128xf32>
    %298 = tpu.matmul %295, %297, %cst_251 {dimension_numbers = #tpu.dot_dimension_numbers<[1], [0], [0], [1], [0, 0, 1, 1], [], []>} : vector<4x128xf32>, vector<128x128xbf16>, vector<4x128xf32> -> vector<4x128xf32>
    %299 = arith.addf %292, %298 : vector<4x128xf32>
    %c5_252 = arith.constant 5 : index
    %c0_253 = arith.constant 0 : index
    %300 = vector.load %arg16[%c5_252, %c0_253] : memref<7x128xf32, #tpu.memory_space<vmem>>, vector<1x128xf32>
    %301 = vector.broadcast %300 : vector<1x128xf32> to vector<4x128xf32>
    %302 = arith.addf %299, %301 : vector<4x128xf32>
    %c2_254 = arith.constant 2 : index
    %c0_255 = arith.constant 0 : index
    %c0_256 = arith.constant 0 : index
    %303 = vector.load %arg17[%c2_254, %c0_255, %c0_256] : memref<3x128x128xf32, #tpu.memory_space<vmem>>, vector<1x128x128xf32>
    %304 = vector.shape_cast %303 : vector<1x128x128xf32> to vector<128x128xf32>
    %cst_257 = arith.constant dense<0.000000e+00> : vector<4x128xf32>
    %305 = tpu.matmul %302, %304, %cst_257 {dimension_numbers = #tpu.dot_dimension_numbers<[1], [0], [0], [1], [0, 0, 1, 1], [], []>} : vector<4x128xf32>, vector<128x128xf32>, vector<4x128xf32> -> vector<4x128xf32>
    %cst_258 = arith.constant dense<0.000000e+00> : vector<128xf32>
    %306 = vector.multi_reduction <add>, %305, %cst_258 [0] : vector<4x128xf32> to vector<128xf32>
    %307 = vector.shape_cast %306 : vector<128xf32> to vector<1x128xf32>
    %308 = arith.mulf %302, %302 : vector<4x128xf32>
    %cst_259 = arith.constant dense<0.000000e+00> : vector<4x128xf32>
    %309 = tpu.matmul %308, %304, %cst_259 {dimension_numbers = #tpu.dot_dimension_numbers<[1], [0], [0], [1], [0, 0, 1, 1], [], []>} : vector<4x128xf32>, vector<128x128xf32>, vector<4x128xf32> -> vector<4x128xf32>
    %cst_260 = arith.constant dense<0.000000e+00> : vector<128xf32>
    %310 = vector.multi_reduction <add>, %309, %cst_260 [0] : vector<4x128xf32> to vector<128xf32>
    %311 = vector.shape_cast %310 : vector<128xf32> to vector<1x128xf32>
    %312 = arith.mulf %307, %307 : vector<1x128xf32>
    %313 = arith.subf %311, %312 : vector<1x128xf32>
    %cst_261 = arith.constant 0.000000e+00 : f32
    %314 = vector.broadcast %cst_261 : f32 to vector<1x128xf32>
    %315 = arith.maximumf %313, %314 : vector<1x128xf32>
    %316 = vector.broadcast %307 : vector<1x128xf32> to vector<4x128xf32>
    %317 = arith.subf %302, %316 : vector<4x128xf32>
    %cst_262 = arith.constant 9.99999974E-6 : f32
    %318 = vector.broadcast %cst_262 : f32 to vector<1x128xf32>
    %319 = arith.addf %315, %318 : vector<1x128xf32>
    %320 = math.rsqrt %319 : vector<1x128xf32>
    %321 = vector.broadcast %320 : vector<1x128xf32> to vector<4x128xf32>
    %322 = arith.mulf %317, %321 : vector<4x128xf32>
    %cst_263 = arith.constant 0.000000e+00 : f32
    %323 = vector.broadcast %cst_263 : f32 to vector<4x128xf32>
    %324 = arith.maximumf %322, %323 : vector<4x128xf32>
    %cst_264 = arith.constant 0.000000e+00 : f32
    %325 = vector.broadcast %cst_264 : f32 to vector<4x128xf32>
    %c0_265 = arith.constant 0 : index
    %c0_266 = arith.constant 0 : index
    %c0_267 = arith.constant 0 : index
    %326 = vector.load %arg8[%c0_265, %c0_266, %c0_267] : memref<3x4x4xf32, #tpu.memory_space<vmem>>, vector<1x4x4xf32>
    %327 = vector.shape_cast %326 : vector<1x4x4xf32> to vector<4x4xf32>
    %cst_268 = arith.constant dense<0.000000e+00> : vector<4x128xf32>
    %328 = tpu.matmul %327, %324, %cst_268 {dimension_numbers = #tpu.dot_dimension_numbers<[1], [0], [0], [1], [0, 0, 1, 1], [], []>} : vector<4x4xf32>, vector<4x128xf32>, vector<4x128xf32> -> vector<4x128xf32>
    %c0_269 = arith.constant 0 : index
    %c0_270 = arith.constant 0 : index
    %c0_271 = arith.constant 0 : index
    %329 = vector.load %arg15[%c0_269, %c0_270, %c0_271] : memref<3x128x128xbf16, #tpu.memory_space<vmem>>, vector<1x128x128xbf16>
    %330 = vector.shape_cast %329 : vector<1x128x128xbf16> to vector<128x128xbf16>
    %cst_272 = arith.constant dense<0.000000e+00> : vector<4x128xf32>
    %331 = tpu.matmul %328, %330, %cst_272 {dimension_numbers = #tpu.dot_dimension_numbers<[1], [0], [0], [1], [0, 0, 1, 1], [], []>} : vector<4x128xf32>, vector<128x128xbf16>, vector<4x128xf32> -> vector<4x128xf32>
    %332 = arith.addf %325, %331 : vector<4x128xf32>
    %c1_273 = arith.constant 1 : index
    %c0_274 = arith.constant 0 : index
    %c0_275 = arith.constant 0 : index
    %333 = vector.load %arg8[%c1_273, %c0_274, %c0_275] : memref<3x4x4xf32, #tpu.memory_space<vmem>>, vector<1x4x4xf32>
    %334 = vector.shape_cast %333 : vector<1x4x4xf32> to vector<4x4xf32>
    %cst_276 = arith.constant dense<0.000000e+00> : vector<4x128xf32>
    %335 = tpu.matmul %334, %324, %cst_276 {dimension_numbers = #tpu.dot_dimension_numbers<[1], [0], [0], [1], [0, 0, 1, 1], [], []>} : vector<4x4xf32>, vector<4x128xf32>, vector<4x128xf32> -> vector<4x128xf32>
    %c1_277 = arith.constant 1 : index
    %c0_278 = arith.constant 0 : index
    %c0_279 = arith.constant 0 : index
    %336 = vector.load %arg15[%c1_277, %c0_278, %c0_279] : memref<3x128x128xbf16, #tpu.memory_space<vmem>>, vector<1x128x128xbf16>
    %337 = vector.shape_cast %336 : vector<1x128x128xbf16> to vector<128x128xbf16>
    %cst_280 = arith.constant dense<0.000000e+00> : vector<4x128xf32>
    %338 = tpu.matmul %335, %337, %cst_280 {dimension_numbers = #tpu.dot_dimension_numbers<[1], [0], [0], [1], [0, 0, 1, 1], [], []>} : vector<4x128xf32>, vector<128x128xbf16>, vector<4x128xf32> -> vector<4x128xf32>
    %339 = arith.addf %332, %338 : vector<4x128xf32>
    %c2_281 = arith.constant 2 : index
    %c0_282 = arith.constant 0 : index
    %c0_283 = arith.constant 0 : index
    %340 = vector.load %arg8[%c2_281, %c0_282, %c0_283] : memref<3x4x4xf32, #tpu.memory_space<vmem>>, vector<1x4x4xf32>
    %341 = vector.shape_cast %340 : vector<1x4x4xf32> to vector<4x4xf32>
    %cst_284 = arith.constant dense<0.000000e+00> : vector<4x128xf32>
    %342 = tpu.matmul %341, %324, %cst_284 {dimension_numbers = #tpu.dot_dimension_numbers<[1], [0], [0], [1], [0, 0, 1, 1], [], []>} : vector<4x4xf32>, vector<4x128xf32>, vector<4x128xf32> -> vector<4x128xf32>
    %c2_285 = arith.constant 2 : index
    %c0_286 = arith.constant 0 : index
    %c0_287 = arith.constant 0 : index
    %343 = vector.load %arg15[%c2_285, %c0_286, %c0_287] : memref<3x128x128xbf16, #tpu.memory_space<vmem>>, vector<1x128x128xbf16>
    %344 = vector.shape_cast %343 : vector<1x128x128xbf16> to vector<128x128xbf16>
    %cst_288 = arith.constant dense<0.000000e+00> : vector<4x128xf32>
    %345 = tpu.matmul %342, %344, %cst_288 {dimension_numbers = #tpu.dot_dimension_numbers<[1], [0], [0], [1], [0, 0, 1, 1], [], []>} : vector<4x128xf32>, vector<128x128xbf16>, vector<4x128xf32> -> vector<4x128xf32>
    %346 = arith.addf %339, %345 : vector<4x128xf32>
    %c6_289 = arith.constant 6 : index
    %c0_290 = arith.constant 0 : index
    %347 = vector.load %arg16[%c6_289, %c0_290] : memref<7x128xf32, #tpu.memory_space<vmem>>, vector<1x128xf32>
    %348 = vector.broadcast %347 : vector<1x128xf32> to vector<4x128xf32>
    %349 = arith.addf %346, %348 : vector<4x128xf32>
    %c2_291 = arith.constant 2 : index
    %c0_292 = arith.constant 0 : index
    %c0_293 = arith.constant 0 : index
    %350 = vector.load %arg17[%c2_291, %c0_292, %c0_293] : memref<3x128x128xf32, #tpu.memory_space<vmem>>, vector<1x128x128xf32>
    %351 = vector.shape_cast %350 : vector<1x128x128xf32> to vector<128x128xf32>
    %cst_294 = arith.constant dense<0.000000e+00> : vector<4x128xf32>
    %352 = tpu.matmul %349, %351, %cst_294 {dimension_numbers = #tpu.dot_dimension_numbers<[1], [0], [0], [1], [0, 0, 1, 1], [], []>} : vector<4x128xf32>, vector<128x128xf32>, vector<4x128xf32> -> vector<4x128xf32>
    %cst_295 = arith.constant dense<0.000000e+00> : vector<128xf32>
    %353 = vector.multi_reduction <add>, %352, %cst_295 [0] : vector<4x128xf32> to vector<128xf32>
    %354 = vector.shape_cast %353 : vector<128xf32> to vector<1x128xf32>
    %355 = arith.mulf %349, %349 : vector<4x128xf32>
    %cst_296 = arith.constant dense<0.000000e+00> : vector<4x128xf32>
    %356 = tpu.matmul %355, %351, %cst_296 {dimension_numbers = #tpu.dot_dimension_numbers<[1], [0], [0], [1], [0, 0, 1, 1], [], []>} : vector<4x128xf32>, vector<128x128xf32>, vector<4x128xf32> -> vector<4x128xf32>
    %cst_297 = arith.constant dense<0.000000e+00> : vector<128xf32>
    %357 = vector.multi_reduction <add>, %356, %cst_297 [0] : vector<4x128xf32> to vector<128xf32>
    %358 = vector.shape_cast %357 : vector<128xf32> to vector<1x128xf32>
    %359 = arith.mulf %354, %354 : vector<1x128xf32>
    %360 = arith.subf %358, %359 : vector<1x128xf32>
    %cst_298 = arith.constant 0.000000e+00 : f32
    %361 = vector.broadcast %cst_298 : f32 to vector<1x128xf32>
    %362 = arith.maximumf %360, %361 : vector<1x128xf32>
    %363 = vector.broadcast %354 : vector<1x128xf32> to vector<4x128xf32>
    %364 = arith.subf %349, %363 : vector<4x128xf32>
    %cst_299 = arith.constant 9.99999974E-6 : f32
    %365 = vector.broadcast %cst_299 : f32 to vector<1x128xf32>
    %366 = arith.addf %362, %365 : vector<1x128xf32>
    %367 = math.rsqrt %366 : vector<1x128xf32>
    %368 = vector.broadcast %367 : vector<1x128xf32> to vector<4x128xf32>
    %369 = arith.mulf %364, %368 : vector<4x128xf32>
    %370 = arith.addf %369, %277 : vector<4x128xf32>
    %c0_300 = arith.constant 0 : index
    %c0_301 = arith.constant 0 : index
    %c0_302 = arith.constant 0 : index
    %371 = vector.load %arg18[%c0_300, %c0_301, %c0_302] : memref<1x4x128xf32, #tpu.memory_space<vmem>>, vector<1x4x128xf32>
    %372 = vector.shape_cast %371 : vector<1x4x128xf32> to vector<4x128xf32>
    %373 = vector.shape_cast %370 : vector<4x128xf32> to vector<1x4x128xf32>
    tpu.vector_store %arg18[%c0_300, %c0_301, %c0_302], %373 {strides = array<i32>} : memref<1x4x128xf32, #tpu.memory_space<vmem>>, vector<1x4x128xf32>,
    return
  }
  func.func @transform_0(%arg0: i32) -> (i32, i32, i32) {
    %c0_i32 = arith.constant 0 : i32
    %c0_i32_0 = arith.constant 0 : i32
    %c0_i32_1 = arith.constant 0 : i32
    return %arg0, %c0_i32, %c0_i32_0 : i32, i32, i32
  }
  func.func @transform_1(%arg0: i32) -> (i32, i32, i32) {
    %c0_i32 = arith.constant 0 : i32
    %c0_i32_0 = arith.constant 0 : i32
    %c0_i32_1 = arith.constant 0 : i32
    %c0_i32_2 = arith.constant 0 : i32
    return %c0_i32, %c0_i32_0, %c0_i32_1 : i32, i32, i32
  }
  func.func @transform_2(%arg0: i32) -> (i32, i32, i32) {
    %c0_i32 = arith.constant 0 : i32
    %c0_i32_0 = arith.constant 0 : i32
    %c0_i32_1 = arith.constant 0 : i32
    %c0_i32_2 = arith.constant 0 : i32
    return %c0_i32, %c0_i32_0, %c0_i32_1 : i32, i32, i32
  }
  func.func @transform_3(%arg0: i32) -> (i32, i32, i32) {
    %c0_i32 = arith.constant 0 : i32
    %c0_i32_0 = arith.constant 0 : i32
    %c0_i32_1 = arith.constant 0 : i32
    %c0_i32_2 = arith.constant 0 : i32
    return %c0_i32, %c0_i32_0, %c0_i32_1 : i32, i32, i32
  }
  func.func @transform_4(%arg0: i32) -> (i32, i32, i32) {
    %c0_i32 = arith.constant 0 : i32
    %c0_i32_0 = arith.constant 0 : i32
    %c0_i32_1 = arith.constant 0 : i32
    %c0_i32_2 = arith.constant 0 : i32
    return %c0_i32, %c0_i32_0, %c0_i32_1 : i32, i32, i32
  }
  func.func @transform_5(%arg0: i32) -> (i32, i32, i32) {
    %c0_i32 = arith.constant 0 : i32
    %c0_i32_0 = arith.constant 0 : i32
    %c0_i32_1 = arith.constant 0 : i32
    %c0_i32_2 = arith.constant 0 : i32
    return %c0_i32, %c0_i32_0, %c0_i32_1 : i32, i32, i32
  }
  func.func @transform_6(%arg0: i32) -> (i32, i32, i32) {
    %c0_i32 = arith.constant 0 : i32
    %c0_i32_0 = arith.constant 0 : i32
    %c0_i32_1 = arith.constant 0 : i32
    %c0_i32_2 = arith.constant 0 : i32
    return %c0_i32, %c0_i32_0, %c0_i32_1 : i32, i32, i32
  }
  func.func @transform_7(%arg0: i32) -> (i32, i32, i32) {
    %c0_i32 = arith.constant 0 : i32
    %c0_i32_0 = arith.constant 0 : i32
    %c0_i32_1 = arith.constant 0 : i32
    %c0_i32_2 = arith.constant 0 : i32
    return %c0_i32, %c0_i32_0, %c0_i32_1 : i32, i32, i32
  }
  func.func @transform_8(%arg0: i32) -> (i32, i32, i32) {
    %c0_i32 = arith.constant 0 : i32
    %c0_i32_0 = arith.constant 0 : i32
    %c0_i32_1 = arith.constant 0 : i32
    %c0_i32_2 = arith.constant 0 : i32
    return %c0_i32, %c0_i32_0, %c0_i32_1 : i32, i32, i32
  }
  func.func @transform_9(%arg0: i32) -> (i32, i32, i32) {
    %c0_i32 = arith.constant 0 : i32
    %c0_i32_0 = arith.constant 0 : i32
    %c0_i32_1 = arith.constant 0 : i32
    %c0_i32_2 = arith.constant 0 : i32
    return %c0_i32, %c0_i32_0, %c0_i32_1 : i32, i32, i32
  }
  func.func @transform_10(%arg0: i32) -> (i32, i32, i32) {
    %c0_i32 = arith.constant 0 : i32
    %c0_i32_0 = arith.constant 0 : i32
    %c0_i32_1 = arith.constant 0 : i32
    %c0_i32_2 = arith.constant 0 : i32
    return %c0_i32, %c0_i32_0, %c0_i32_1 : i32, i32, i32
  }
  func.func @transform_11(%arg0: i32) -> (i32, i32, i32) {
    %c0_i32 = arith.constant 0 : i32
    %c0_i32_0 = arith.constant 0 : i32
    %c0_i32_1 = arith.constant 0 : i32
    %c0_i32_2 = arith.constant 0 : i32
    return %c0_i32, %c0_i32_0, %c0_i32_1 : i32, i32, i32
  }
  func.func @transform_12(%arg0: i32) -> (i32, i32, i32) {
    %c0_i32 = arith.constant 0 : i32
    %c0_i32_0 = arith.constant 0 : i32
    %c0_i32_1 = arith.constant 0 : i32
    %c0_i32_2 = arith.constant 0 : i32
    return %c0_i32, %c0_i32_0, %c0_i32_1 : i32, i32, i32
  }
  func.func @transform_13(%arg0: i32) -> (i32, i32, i32) {
    %c0_i32 = arith.constant 0 : i32
    %c0_i32_0 = arith.constant 0 : i32
    %c0_i32_1 = arith.constant 0 : i32
    %c0_i32_2 = arith.constant 0 : i32
    return %c0_i32, %c0_i32_0, %c0_i32_1 : i32, i32, i32
  }
  func.func @transform_14(%arg0: i32) -> (i32, i32, i32) {
    %c0_i32 = arith.constant 0 : i32
    %c0_i32_0 = arith.constant 0 : i32
    %c0_i32_1 = arith.constant 0 : i32
    %c0_i32_2 = arith.constant 0 : i32
    return %c0_i32, %c0_i32_0, %c0_i32_1 : i32, i32, i32
  }
  func.func @transform_15(%arg0: i32) -> (i32, i32) {
    %c0_i32 = arith.constant 0 : i32
    %c0_i32_0 = arith.constant 0 : i32
    %c0_i32_1 = arith.constant 0 : i32
    return %c0_i32, %c0_i32_0 : i32, i32
  }
  func.func @transform_16(%arg0: i32) -> (i32, i32, i32) {
    %c0_i32 = arith.constant 0 : i32
    %c0_i32_0 = arith.constant 0 : i32
    %c0_i32_1 = arith.constant 0 : i32
    %c0_i32_2 = arith.constant 0 : i32
    return %c0_i32, %c0_i32_0, %c0_i32_1 : i32, i32, i32
  }
  func.func @transform_17(%arg0: i32) -> (i32, i32, i32) {
    %c0_i32 = arith.constant 0 : i32
    %c0_i32_0 = arith.constant 0 : i32
    %c0_i32_1 = arith.constant 0 : i32
    return %arg0, %c0_i32, %c0_i32_0 : i32, i32, i32
  }
}

</mosaic_0001>

<bundles_post_ra>
// kernel: tpu_custom_call.1
= control target key start
LH: loop header
LB: loop body
LE: loop exit
PB: predicated region body
PF: predicated region fallthrough
CT: control target
= control target key end

     0   :  { %s11447_s0 = inlined_call_operand.hbm [shape: f32[2,16,64], index: 0, kind: input, shape index: {}]   ;;  %s11448_s1 = inlined_call_operand.hbm [shape: f32[7,16,16], index: 1, kind: input, shape index: {}]   ;;  %s11449_s2 = inlined_call_operand.hbm [shape: f32[4,8,16], index: 2, kind: input, shape index: {}]   ;;  %s11450_s3 = inlined_call_operand.hbm [shape: f32[4,4,8], index: 3, kind: input, shape index: {}]   ;;  %s11451_s4 = inlined_call_operand.vmem [shape: f32[3,4,4], index: 4, kind: input, shape index: {}]   ;;  %s11452_s5 = inlined_call_operand.hbm [shape: f32[3,4,4], index: 5, kind: input, shape index: {}]   ;;  %s11453_s6 = inlined_call_operand.hbm [shape: f32[3,4,4], index: 6, kind: input, shape index: {}]   ;;  %s11454_s7 = inlined_call_operand.vmem [shape: f32[3,4,4], index: 7, kind: input, shape index: {}]   ;;  %s11455_s8 = inlined_call_operand.hbm [shape: bf16[7,64,128], index: 8, kind: input, shape index: {}]   ;;  %s11456_s9 = inlined_call_operand.hbm [shape: bf16[4,128,128], index: 9, kind: input, shape index: {}]   ;;  %s11457_s10 = inlined_call_operand.hbm [shape: bf16[4,128,128], index: 10, kind: input, shape index: {}]   ;;  %s11458_s11 = inlined_call_operand.hbm [shape: bf16[3,128,128], index: 11, kind: input, shape index: {}]   ;;  %s11459_s12 = inlined_call_operand.hbm [shape: bf16[3,128,128], index: 12, kind: input, shape index: {}]   ;;  %s11460_s13 = inlined_call_operand.hbm [shape: bf16[3,128,128], index: 13, kind: input, shape index: {}]   ;;  %s11461_s14 = inlined_call_operand.hbm [shape: bf16[3,128,128], index: 14, kind: input, shape index: {}]   ;;  %s11462_s15 = inlined_call_operand.vmem [shape: f32[7,128], index: 15, kind: input, shape index: {}]   ;;  %s11463_s16 = inlined_call_operand.hbm [shape: f32[3,128,128], index: 16, kind: input, shape index: {}]   ;;  %s11464_s17 = inlined_call_operand.hbm [shape: f32[2,4,128], index: 17, kind: output, shape index: {}]  }
   0x1   :  { %11488 = sst [smem:[#allocation39_spill]] %s11447_s0 }
   0x2   :  { %11489 = sst [smem:[#allocation40_spill]] %s11448_s1 }
   0x3   :  { %11490 = sst [smem:[#allocation41_spill]] %s11449_s2 }
   0x4   :  { %11491 = sst [smem:[#allocation42_spill]] %s11450_s3 }
   0x5   :  { %11492 = sst [smem:[#allocation43_spill]] %s11451_s4 }
   0x6   :  { %11493 = sst [smem:[#allocation44_spill]] %s11452_s5 }
   0x7   :  { %11494 = sst [smem:[#allocation45_spill]] %s11453_s6 }
   0x8   :  { %11495 = sst [smem:[#allocation46_spill]] %s11454_s7 }
   0x9   :  { %11496 = sst [smem:[#allocation47_spill]] %s11462_s15 }
   0xa   :  { %11497 = sst [smem:[#allocation48_spill]] %s11464_s17 }
   0xb   :  { %22 = vsyncpa [#allocation3], 0 }
   0xc   :  { %24 = vsyncpa [#allocation3 + $0x1], 0 }
   0xd   :  { %25 = vsyncpa [#allocation6], 0 }
   0xe   :  { %26 = vsyncpa [#allocation9], 0 }
   0xf   :  { %27 = vsyncpa [#allocation12], 0 }
  0x10   :  { %28 = vsyncpa [#allocation15], 0 }
  0x11   :  { %29 = vsyncpa [#allocation18], 0 }
  0x12   :  { %30 = vsyncpa [#allocation21], 0 }
  0x13   :  { %31 = vsyncpa [#allocation24], 0 }
  0x14   :  { %32 = vsyncpa [#allocation4], 0 }
  0x15   :  { %34 = vsyncpa [#allocation4 + $0x1], 0  ;;  %s10286_s24 = smov 0   ;;  %s10288_s25 = smov 0  }
  0x16   :  { %s10290_s26 = smov 0   ;;  %s10292_s27 = smov 0  }
  0x17 LB: > { %11498 = sst [smem:[#allocation35_spill]] %s10160_s24  ;;  %s10174_s28 = smov [#allocation5]   ;;  %s10172_s27 = sphi %s10292_s27, %s11553_s27   ;;  %s10168_s26 = sphi %s10290_s26, %s11552_s26   ;;  %s10164_s25 = sphi %s10288_s25, %s11551_s25   ;;  %s10160_s24 = sphi %s10286_s24, %s11549_s24  }
  0x18   : > { %11499 = sst [smem:[#allocation36_spill]] %s10164_s25  ;;  %s445_s29 = sshll.u32 %s10174_s28, 4  ;;  %s10312_s29 = int_to_ptr.vmem [resolvable:$true] %s445_s29 }
  0x19   : > { %s10307_s0 = sadd.s32 4294967295, %s10172_s27   ;;  %p6958_p0 = scmp.ge.s32.totalorder %s10172_s27, 1 }
  0x1a   : > { %11500 = sst [smem:[#allocation37_spill]] %s10307_s0  ;;  %p11478_p1 = scmp.eq.s32.totalorder %s10307_s0, 0 }
  0x1b   : > { %p433_p2 = scmp.lt.s32.totalorder %s10172_s27, 3  ;;  %s10175_s18 = smov [#allocation8]  }
  0x1c   : > { %s471_s19 = sshll.u32 %s10175_s18, 4  ;;  %s10176_s20 = smov [#allocation11]   ;;  %s10327_s19 = int_to_ptr.vmem [resolvable:$true] %s471_s19 }
  0x1d   : > { %p10314_p3 = pnand %p6958_p0, %p433_p2  ;;  %s10329_s21 = sshll.u32 %s10176_s20, 4  ;;  %s501_s21 = int_to_ptr.vmem [resolvable:$true] %s10329_s21 }
  0x1e   : > { %s11504_s28 = sld [smem:[#allocation40_spill]] }
  0x1f   : > { %s11501_s30 = scalar_select %p10314_p3, 1, 0 }
  0x20   : > { %p9354_p5 = pneg %p10314_p3 }
  0x21   : > { %11502 = sst [smem:[#allocation38_spill]] %s11501_s30 }
  0x22   : > { %p10323_p6 = pnand %p9354_p5, %p11478_p1 }
  0x24   : > { %s9684_s17 = scalar_lea.hbm %s11504_s28, 1792  ;;  %p10339_p8 = pneg %p10323_p6 }
  0x25   : > { %p9685_p7 = scmp.ne.s32.totalorder %s11504_s28, %s9684_s17  ;;  %p9691_p11 = scmp.lt.u32.totalorder %s9684_s17, %s11504_s28 }
  0x27   : > { %p9687_p9 = pnand %p10339_p8, %p9685_p7 }
  0x29   : > { %p9688_p10 = pneg %p9687_p9 }
  0x2b   : > { %p9693_p12 = pnand %p9691_p11, %p9688_p10 }
  0x2d   : > { %9696 = shalt.err (!%p9693_p12)
}
  0x2e   : > { %s9697_s4 = scalar_lea.vmem %s10312_s29, 1792  ;;  %p9705_p5 = scmp.lt.s32.totalorder %s10312_s29, %s10312_s29 }
  0x2f   : > { %p9698_p13 = scmp.ne.s32.totalorder %s10312_s29, %s9697_s4  ;;  %p9706_p4 = scmp.lt.s32.totalorder %s9697_s4, %s9697_s4 }
  0x31   : > { %p9700_p0 = pnand %p9698_p13, %p10339_p8  ;;  %p9707_p7 = por %p9706_p4, %p9705_p5 }
  0x33   : > { %p9701_p2 = pneg %p9700_p0 }
  0x35   : > { %p9708_p9 = pnand %p9707_p7, %p9701_p2 }
  0x37   : > { %9711 = shalt.err (!%p9708_p9)
}
  0x38   : > { %s11476_s7 = smov 128   ;;  %s11480_s15 = smov 8  }
  0x39   : > { %9357 = dma.hbm_to_vmem [thread:$0]  (!%p10323_p6), %s11504_s28, 1792, %s10312_s29, [#allocation6], %s11476_s7, %s11476_s7, %s11480_s15  }
  0x3a   : > { %s11506_s3 = sld [smem:[#allocation42_spill]] }
  0x40   : > { %s9712_s4 = scalar_lea.hbm %s11506_s3, 256 }
  0x41   : > { %p9713_p4 = scmp.ne.s32.totalorder %s11506_s3, %s9712_s4  ;;  %p9719_p12 = scmp.lt.u32.totalorder %s9712_s4, %s11506_s3 }
  0x43   : > { %p9715_p10 = pnand %p9713_p4, %p10339_p8 }
  0x45   : > { %p9716_p11 = pneg %p9715_p10 }
  0x47   : > { %p9721_p13 = pnand %p9719_p12, %p9716_p11 }
  0x49   : > { %9724 = shalt.err (!%p9721_p13)
}
  0x4a   : > { %s9725_s29 = scalar_lea.vmem %s10327_s19, 256  ;;  %p9733_p7 = scmp.lt.s32.totalorder %s10327_s19, %s10327_s19 }
  0x4b   : > { %p9726_p0 = scmp.ne.s32.totalorder %s10327_s19, %s9725_s29  ;;  %p9734_p9 = scmp.lt.s32.totalorder %s9725_s29, %s9725_s29 }
  0x4d   : > { %p9728_p2 = pnand %p9726_p0, %p10339_p8  ;;  %p9735_p4 = por %p9734_p9, %p9733_p7 }
  0x4f   : > { %p9729_p5 = pneg %p9728_p2 }
  0x51   : > { %p9736_p10 = pnand %p9735_p4, %p9729_p5 }
  0x53   : > { %9739 = shalt.err (!%p9736_p10)
}
  0x54   : > { %s11482_s0 = smov 64   ;;  %s11484_s24 = smov 4  }
  0x55   : > { %9363 = dma.hbm_to_vmem [thread:$0]  (!%p10323_p6), %s11506_s3, 256, %s10327_s19, [#allocation9], %s11482_s0, %s11482_s0, %s11484_s24  }
  0x56   : > { %s11507_s6 = sld [smem:[#allocation45_spill]] }
  0x5c   : > { %s9740_s23 = scalar_lea.hbm %s11507_s6, 192 }
  0x5d   : > { %p9741_p11 = scmp.ne.s32.totalorder %s11507_s6, %s9740_s23  ;;  %p9747_p0 = scmp.lt.u32.totalorder %s9740_s23, %s11507_s6 }
  0x5f   : > { %p9743_p12 = pnand %p9741_p11, %p10339_p8 }
  0x61   : > { %p9744_p13 = pneg %p9743_p12 }
  0x63   : > { %p9749_p2 = pnand %p9747_p0, %p9744_p13 }
  0x65   : > { %9752 = shalt.err (!%p9749_p2)
}
  0x66   : > { %s9753_s25 = scalar_lea.vmem %s501_s21, 192  ;;  %p9761_p4 = scmp.lt.s32.totalorder %s501_s21, %s501_s21 }
  0x67   : > { %p9754_p5 = scmp.ne.s32.totalorder %s501_s21, %s9753_s25  ;;  %p9762_p10 = scmp.lt.s32.totalorder %s9753_s25, %s9753_s25 }
  0x69   : > { %p9756_p7 = pnand %p9754_p5, %p10339_p8  ;;  %p9763_p1 = por %p9762_p10, %p9761_p4 }
  0x6b   : > { %p9757_p9 = pneg %p9756_p7 }
  0x6d   : > { %p9764_p3 = pnand %p9763_p1, %p9757_p9 }
  0x6f   : > { %9767 = shalt.err (!%p9764_p3)
}
  0x70   : > { %9369 = dma.hbm_to_vmem [thread:$0]  (!%p10323_p6), %s11507_s6, 192, %s501_s21, [#allocation12], %s11482_s0, %s11482_s0, %s11484_s24  }
  0x71   : > { %s10181_s30 = smov [#allocation14]   ;;  %s10182_s22 = smov [#allocation17]  }
  0x72   : > { %s529_s17 = sshll.u32 %s10181_s30, 4  ;;  %s555_s23 = sshll.u32 %s10182_s22, 4  ;;  %s530_s17 = int_to_ptr.vmem [resolvable:$true] %s529_s17  ;;  %s556_s23 = int_to_ptr.vmem [resolvable:$true] %s555_s23 }
  0x73   : > { %s9768_s29 = scalar_lea.hbm %s11456_s9, 4096 }
  0x74   : > { %p9769_p1 = scmp.ne.s32.totalorder %s11456_s9, %s9768_s29  ;;  %p9775_p12 = scmp.lt.u32.totalorder %s9768_s29, %s11456_s9 }
  0x76   : > { %p9771_p3 = pnand %p9769_p1, %p10339_p8 }
  0x78   : > { %p9772_p11 = pneg %p9771_p3 }
  0x7a   : > { %p9777_p13 = pnand %p9775_p12, %p9772_p11 }
  0x7c   : > { %9780 = shalt.err (!%p9777_p13)
}
  0x7d   : > { %s9781_s21 = scalar_lea.vmem %s530_s17, 4096  ;;  %p9789_p7 = scmp.lt.s32.totalorder %s530_s17, %s530_s17 }
  0x7e   : > { %p9782_p0 = scmp.ne.s32.totalorder %s530_s17, %s9781_s21  ;;  %p9790_p9 = scmp.lt.s32.totalorder %s9781_s21, %s9781_s21 }
  0x80   : > { %p9784_p2 = pnand %p9782_p0, %p10339_p8  ;;  %p9791_p4 = por %p9790_p9, %p9789_p7 }
  0x82   : > { %p9785_p5 = pneg %p9784_p2 }
  0x84   : > { %p9792_p10 = pnand %p9791_p4, %p9785_p5 }
  0x86   : > { %9795 = shalt.err (!%p9792_p10)
}
  0x87   : > { %9375 = dma.hbm_to_vmem [thread:$0]  (!%p10323_p6), %s11456_s9, 4096, %s530_s17, [#allocation15], %s11482_s0, %s11482_s0, %s11484_s24  }
  0x88   : > { %s9796_s22 = scalar_lea.hbm %s11458_s11, 3072 }
  0x89   : > { %p9797_p1 = scmp.ne.s32.totalorder %s11458_s11, %s9796_s22  ;;  %p9803_p12 = scmp.lt.u32.totalorder %s9796_s22, %s11458_s11 }
  0x8b   : > { %p9799_p3 = pnand %p9797_p1, %p10339_p8 }
  0x8d   : > { %p9800_p11 = pneg %p9799_p3 }
  0x8f   : > { %p9805_p13 = pnand %p9803_p12, %p9800_p11 }
  0x91   : > { %9808 = shalt.err (!%p9805_p13)
}
  0x92   : > { %s9809_s19 = scalar_lea.vmem %s556_s23, 3072  ;;  %p9817_p7 = scmp.lt.s32.totalorder %s556_s23, %s556_s23 }
  0x93   : > { %p9810_p0 = scmp.ne.s32.totalorder %s556_s23, %s9809_s19  ;;  %p9818_p9 = scmp.lt.s32.totalorder %s9809_s19, %s9809_s19 }
  0x95   : > { %p9812_p2 = pnand %p9810_p0, %p10339_p8  ;;  %p9819_p4 = por %p9818_p9, %p9817_p7 }
  0x97   : > { %p9813_p5 = pneg %p9812_p2 }
  0x99   : > { %p9820_p10 = pnand %p9819_p4, %p9813_p5 }
  0x9b   : > { %9823 = shalt.err (!%p9820_p10)
}
  0x9c   : > { %9381 = dma.hbm_to_vmem [thread:$0]  (!%p10323_p6), %s11458_s11, 3072, %s556_s23, [#allocation18], %s11482_s0, %s11482_s0, %s11484_s24  }
  0x9d   : > { %s10183_s3 = smov [#allocation20]   ;;  %s10184_s7 = smov [#allocation7]  }
  0x9e   : > { %s581_s15 = sshll.u32 %s10183_s3, 4  ;;  %s458_s30 = sshll.u32 %s10184_s7, 4  ;;  %s582_s15 = int_to_ptr.vmem [resolvable:$true] %s581_s15  ;;  %s459_s30 = int_to_ptr.vmem [resolvable:$true] %s458_s30 }
  0x9f   : > { %s9824_s4 = scalar_lea.hbm %s11460_s13, 3072 }
  0xa0   : > { %p9825_p1 = scmp.ne.s32.totalorder %s11460_s13, %s9824_s4  ;;  %p9831_p12 = scmp.lt.u32.totalorder %s9824_s4, %s11460_s13 }
  0xa2   : > { %p9827_p3 = pnand %p9825_p1, %p10339_p8 }
  0xa4   : > { %p9828_p11 = pneg %p9827_p3 }
  0xa6   : > { %p9833_p13 = pnand %p9831_p12, %p9828_p11 }
  0xa8   : > { %9836 = shalt.err (!%p9833_p13)
}
  0xa9   : > { %s9837_s23 = scalar_lea.vmem %s582_s15, 3072  ;;  %p9845_p7 = scmp.lt.s32.totalorder %s582_s15, %s582_s15 }
  0xaa   : > { %p9838_p0 = scmp.ne.s32.totalorder %s582_s15, %s9837_s23  ;;  %p9846_p9 = scmp.lt.s32.totalorder %s9837_s23, %s9837_s23 }
  0xac   : > { %p9840_p2 = pnand %p9838_p0, %p10339_p8  ;;  %p9847_p4 = por %p9846_p9, %p9845_p7 }
  0xae   : > { %p9841_p5 = pneg %p9840_p2 }
  0xb0   : > { %p9848_p10 = pnand %p9847_p4, %p9841_p5 }
  0xb2   : > { %9851 = shalt.err (!%p9848_p10)
}
  0xb3   : > { %9387 = dma.hbm_to_vmem [thread:$0]  (!%p10323_p6), %s11460_s13, 3072, %s582_s15, [#allocation21], %s11482_s0, %s11482_s0, %s11484_s24  }
  0xb4   : > { %s11508_s2 = sld [smem:[#allocation41_spill]] }
  0xba   : > { %s9852_s20 = scalar_lea.hbm %s11508_s2, 512 }
  0xbb   : > { %p9853_p1 = scmp.ne.s32.totalorder %s11508_s2, %s9852_s20  ;;  %p9859_p12 = scmp.lt.u32.totalorder %s9852_s20, %s11508_s2 }
  0xbd   : > { %p9855_p3 = pnand %p9853_p1, %p10339_p8 }
  0xbf   : > { %p9856_p11 = pneg %p9855_p3 }
  0xc1   : > { %p9861_p13 = pnand %p9859_p12, %p9856_p11 }
  0xc3   : > { %9864 = shalt.err (!%p9861_p13)
}
  0xc4   : > { %s9865_s17 = scalar_lea.vmem %s459_s30, 512  ;;  %p9873_p7 = scmp.lt.s32.totalorder %s459_s30, %s459_s30 }
  0xc5   : > { %p9866_p0 = scmp.ne.s32.totalorder %s459_s30, %s9865_s17  ;;  %p9874_p9 = scmp.lt.s32.totalorder %s9865_s17, %s9865_s17 }
  0xc7   : > { %p9868_p2 = pnand %p9866_p0, %p10339_p8  ;;  %p9875_p4 = por %p9874_p9, %p9873_p7 }
  0xc9   : > { %p9869_p5 = pneg %p9868_p2 }
  0xcb   : > { %p9876_p10 = pnand %p9875_p4, %p9869_p5 }
  0xcd   : > { %9879 = shalt.err (!%p9876_p10)
}
  0xce   : > { %s11509_s15 = smov 8   ;;  %s11510_s23 = smov 128  }
  0xcf   : > { %9360 = dma.hbm_to_vmem [thread:$0]  (!%p10323_p6), %s11508_s2, 512, %s459_s30, [#allocation6], %s11510_s23, %s11510_s23, %s11509_s15  }
  0xd0   : > { %s10185_s7 = smov [#allocation10]   ;;  %s10186_s20 = smov [#allocation13]  }
  0xd1   : > { %s487_s22 = sshll.u32 %s10185_s7, 4  ;;  %s516_s4 = sshll.u32 %s10186_s20, 4  ;;  %s488_s22 = int_to_ptr.vmem [resolvable:$true] %s487_s22  ;;  %s517_s4 = int_to_ptr.vmem [resolvable:$true] %s516_s4 }
  0xd2   : > { %s11511_s5 = sld [smem:[#allocation44_spill]] }
  0xd8   : > { %s9880_s19 = scalar_lea.hbm %s11511_s5, 192 }
  0xd9   : > { %p9881_p1 = scmp.ne.s32.totalorder %s11511_s5, %s9880_s19  ;;  %p9887_p12 = scmp.lt.u32.totalorder %s9880_s19, %s11511_s5 }
  0xdb   : > { %p9883_p3 = pnand %p9881_p1, %p10339_p8 }
  0xdd   : > { %p9884_p11 = pneg %p9883_p3 }
  0xdf   : > { %p9889_p13 = pnand %p9887_p12, %p9884_p11 }
  0xe1   : > { %9892 = shalt.err (!%p9889_p13)
}
  0xe2   : > { %s9893_s30 = scalar_lea.vmem %s488_s22, 192  ;;  %p9901_p7 = scmp.lt.s32.totalorder %s488_s22, %s488_s22 }
  0xe3   : > { %p9894_p0 = scmp.ne.s32.totalorder %s488_s22, %s9893_s30  ;;  %p9902_p9 = scmp.lt.s32.totalorder %s9893_s30, %s9893_s30 }
  0xe5   : > { %p9896_p2 = pnand %p9894_p0, %p10339_p8  ;;  %p9903_p4 = por %p9902_p9, %p9901_p7 }
  0xe7   : > { %p9897_p5 = pneg %p9896_p2 }
  0xe9   : > { %p9904_p10 = pnand %p9903_p4, %p9897_p5 }
  0xeb   : > { %9907 = shalt.err (!%p9904_p10)
}
  0xec   : > { %s11512_s0 = smov 4   ;;  %s11513_s3 = smov 64  }
  0xed   : > { %9366 = dma.hbm_to_vmem [thread:$0]  (!%p10323_p6), %s11511_s5, 192, %s488_s22, [#allocation9], %s11513_s3, %s11513_s3, %s11512_s0  }
  0xee   : > { %s9908_s25 = scalar_lea.hbm %s11455_s8, 3584 }
  0xef   : > { %p9909_p1 = scmp.ne.s32.totalorder %s11455_s8, %s9908_s25  ;;  %p9915_p12 = scmp.lt.u32.totalorder %s9908_s25, %s11455_s8 }
  0xf1   : > { %p9911_p3 = pnand %p9909_p1, %p10339_p8 }
  0xf3   : > { %p9912_p11 = pneg %p9911_p3 }
  0xf5   : > { %p9917_p13 = pnand %p9915_p12, %p9912_p11 }
  0xf7   : > { %9920 = shalt.err (!%p9917_p13)
}
  0xf8   : > { %s9921_s24 = scalar_lea.vmem %s517_s4, 3584  ;;  %p9929_p7 = scmp.lt.s32.totalorder %s517_s4, %s517_s4 }
  0xf9   : > { %p9922_p0 = scmp.ne.s32.totalorder %s517_s4, %s9921_s24  ;;  %p9930_p9 = scmp.lt.s32.totalorder %s9921_s24, %s9921_s24 }
  0xfb   : > { %p9924_p2 = pnand %p9922_p0, %p10339_p8  ;;  %p9931_p4 = por %p9930_p9, %p9929_p7 }
  0xfd   : > { %p9925_p5 = pneg %p9924_p2 }
  0xff   : > { %p9932_p10 = pnand %p9931_p4, %p9925_p5 }
 0x101   : > { %9935 = shalt.err (!%p9932_p10)
}
 0x102   : > { %9372 = dma.hbm_to_vmem [thread:$0]  (!%p10323_p6), %s11455_s8, 3584, %s517_s4, [#allocation12], %s11513_s3, %s11513_s3, %s11512_s0  }
 0x103   : > { %s10187_s20 = smov [#allocation16]   ;;  %s10188_s25 = smov [#allocation19]  }
 0x104   : > { %s542_s29 = sshll.u32 %s10187_s20, 4  ;;  %s568_s19 = sshll.u32 %s10188_s25, 4  ;;  %s543_s29 = int_to_ptr.vmem [resolvable:$true] %s542_s29  ;;  %s569_s19 = int_to_ptr.vmem [resolvable:$true] %s568_s19 }
 0x105   : > { %s9936_s30 = scalar_lea.hbm %s11457_s10, 4096 }
 0x106   : > { %p9937_p1 = scmp.ne.s32.totalorder %s11457_s10, %s9936_s30  ;;  %p9943_p12 = scmp.lt.u32.totalorder %s9936_s30, %s11457_s10 }
 0x108   : > { %p9939_p3 = pnand %p9937_p1, %p10339_p8 }
 0x10a   : > { %p9940_p11 = pneg %p9939_p3 }
 0x10c   : > { %p9945_p13 = pnand %p9943_p12, %p9940_p11 }
 0x10e   : > { %9948 = shalt.err (!%p9945_p13)
}
 0x10f   : > { %s9949_s4 = scalar_lea.vmem %s543_s29, 4096  ;;  %p9957_p7 = scmp.lt.s32.totalorder %s543_s29, %s543_s29 }
 0x110   : > { %p9950_p0 = scmp.ne.s32.totalorder %s543_s29, %s9949_s4  ;;  %p9958_p9 = scmp.lt.s32.totalorder %s9949_s4, %s9949_s4 }
 0x112   : > { %p9952_p2 = pnand %p9950_p0, %p10339_p8  ;;  %p9959_p4 = por %p9958_p9, %p9957_p7 }
 0x114   : > { %p9953_p5 = pneg %p9952_p2 }
 0x116   : > { %p9960_p10 = pnand %p9959_p4, %p9953_p5 }
 0x118   : > { %9963 = shalt.err (!%p9960_p10)
}
 0x119   : > { %9378 = dma.hbm_to_vmem [thread:$0]  (!%p10323_p6), %s11457_s10, 4096, %s543_s29, [#allocation15], %s11513_s3, %s11513_s3, %s11512_s0  }
 0x11a   : > { %s9964_s25 = scalar_lea.hbm %s11459_s12, 3072 }
 0x11b   : > { %p9965_p1 = scmp.ne.s32.totalorder %s11459_s12, %s9964_s25  ;;  %p9971_p12 = scmp.lt.u32.totalorder %s9964_s25, %s11459_s12 }
 0x11d   : > { %p9967_p3 = pnand %p9965_p1, %p10339_p8 }
 0x11f   : > { %p9968_p11 = pneg %p9967_p3 }
 0x121   : > { %p9973_p13 = pnand %p9971_p12, %p9968_p11 }
 0x123   : > { %9976 = shalt.err (!%p9973_p13)
}
 0x124   : > { %s9977_s22 = scalar_lea.vmem %s569_s19, 3072  ;;  %p9985_p7 = scmp.lt.s32.totalorder %s569_s19, %s569_s19 }
 0x125   : > { %p9978_p0 = scmp.ne.s32.totalorder %s569_s19, %s9977_s22  ;;  %p9986_p9 = scmp.lt.s32.totalorder %s9977_s22, %s9977_s22 }
 0x127   : > { %p9980_p2 = pnand %p9978_p0, %p10339_p8  ;;  %p9987_p4 = por %p9986_p9, %p9985_p7 }
 0x129   : > { %p9981_p5 = pneg %p9980_p2 }
 0x12b   : > { %p9988_p10 = pnand %p9987_p4, %p9981_p5 }
 0x12d   : > { %9991 = shalt.err (!%p9988_p10)
}
 0x12e   : > { %9384 = dma.hbm_to_vmem [thread:$0]  (!%p10323_p6), %s11459_s12, 3072, %s569_s19, [#allocation18], %s11513_s3, %s11513_s3, %s11512_s0  }
 0x12f   : > { %s10189_s2 = smov [#allocation22]   ;;  %s10190_s7 = smov [#allocation23]  }
 0x130   : > { %s594_s5 = sshll.u32 %s10189_s2, 4  ;;  %s610_s20 = sshll.u32 %s10190_s7, 4  ;;  %s595_s5 = int_to_ptr.vmem [resolvable:$true] %s594_s5  ;;  %s611_s20 = int_to_ptr.vmem [resolvable:$true] %s610_s20 }
 0x131   : > { %s9992_s21 = scalar_lea.hbm %s11461_s14, 3072 }
 0x132   : > { %p9993_p1 = scmp.ne.s32.totalorder %s11461_s14, %s9992_s21  ;;  %p9999_p12 = scmp.lt.u32.totalorder %s9992_s21, %s11461_s14 }
 0x134   : > { %p9995_p3 = pnand %p9993_p1, %p10339_p8 }
 0x136   : > { %p9996_p11 = pneg %p9995_p3 }
 0x138   : > { %p10001_p13 = pnand %p9999_p12, %p9996_p11 }
 0x13a   : > { %10004 = shalt.err (!%p10001_p13)
}
 0x13b   : > { %s10005_s19 = scalar_lea.vmem %s595_s5, 3072  ;;  %p10013_p7 = scmp.lt.s32.totalorder %s595_s5, %s595_s5 }
 0x13c   : > { %p10006_p0 = scmp.ne.s32.totalorder %s595_s5, %s10005_s19  ;;  %p10014_p9 = scmp.lt.s32.totalorder %s10005_s19, %s10005_s19 }
 0x13e   : > { %p10008_p2 = pnand %p10006_p0, %p10339_p8  ;;  %p10015_p4 = por %p10014_p9, %p10013_p7 }
 0x140   : > { %p10009_p5 = pneg %p10008_p2 }
 0x142   : > { %p10016_p10 = pnand %p10015_p4, %p10009_p5 }
 0x144   : > { %10019 = shalt.err (!%p10016_p10)
}
 0x145   : > { %9390 = dma.hbm_to_vmem [thread:$0]  (!%p10323_p6), %s11461_s14, 3072, %s595_s5, [#allocation21], %s11513_s3, %s11513_s3, %s11512_s0  }
 0x146   : > { %s10020_s17 = scalar_lea.hbm %s11463_s16, 6144 }
 0x147   : > { %p10021_p1 = scmp.ne.s32.totalorder %s11463_s16, %s10020_s17  ;;  %p10027_p12 = scmp.lt.u32.totalorder %s10020_s17, %s11463_s16 }
 0x149   : > { %p10023_p3 = pnand %p10021_p1, %p10339_p8 }
 0x14b   : > { %p10024_p11 = pneg %p10023_p3 }
 0x14d   : > { %p10029_p13 = pnand %p10027_p12, %p10024_p11 }
 0x14f   : > { %10032 = shalt.err (!%p10029_p13)
}
 0x150   : > { %s10033_s29 = scalar_lea.vmem %s611_s20, 6144  ;;  %p10041_p7 = scmp.lt.s32.totalorder %s611_s20, %s611_s20 }
 0x151   : > { %p10034_p0 = scmp.ne.s32.totalorder %s611_s20, %s10033_s29  ;;  %p10042_p9 = scmp.lt.s32.totalorder %s10033_s29, %s10033_s29 }
 0x153   : > { %p10036_p2 = pnand %p10034_p0, %p10339_p8  ;;  %p10043_p4 = por %p10042_p9, %p10041_p7 }
 0x155   : > { %p10037_p5 = pneg %p10036_p2 }
 0x157   : > { %p10044_p10 = pnand %p10043_p4, %p10037_p5 }
 0x159   : > { %10047 = shalt.err (!%p10044_p10)
}
 0x15a   : > { %s11514_s18 = sld [smem:[#allocation36_spill]]  ;;  %s11515_s5 = sld [smem:[#allocation35_spill]] }
 0x15b   : > { %s11516_s19 = sld [smem:[#allocation37_spill]]  ;;  %s6957_s1 = sadd.s32 4294967294, %s10172_s27  }
 0x15c   : > { %9393 = dma.hbm_to_vmem [thread:$0]  (!%p10323_p6), %s11463_s16, 6144, %s611_s20, [#allocation24], %s11510_s23, %s11510_s23, %s11509_s15  }
 0x15d   : > { %s10623_s4 = sadd.s32 1, %s10172_s27   ;;  %s47_s2 = sadd.s32 1, %s10168_s26 }
 0x15e   : > { %s44_s7 = ssub.s32 %s10172_s27, %s10623_s4  ;;  %p55_p3 = scmp.eq.s32.totalorder %s10172_s27, 0 }
 0x15f   : > { %p45_p1 = scmp.eq.s32.totalorder %s44_s7, 0  ;;  %p426_p5 = scmp.eq.s32.totalorder %s6957_s1, 1 }
 0x160   : > { %p54_p8 = scmp.ne.s32.totalorder %s10168_s26, %s11514_s18  ;;  %p60_p11 = scmp.ne.s32.totalorder %s11514_s18, %s11515_s5 }
 0x161   : > { %p420_p12 = scmp.eq.s32.totalorder %s11516_s19, 1  ;;  %p11517_p0 = scmp.eq.s32.totalorder %s11516_s19, 0 }
 0x162   : > { %s10635_s25 = scalar_select %p45_p1, %s10168_s26, %s47_s2  }
 0x163   : > { %p56_p13 = por %p55_p3, %p54_p8  ;;  %p10639_p2 = por %p11517_p0, %p60_p11 }
 0x164   : > { %p10643_p6 = por %p420_p12, %p54_p8  ;;  %p9415_p7 = scmp.lt.s32.totalorder %s10172_s27, 2 }
 0x165   : > { %s624_s21 = sand.u32 1, %s10168_s26   ;;  %p10649_p9 = por %p426_p5, %p60_p11 }
 0x166   : > { %s11519_s20 = scalar_select %p10643_p6, 1, 0 }
 0x167   : > { %s11520_s30 = scalar_select %p10649_p9, 1, 0 }
 0x168   : > { %s6973_s24 = sshll.u32 %s624_s21, 4  ;;  %s7255_s22 = sshll.u32 %s10172_s27, 8 }
 0x169   : > { %s11521_s3 = sld [smem:[#allocation39_spill]]  ;;  %s628_s5 = scalar_lea.vmem [#allocation2], %s6973_s24 }
 0x16a   : > { %s635_s19 = sshll.u32 %s628_s5, 4  ;;  %p10659_p4 = pnand %p9415_p7, %p56_p13  ;;  %s10663_s19 = int_to_ptr.vmem [resolvable:$true] %s635_s19 }
 0x16b   : > { %s10665_s2 = scalar_lea.sflag [#allocation3], %s624_s21 }
 0x16c   : > { %p10050_p8 = pneg %p10659_p4 }
 0x16f   : > { %s10657_s18 = scalar_lea.hbm %s11521_s3, %s7255_s22  ;;  %s10053_s29 = scalar_lea.hbm %s11521_s3, 512 }
 0x170   : > { %s10048_s7 = scalar_lea.hbm %s10657_s18, 256  ;;  %p10054_p11 = scmp.lt.u32.totalorder %s10657_s18, %s11521_s3 }
 0x171   : > { %p10049_p10 = scmp.ne.s32.totalorder %s10657_s18, %s10048_s7  ;;  %p10055_p12 = scmp.lt.u32.totalorder %s10053_s29, %s10048_s7 }
 0x172   : > { %p10057_p0 = scmp.lt.u32.totalorder %s10048_s7, %s10657_s18 }
 0x173   : > { %p10051_p1 = pnand %p10050_p8, %p10049_p10  ;;  %p10056_p13 = por %p10055_p12, %p10054_p11 }
 0x175   : > { %p10052_p3 = pneg %p10051_p1  ;;  %p10058_p5 = por %p10057_p0, %p10056_p13 }
 0x177   : > { %p10059_p7 = pnand %p10058_p5, %p10052_p3 }
 0x179   : > { %10062 = shalt.err (!%p10059_p7)
}
 0x17a   : > { %s10063_s21 = scalar_lea.vmem %s10663_s19, 256  ;;  %s10191_s24 = smov [#allocation2]  }
 0x17b   : > { %p10064_p10 = scmp.ne.s32.totalorder %s10663_s19, %s10063_s21  ;;  %s10068_s22 = sshll.u32 %s10191_s24, 4  ;;  %s10069_s22 = int_to_ptr.vmem [resolvable:$false] %s10068_s22 }
 0x17c   : > { %s10070_s0 = scalar_lea.vmem %s10069_s22, 512  ;;  %p10071_p6 = scmp.lt.s32.totalorder %s10663_s19, %s10069_s22 }
 0x17d   : > { %p10066_p1 = pnand %p10064_p10, %p10050_p8  ;;  %p10072_p11 = scmp.lt.s32.totalorder %s10070_s0, %s10063_s21 }
 0x17f   : > { %p10067_p9 = pneg %p10066_p1  ;;  %p10073_p12 = por %p10072_p11, %p10071_p6 }
 0x181   : > { %p10074_p13 = pnand %p10073_p12, %p10067_p9 }
 0x183   : > { %10077 = shalt.err (!%p10074_p13)
}
 0x184   : > { %9397 = dma.hbm_to_vmem [thread:$0]  (!%p10659_p4), %s10657_s18, 256, %s10663_s19, %s10665_s2, %s11510_s23, %s11510_s23, %s11509_s15  }
 0x185   : > { %s11523_s7 = sld [smem:[#allocation38_spill]] }
 0x18b   : > { %p11524_p8 = scmp.ne.s32.totalorder %s11523_s7, 0 }
 0x18c   : > { %s11525_s29 = sld [smem:[#allocation36_spill]] (!%p11524_p8) }
 0x18d   : > { %647 = sbr.rel (%p11524_p8) target bundleno = 6654 (0x19fe), region = 88 }
 0x192   : > { %s10699_s5 = sand.u32 (!%p11524_p8), 1, %s11525_s29  }
 0x193   : > { %s6977_s21 = sshll.u32 (!%p11524_p8), %s10699_s5, 4  ;;  %s650_s24 = scalar_lea.sflag (!%p11524_p8), [#allocation3], %s10699_s5 }
 0x194   : > { %s653_s22 = scalar_lea.vmem [#allocation2], %s6977_s21 }
 0x195   : > { %10123 = dma.done.wait (%p10639_p2), %s650_s24, 256  }
 0x196   : > { %10125 = vsyncadd (%p10639_p2), %s650_s24, 4294967040  ;;  %s11526_s1 = sld [smem:[#allocation37_spill]] }
 0x19c   : > { %p11527_p6 = scmp.eq.s32.totalorder %s11526_s1, 0 }
 0x19e   : > { %10127 = dma.done.wait (%p11527_p6), [#allocation6], 2304   ;;  %p11528_p9 = pmov %p11527_p6 }
 0x19f   : > { %p11529_p4 = pmov %p11527_p6 }
 0x1a0   : > { %10129 = vsyncadd (%p11528_p9), [#allocation6], 4294964992 }
 0x1a1   : > { %10131 = dma.done.wait (%p11529_p4), [#allocation9], 448   ;;  %p11530_p3 = pmov %p11529_p4 }
 0x1a3   : > { %10133 = vsyncadd (%p11530_p3), [#allocation9], 4294966848  ;;  %p11531_p0 = pmov %p11530_p3 }
 0x1a5   : > { %10135 = dma.done.wait (%p11531_p0), [#allocation12], 3776   ;;  %p11532_p5 = pmov %p11531_p0 }
 0x1a6   : > { %p11533_p2 = pmov %p11531_p0 }
 0x1a7   : > { %10137 = vsyncadd (%p11532_p5), [#allocation12], 4294963520 }
 0x1a8   : > { %10139 = dma.done.wait (%p11533_p2), [#allocation15], 8192   ;;  %p11534_p7 = pmov %p11531_p0 }
 0x1a9   : > { %p11535_p10 = pmov %p11531_p0 }
 0x1aa   : > { %10141 = vsyncadd (%p11534_p7), [#allocation15], 4294959104 }
 0x1ab   : > { %10143 = dma.done.wait (%p11535_p10), [#allocation18], 6144   ;;  %p11536_p1 = pmov %p11531_p0 }
 0x1ac   : > { %p11537_p11 = pmov %p11531_p0 }
 0x1ad   : > { %10145 = vsyncadd (%p11536_p1), [#allocation18], 4294961152 }
 0x1ae   : > { %10147 = dma.done.wait (%p11537_p11), [#allocation21], 6144   ;;  %p11538_p12 = pmov %p11531_p0 }
 0x1af   : > { %p11539_p13 = pmov %p11531_p0 }
 0x1b0   : > { %10149 = vsyncadd (%p11538_p12), [#allocation21], 4294961152 }
 0x1b1   : > { %10151 = dma.done.wait (%p11539_p13), [#allocation24], 6144   ;;  %p11540_p8 = pmov %p11531_p0 }
 0x1b2   : > { %vm761_vm0 = vcmask 130048   ;;  %v757_v0 = vld [vmem:[%s653_s22] sm:$0xff]  ;;  %v758_v1 = vld [vmem:[%s653_s22 + $0x8] sm:$0xff]  ;;  %vm968_vm1 = vcmask 523264   ;;  %s11541_s17 = sld [smem:[#allocation47_spill]]  ;;  %vm10193_vm2 = vmmov 0  }
 0x1b3   : > { %10153 = vsyncadd (%p11540_p8), [#allocation24], 4294961152  ;;  %v759_v2 = vld [vmem:[#allocation5] sm:$0xff]  ;;  %v8894_v3 = vpack.c.bf16 %v758_v1, %v757_v0  ;;  %v760_v5 = vld [vmem:[#allocation5 + $0x8] sm:$0xff]  ;;  %vm3028_vm3 = vcmask 64512   ;;  %vm3833_vm4 = vcmask 1043456  }
 0x1b4   : > { %7794 = vmatprep.mubr.msk.f32.mxu0 %vm761_vm0, %v759_v2  ;;  %v1092_v4 = vld [vmem:[#allocation5 + $0x20] sm:$0xff]  ;;  %v852_v6 = vld [vmem:[#allocation5 + $0x10] sm:$0xff]  ;;  %v1093_v7 = vld [vmem:[#allocation5 + $0x28] sm:$0xff]  ;;  %s11542_s21 = sld [smem:[#allocation43_spill]]  ;;  %vm3928_vm5 = vcmask 31744   ;;  %s11543_s15 = sld [smem:[#allocation46_spill]] }
 0x1b5   : > { %8895 = vmatprep.subr.bf16.mxu0 %v8894_v3  ;;  %8903 = vmatprep.subr.bf16.mxu1 %v8894_v3  ;;  %v1260_v8 = vld [vmem:[#allocation5 + $0x30] sm:$0xff]  ;;  %v853_v9 = vld [vmem:[#allocation5 + $0x18] sm:$0xff]  ;;  %v1428_v12 = vld [vmem:[#allocation5 + $0x40] sm:$0xff]  ;;  %s6991_s29 = sshll.u32 %s10699_s5, 2  ;;  %s7252_s24 = sshll.u32 %s11526_s1, 6 }
 0x1b6   : > { %8897 = vmatpush3.bf16.msra.mxu0 %v8894_v3  ;;  %8905 = vmatpush3.bf16.msra.mxu1 %v8894_v3  ;;  %v9482_v10 = vld [vmem:[#allocation13 + $0x20] sm:$0xff]   ;;  %v9483_v13 = vld [vmem:[#allocation13 + $0x28] sm:$0xff]   ;;  %v1429_v14 = vld [vmem:[#allocation5 + $0x48] sm:$0xff]  ;;  %s755_s22 = scalar_lea.vmem [#allocation25], %s6991_s29  ;;  %s11544_s2 = sld [smem:[#allocation48_spill]] }
 0x1b7   : > { %8899 = vmatprep.subr.bf16.mxu0 %v8894_v3  ;;  %7830 = vmatprep.mubr.msk.f32.mxu1 %vm761_vm0, %v1092_v4  ;;  %v1261_v11 = vld [vmem:[#allocation5 + $0x38] sm:$0xff]  ;;  %v1596_v15 = vld [vmem:[#allocation5 + $0x50] sm:$0xff]  ;;  %v9484_v16 = vld [vmem:[#allocation13 + $0x30] sm:$0xff]   ;;  %s6763_s23 = sshll.u32 %s755_s22, 4  ;;  %s6750_s7 = scalar_lea.sflag [#allocation4], %s10699_s5  ;;  %s11405_s23 = int_to_ptr.vmem [resolvable:$true] %s6763_s23 }
 0x1b8   : > { %8907 = vmatprep.subr.bf16.mxu1 %v8894_v3  ;;  %v1597_v17 = vld [vmem:[#allocation5 + $0x58] sm:$0xff]  ;;  %v1764_v18 = vld [vmem:[#allocation5 + $0x60] sm:$0xff]  ;;  %v1765_v19 = vld [vmem:[#allocation5 + $0x68] sm:$0xff]  ;;  %s10078_s3 = scalar_lea.vmem %s11405_s23, 64  ;;  %p11545_p9 = scmp.ne.s32.totalorder %s11519_s20, 0 }
 0x1b9   : > { %7795 = vmatmul.mubr.msk.f32.vlgmr.msra.gmra.mrb[0].mxu0 %vm761_vm0, %v760_v5  ;;  %7831 = vmatmul.mubr.msk.f32.vlgmr.msra.gmra.mrb[0].mxu1 %vm761_vm0, %v1093_v7  ;;  %v9485_v20 = vld [vmem:[#allocation13 + $0x38] sm:$0xff]   ;;  %v9486_v21 = vld [vmem:[#allocation13] sm:$0xff]   ;;  %v1939_v23 = vld [vmem:[#allocation23 + $0x8] sm:$0xff]  ;;  %p10079_p6 = scmp.ne.s32.totalorder %s11405_s23, %s10078_s3  ;;  %s10195_s1 = smov [#allocation25]  }
 0x1ba   : > { %8901 = vmatpush3.bf16.msra.mxu0 %v8894_v3  ;;  %7801 = vmatprep.mubr.msk.f32.mxu0 %vm761_vm0, %v852_v6  ;;  %v1938_v22 = vld [vmem:[#allocation23] sm:$0xff]  ;;  %v1940_v24 = vld [vmem:[#allocation23 + $0x10] sm:$0xff]  ;;  %v1941_v26 = vld [vmem:[#allocation23 + $0x18] sm:$0xff]  ;;  %s10082_s29 = sshll.u32 %s10195_s1, 4  ;;  %s10083_s29 = int_to_ptr.vmem [resolvable:$false] %s10082_s29 }
 0x1bb   : > { %8909 = vmatpush3.bf16.msra.mxu1 %v8894_v3  ;;  %7848 = vmatprep.mubr.msk.f32.mxu1 %vm761_vm0, %v1260_v8  ;;  %v10749_v25 = vpack.c.bf16 %v1939_v23, %v1938_v22  ;;  %v10751_v27 = vpack.c.bf16 %v1941_v26, %v1940_v24  ;;  %v1942_v28 = vld [vmem:[#allocation23 + $0x20] sm:$0xff]  ;;  %v1943_v29 = vld [vmem:[#allocation23 + $0x28] sm:$0xff]  ;;  %v1944_v31 = vld [vmem:[#allocation23 + $0x30] sm:$0xff]  ;;  %v10192_v26 = vmov 0.0|0.0   ;;  %p10080_p4 = pnand %p10079_p6, %p11545_p9  ;;  %s10084_s6 = scalar_lea.vmem %s10083_s29, 128 }
 0x1bc   : > { %8911 = vmatprep.subr.bf16.mxu1 %v8894_v3  ;;  %7804 = vmatprep.subr.bf16.mxu0 %v9482_v10  ;;  %v10756_v30 = vpack.c.bf16 %v1943_v29, %v1942_v28  ;;  %v1945_v32 = vld [vmem:[#allocation23 + $0x38] sm:$0xff]  ;;  %v1946_v34 = vld [vmem:[#allocation23 + $0x40] sm:$0xff]  ;;  %v1947_v35 = vld [vmem:[#allocation23 + $0x48] sm:$0xff]  ;;  %s11403_s0 = scalar_lea.hbm %s11544_s2, %s7252_s24  ;;  %p10085_p0 = scmp.lt.s32.totalorder %s11405_s23, %s10083_s29 }
 0x1bd   : > { %7802 = vmatmul.mubr.msk.f32.vlgmr.msra.gmra.mrb[2].mxu0 %vm761_vm0, %v853_v9  ;;  %v10760_v33 = vpack.c.bf16 %v1945_v32, %v1944_v31  ;;  %v10764_v36 = vpack.c.bf16 %v1947_v35, %v1946_v34  ;;  %v1948_v37 = vld [vmem:[#allocation23 + $0x50] sm:$0xff]  ;;  %v1949_v38 = vld [vmem:[#allocation23 + $0x58] sm:$0xff]  ;;  %v1950_v40 = vld [vmem:[#allocation23 + $0x60] sm:$0xff]  ;;  %p10081_p3 = pneg %p10080_p4  ;;  %p10086_p5 = scmp.lt.s32.totalorder %s10084_s6, %s10078_s3 }
 0x1be   : > { %7849 = vmatmul.mubr.msk.f32.vlgmr.msra.gmra.mrb[2].mxu1 %vm761_vm0, %v1261_v11  ;;  %7805 = vmatpush3.bf16.msra.mxu0 %v9482_v10  ;;  %v10768_v39 = vpack.c.bf16 %v1949_v38, %v1948_v37  ;;  %v1951_v41 = vld [vmem:[#allocation23 + $0x68] sm:$0xff]  ;;  %v9488_v52 = vld [vmem:[#allocation13 + $0x10] sm:$0xff]   ;;  %v9489_v55 = vld [vmem:[#allocation13 + $0x18] sm:$0xff]  }
 0x1bf   : > { %8913 = vmatpush3.bf16.msra.mxu1 %v8894_v3  ;;  %7866 = vmatprep.mubr.msk.f32.mxu1 %vm761_vm0, %v1428_v12  ;;  %v10772_v42 = vpack.c.bf16 %v1951_v41, %v1950_v40  ;;  %v9487_v49 = vld [vmem:[#allocation13 + $0x8] sm:$0xff]   ;;  %v9490_v58 = vld [vmem:[#allocation13 + $0x40] sm:$0xff]   ;;  %v9492_v62 = vld [vmem:[#allocation13 + $0x50] sm:$0xff]   ;;  %p10087_p2 = por %p10086_p5, %p10085_p0 }
 0x1c0   : > { %8915 = vmatprep.subr.bf16.mxu1 %v8894_v3  ;;  %7806 = vmatprep.subr.bf16.mxu0 %v9483_v13  ;;  %v9491_v61 = vld [vmem:[#allocation13 + $0x48] sm:$0xff]   ;;  %v9493_v63 = vld [vmem:[#allocation13 + $0x58] sm:$0xff]   ;;  %v9494_v0 = vld [vmem:[#allocation13 + $0x60] sm:$0xff]  }
 0x1c1   : > { %v9495_v1 = vld [vmem:[#allocation13 + $0x68] sm:$0xff]   ;;  %v9496_v2 = vld [vmem:[#allocation13 + $0x70] sm:$0xff]   ;;  %v9498_v4 = vld [vmem:[#allocation13 + $0x80] sm:$0xff]   ;;  %p10088_p7 = pnand %p10087_p2, %p10081_p3 }
 0x1c2   : > { %7867 = vmatmul.mubr.msk.f32.vlgmr.msra.gmra.mrb[4].mxu1 %vm761_vm0, %v1429_v14  ;;  %7807 = vmatpush3.bf16.msra.mxu0 %v9483_v13  ;;  %v9499_v5 = vld [vmem:[#allocation13 + $0x88] sm:$0xff]   ;;  %v9500_v6 = vld [vmem:[#allocation13 + $0x90] sm:$0xff]   ;;  %v9501_v7 = vld [vmem:[#allocation13 + $0x98] sm:$0xff]  }
 0x1c3   : > { %8917 = vmatpush3.bf16.msra.mxu1 %v8894_v3  ;;  %7884 = vmatprep.mubr.msk.f32.mxu1 %vm761_vm0, %v1596_v15  ;;  %v9502_v8 = vld [vmem:[#allocation13 + $0xa0] sm:$0xff]   ;;  %v9503_v9 = vld [vmem:[#allocation13 + $0xa8] sm:$0xff]   ;;  %v9504_v10 = vld [vmem:[#allocation13 + $0xb0] sm:$0xff]  }
 0x1c4   : > { %8919 = vmatprep.subr.bf16.mxu1 %v8894_v3  ;;  %7808 = vmatprep.subr.bf16.mxu0 %v9484_v16  ;;  %v9505_v11 = vld [vmem:[#allocation13 + $0xb8] sm:$0xff]   ;;  %v9506_v12 = vld [vmem:[#allocation13 + $0xc0] sm:$0xff]   ;;  %v9507_v13 = vld [vmem:[#allocation13 + $0xc8] sm:$0xff]  }
 0x1c5   : > { %v9508_v14 = vld [vmem:[#allocation13 + $0xd0] sm:$0xff]   ;;  %v9509_v15 = vld [vmem:[#allocation13 + $0xd8] sm:$0xff]   ;;  %v9510_v28 = vld [vmem:[#allocation14] sm:$0xff]  }
 0x1c6   : > { %7885 = vmatmul.mubr.msk.f32.vlgmr.msra.gmra.mrb[6].mxu1 %vm761_vm0, %v1597_v17  ;;  %7809 = vmatpush3.bf16.msra.mxu0 %v9484_v16  ;;  %v1952_v16 = vld [vmem:[#allocation23 + $0x70] sm:$0xff]  ;;  %v1953_v17 = vld [vmem:[#allocation23 + $0x78] sm:$0xff]  ;;  %v9512_v29 = vld [vmem:[#allocation14 + $0x8] sm:$0xff]  }
 0x1c7   : > { %8921 = vmatpush3.bf16.msra.mxu1 %v8894_v3  ;;  %7902 = vmatprep.mubr.msk.f32.mxu1 %vm761_vm0, %v1764_v18  ;;  %v9497_v3 = vld [vmem:[#allocation13 + $0x78] sm:$0xff]   ;;  %v8950_v18 = vpack.c.bf16 %v1953_v17, %v1952_v16  ;;  %v9518_v32 = vld [vmem:[#allocation14 + $0x20] sm:$0xff]   ;;  %v9522_v34 = vld [vmem:[#allocation14 + $0x30] sm:$0xff]  }
 0x1c8   : > { %7810 = vmatprep.subr.bf16.mxu0 %v9485_v20  ;;  %8923 = vmatprep.subr.bf16.mxu1 %v10749_v25  ;;  %v9516_v31 = vld [vmem:[#allocation14 + $0x18] sm:$0xff]  }
 0x1c9   : > { %v9524_v35 = vld [vmem:[#allocation14 + $0x38] sm:$0xff]  }
 0x1ca   : > { %7903 = vmatmul.mubr.msk.f32.vlgmr.msra.gmra.mrb[8].mxu1 %vm761_vm0, %v1765_v19  ;;  %7811 = vmatpush3.bf16.msra.mxu0 %v9485_v20  ;;  %v7048_v19 = vld [vmem:[%s11541_s17] ss:$0 sm:$0xff] }
 0x1cb   : > { %7815 = vmatprep.subr.bf16.mxu0 %v9486_v21  ;;  %8925 = vmatpush3.bf16.msra.mxu1 %v10749_v25 }
 0x1cc   : > { %8927 = vmatprep.subr.bf16.mxu1 %v10751_v27 }
 0x1cf   : > { %8929 = vmatpush3.bf16.msra.mxu1 %v10751_v27 }
 0x1d0   : > { %8931 = vmatprep.subr.bf16.mxu1 %v10756_v30 }
 0x1d3   : > { %8933 = vmatpush3.bf16.msra.mxu1 %v10756_v30 }
 0x1d4   : > { %8935 = vmatprep.subr.bf16.mxu1 %v10760_v33 }
 0x1d7   : > { %8937 = vmatpush3.bf16.msra.mxu1 %v10760_v33 }
 0x1d8   : > { %8939 = vmatprep.subr.bf16.mxu1 %v10764_v36 }
 0x1db   : > { %8941 = vmatpush3.bf16.msra.mxu1 %v10764_v36 }
 0x1dc   : > { %8943 = vmatprep.subr.bf16.mxu1 %v10768_v39 }
 0x1df   : > { %8945 = vmatpush3.bf16.msra.mxu1 %v10768_v39 }
 0x1e0   : > { %8947 = vmatprep.subr.bf16.mxu1 %v10772_v42 }
 0x1e3   : > { %8949 = vmatpush3.bf16.msra.mxu1 %v10772_v42 }
 0x1e4   : > { %8951 = vmatprep.subr.bf16.mxu1 %v8950_v18 }
 0x1e7   : > { %8953 = vmatpush3.bf16.msra.mxu1 %v8950_v18 }
 0x1e8   : > { %8955 = vmatprep.subr.bf16.mxu1 %v10749_v25 }
 0x28c   : > { %v7796_v43 = vpop.f32.mrb[0].mxu0  ;;  %v7832_v44 = vpop.f32.mrb[0].mxu1 }
 0x28d   : > { %v834_v45 = vpop.f32.mrb[1].mxu0  ;;  %v1166_v46 = vpop.f32.mrb[1].mxu1 }
 0x290   : > { %v7803_v47 = vpop.f32.mrb[2].mxu0 }
 0x291   : > { %v926_v48 = vpop.f32.mrb[3].mxu0  ;;  %v7850_v50 = vpop.f32.mrb[2].mxu1 }
 0x292   : > { %7812 = vmatprep.mubr.msk.f32.mxu0 %vm968_vm1, %v926_v48  ;;  %v1334_v51 = vpop.f32.mrb[3].mxu1 }
 0x293   : > { %7813 = vmatmul.mubr.msk.f32.vlgmr.msra.gmra.mrb[4].mxu0 %vm968_vm1, %v7803_v47 }
 0x294   : > { %7816 = vmatpush3.bf16.msra.mxu0 %v9486_v21  ;;  %7823 = vmatprep.mubr.msk.f32.mxu0 %vm968_vm1, %v834_v45 }
 0x295   : > { %7817 = vmatprep.subr.bf16.mxu0 %v9487_v49  ;;  %v7868_v53 = vpop.f32.mrb[4].mxu1 }
 0x296   : > { %v1502_v54 = vpop.f32.mrb[5].mxu1 }
 0x298   : > { %7818 = vmatpush3.bf16.msra.mxu0 %v9487_v49 }
 0x299   : > { %7819 = vmatprep.subr.bf16.mxu0 %v9488_v52  ;;  %v10780_v56 = vpop.f32.mrb[6].mxu1 }
 0x29a   : > { %v1670_v57 = vpop.f32.mrb[7].mxu1 }
 0x29c   : > { %7820 = vmatpush3.bf16.msra.mxu0 %v9488_v52 }
 0x29d   : > { %7821 = vmatprep.subr.bf16.mxu0 %v9489_v55  ;;  %v10782_v59 = vpop.f32.mrb[8].mxu1 }
 0x29e   : > { %v1838_v60 = vpop.f32.mrb[9].mxu1 }
 0x2a0   : > { %7822 = vmatpush3.bf16.msra.mxu0 %v9489_v55 }
 0x2a1   : > { %7833 = vmatprep.subr.bf16.mxu0 %v9490_v58 }
 0x2a3   : > { %7824 = vmatmul.mubr.msk.f32.vlgmr.msra.gmra.mrb[4].mxu0 %vm968_vm1, %v7796_v43 }
 0x2a4   : > { %7834 = vmatpush3.bf16.msra.mxu0 %v9490_v58  ;;  %7841 = vmatprep.mubr.msk.f32.mxu0 %vm968_vm1, %v1166_v46 }
 0x2a5   : > { %7835 = vmatprep.subr.bf16.mxu0 %v9491_v61 }
 0x2a8   : > { %7836 = vmatpush3.bf16.msra.mxu0 %v9491_v61 }
 0x2a9   : > { %7837 = vmatprep.subr.bf16.mxu0 %v9492_v62 }
 0x2ac   : > { %7838 = vmatpush3.bf16.msra.mxu0 %v9492_v62 }
 0x2ad   : > { %7839 = vmatprep.subr.bf16.mxu0 %v9493_v63 }
 0x2b0   : > { %7840 = vmatpush3.bf16.msra.mxu0 %v9493_v63 }
 0x2b1   : > { %7851 = vmatprep.subr.bf16.mxu0 %v9494_v0 }
 0x2b3   : > { %7842 = vmatmul.mubr.msk.f32.vlgmr.msra.gmra.mrb[4].mxu0 %vm968_vm1, %v7832_v44 }
 0x2b4   : > { %7852 = vmatpush3.bf16.msra.mxu0 %v9494_v0  ;;  %7859 = vmatprep.mubr.msk.f32.mxu0 %vm968_vm1, %v1334_v51 }
 0x2b5   : > { %7853 = vmatprep.subr.bf16.mxu0 %v9495_v1 }
 0x2b8   : > { %7854 = vmatpush3.bf16.msra.mxu0 %v9495_v1 }
 0x2b9   : > { %7855 = vmatprep.subr.bf16.mxu0 %v9496_v2 }
 0x2bc   : > { %7856 = vmatpush3.bf16.msra.mxu0 %v9496_v2  ;;  %v2131_v2 = vld [vmem:[#allocation7] sm:$0xff] }
 0x2bd   : > { %7857 = vmatprep.subr.bf16.mxu0 %v9497_v3 }
 0x2c0   : > { %7858 = vmatpush3.bf16.msra.mxu0 %v9497_v3  ;;  %v2222_v3 = vld [vmem:[#allocation7 + $0x8] sm:$0xff] }
 0x2c1   : > { %7869 = vmatprep.subr.bf16.mxu0 %v9498_v4 }
 0x2c3   : > { %7860 = vmatmul.mubr.msk.f32.vlgmr.msra.gmra.mrb[4].mxu0 %vm968_vm1, %v7850_v50 }
 0x2c4   : > { %7870 = vmatpush3.bf16.msra.mxu0 %v9498_v4  ;;  %7877 = vmatprep.mubr.msk.f32.mxu0 %vm968_vm1, %v1502_v54  ;;  %v9511_v4 = vld [vmem:[#allocation14 + $0x40] sm:$0xff]  }
 0x2c5   : > { %7871 = vmatprep.subr.bf16.mxu0 %v9499_v5 }
 0x2c8   : > { %7872 = vmatpush3.bf16.msra.mxu0 %v9499_v5  ;;  %v9513_v5 = vld [vmem:[#allocation14 + $0x48] sm:$0xff]  }
 0x2c9   : > { %7873 = vmatprep.subr.bf16.mxu0 %v9500_v6 }
 0x2cc   : > { %7874 = vmatpush3.bf16.msra.mxu0 %v9500_v6  ;;  %v9515_v6 = vld [vmem:[#allocation14 + $0x50] sm:$0xff]  }
 0x2cd   : > { %7875 = vmatprep.subr.bf16.mxu0 %v9501_v7 }
 0x2d0   : > { %7876 = vmatpush3.bf16.msra.mxu0 %v9501_v7  ;;  %v9517_v7 = vld [vmem:[#allocation14 + $0x58] sm:$0xff]  }
 0x2d1   : > { %7887 = vmatprep.subr.bf16.mxu0 %v9502_v8 }
 0x2d3   : > { %7878 = vmatmul.mubr.msk.f32.vlgmr.msra.gmra.mrb[4].mxu0 %vm968_vm1, %v7868_v53 }
 0x2d4   : > { %7888 = vmatpush3.bf16.msra.mxu0 %v9502_v8  ;;  %7895 = vmatprep.mubr.msk.f32.mxu0 %vm968_vm1, %v1670_v57  ;;  %v9519_v8 = vld [vmem:[#allocation14 + $0x60] sm:$0xff]  }
 0x2d5   : > { %7889 = vmatprep.subr.bf16.mxu0 %v9503_v9 }
 0x2d8   : > { %7890 = vmatpush3.bf16.msra.mxu0 %v9503_v9  ;;  %v9521_v9 = vld [vmem:[#allocation14 + $0x68] sm:$0xff]  }
 0x2d9   : > { %7891 = vmatprep.subr.bf16.mxu0 %v9504_v10 }
 0x2dc   : > { %7892 = vmatpush3.bf16.msra.mxu0 %v9504_v10  ;;  %v9523_v10 = vld [vmem:[#allocation14 + $0x70] sm:$0xff]  }
 0x2dd   : > { %7893 = vmatprep.subr.bf16.mxu0 %v9505_v11 }
 0x2e0   : > { %7894 = vmatpush3.bf16.msra.mxu0 %v9505_v11  ;;  %v9525_v11 = vld [vmem:[#allocation14 + $0x78] sm:$0xff]  }
 0x2e1   : > { %7905 = vmatprep.subr.bf16.mxu0 %v9506_v12 }
 0x2e3   : > { %7896 = vmatmul.mubr.msk.f32.vlgmr.msra.gmra.mrb[4].mxu0 %vm968_vm1, %v10780_v56 }
 0x2e4   : > { %7906 = vmatpush3.bf16.msra.mxu0 %v9506_v12  ;;  %7913 = vmatprep.mubr.msk.f32.mxu0 %vm968_vm1, %v1838_v60 }
 0x2e5   : > { %7907 = vmatprep.subr.bf16.mxu0 %v9507_v13 }
 0x2e8   : > { %7908 = vmatpush3.bf16.msra.mxu0 %v9507_v13 }
 0x2e9   : > { %7909 = vmatprep.subr.bf16.mxu0 %v9508_v14 }
 0x2ec   : > { %7910 = vmatpush3.bf16.msra.mxu0 %v9508_v14  ;;  %v2665_v14 = vld [vmem:[#allocation7 + $0x18] sm:$0xff] }
 0x2ed   : > { %7911 = vmatprep.subr.bf16.mxu0 %v9509_v15 }
 0x2f0   : > { %7912 = vmatpush3.bf16.msra.mxu0 %v9509_v15  ;;  %v9527_v15 = vld [vmem:[#allocation14 + $0xc0] sm:$0xff]  }
 0x2f3   : > { %7914 = vmatmul.mubr.msk.f32.vlgmr.msra.gmra.mrb[4].mxu0 %vm968_vm1, %v10782_v59 }
 0x3c6   : > { %v7915_v20 = vpop.f32.mrb[4].mxu0 }
 0x3c7   : > { %v1920_v21 = vpop.f32.mrb[5].mxu0  ;;  %v10803_v23 = vadd.f32 %v7915_v20, %v7048_v19  ;;  %v9529_v20 = vld [vmem:[#allocation14 + $0xc8] sm:$0xff]  }
 0x3c8   : > { %v10801_v22 = vadd.f32 %v7048_v19, %v1920_v21  ;;  %v9526_v19 = vld [vmem:[#allocation14 + $0x80] sm:$0xff]   ;;  %v9528_v21 = vld [vmem:[#allocation14 + $0x88] sm:$0xff]  }
 0x3ca   : > { %7948 = vmatprep.mubr.f32.mxu1 %v10801_v22  ;;  %v2036_v24 = vmul.f32 %v10801_v22, %v10801_v22 }
 0x3cb   : > { %7949 = vmatmul.mubr.f32.vlgmr.msra.gmra.mrb[10].mxu1 %v10803_v23 }
 0x3cc   : > { %8957 = vmatpush3.bf16.msra.mxu1 %v10749_v25  ;;  %7983 = vmatprep.mubr.f32.mxu1 %v2036_v24  ;;  %v2037_v25 = vmul.f32 %v10803_v23, %v10803_v23  ;;  %v9533_v24 = vld [vmem:[#allocation14 + $0xd8] sm:$0xff]  }
 0x3cd   : > { %8959 = vmatprep.subr.bf16.mxu1 %v10751_v27 }
 0x3d0   : > { %8961 = vmatpush3.bf16.msra.mxu1 %v10751_v27  ;;  %v10194_v27 = vmov 0.0  }
 0x3d1   : > { %8963 = vmatprep.subr.bf16.mxu1 %v10756_v30  ;;  %8019 = vmatprep.subr.bf16.mxu0 %v10194_v27 }
 0x3d2   : > { %8035 = vmatprep.mubr.msk.f32.mxu0 %vm10193_vm2, %v10194_v27  ;;  %8020 = vmatpush3.bf16.msra.mxu0 %v9510_v28  ;;  %v9535_v28 = vld [vmem:[#allocation14 + $0xe0] sm:$0xff]  }
 0x3d3   : > { %8021 = vmatprep.subr.bf16.mxu0 %v10194_v27 }
 0x3d4   : > { %8965 = vmatpush3.bf16.msra.mxu1 %v10756_v30  ;;  %v9514_v30 = vld [vmem:[#allocation14 + $0x10] sm:$0xff]  }
 0x3d5   : > { %8967 = vmatprep.subr.bf16.mxu1 %v10760_v33 }
 0x3d6   : > { %8022 = vmatpush3.bf16.msra.mxu0 %v9512_v29  ;;  %v9534_v29 = vld [vmem:[#allocation14 + $0xa0] sm:$0xff]  }
 0x3d7   : > { %8023 = vmatprep.subr.bf16.mxu0 %v10194_v27 }
 0x3d8   : > { %8969 = vmatpush3.bf16.msra.mxu1 %v10760_v33  ;;  %v9520_v33 = vld [vmem:[#allocation14 + $0x28] sm:$0xff]  }
 0x3d9   : > { %8971 = vmatprep.subr.bf16.mxu1 %v10764_v36 }
 0x3da   : > { %8024 = vmatpush3.bf16.msra.mxu0 %v9514_v30  ;;  %v9537_v30 = vld [vmem:[#allocation14 + $0xe8] sm:$0xff]  }
 0x3db   : > { %8025 = vmatprep.subr.bf16.mxu0 %v10194_v27 }
 0x3dc   : > { %8973 = vmatpush3.bf16.msra.mxu1 %v10764_v36 }
 0x3dd   : > { %8975 = vmatprep.subr.bf16.mxu1 %v10768_v39 }
 0x3de   : > { %8026 = vmatpush3.bf16.msra.mxu0 %v9516_v31  ;;  %v9536_v31 = vld [vmem:[#allocation14 + $0xa8] sm:$0xff]  }
 0x3df   : > { %8027 = vmatprep.subr.bf16.mxu0 %v10194_v27 }
 0x3e0   : > { %8977 = vmatpush3.bf16.msra.mxu1 %v10768_v39 }
 0x3e1   : > { %8979 = vmatprep.subr.bf16.mxu1 %v10772_v42 }
 0x3e2   : > { %8028 = vmatpush3.bf16.msra.mxu0 %v9518_v32  ;;  %v9538_v32 = vld [vmem:[#allocation14 + $0xb0] sm:$0xff]  }
 0x3e3   : > { %8029 = vmatprep.subr.bf16.mxu0 %v10194_v27 }
 0x3e4   : > { %8981 = vmatpush3.bf16.msra.mxu1 %v10772_v42 }
 0x3e5   : > { %8983 = vmatprep.subr.bf16.mxu1 %v8950_v18 }
 0x3e6   : > { %8030 = vmatpush3.bf16.msra.mxu0 %v9520_v33  ;;  %v9539_v33 = vld [vmem:[#allocation14 + $0xf0] sm:$0xff]  }
 0x3e7   : > { %8031 = vmatprep.subr.bf16.mxu0 %v10194_v27 }
 0x3e8   : > { %8985 = vmatpush3.bf16.msra.mxu1 %v8950_v18  ;;  %v2486_v18 = vld [vmem:[#allocation7 + $0x10] sm:$0xff] }
 0x3e9   : > { %8986 = vmatprep.subr.bf16.mxu1 %v10192_v26 }
 0x3ea   : > { %8032 = vmatpush3.bf16.msra.mxu0 %v9522_v34  ;;  %v9540_v34 = vld [vmem:[#allocation14 + $0xb8] sm:$0xff]  }
 0x3eb   : > { %7984 = vmatmul.mubr.f32.vlgmr.msra.gmra.mrb[12].mxu1 %v2037_v25  ;;  %8033 = vmatprep.subr.bf16.mxu0 %v10194_v27  ;;  %v9532_v25 = vld [vmem:[#allocation14 + $0x98] sm:$0xff]  }
 0x3ec   : > { %7990 = vmatprep.mubr.msk.f32.mxu1 %vm10193_vm2, %v10194_v27 }
 0x3ee   : > { %8034 = vmatpush3.bf16.msra.mxu0 %v9524_v35  ;;  %v9541_v35 = vld [vmem:[#allocation14 + $0xf8] sm:$0xff]  }
 0x3ef   : > { %8995 = vmatprep.subr.bf16.mxu0 %v10192_v26 }
 0x49e   : > { %v7950_v36 = vpop.f32.mrb[10].mxu1 }
 0x49f   : > { %v2020_v37 = vpop.f32.mrb[11].mxu1 }
 0x4a0   : > { %v2029_v38 = vadd.f32 %v7950_v36, %v2020_v37 }
 0x4a2   : > { %v2030_v39 = vrot.slane %v2029_v38, 4 }
 0x4a4   : > { %v2031_v40 = vadd.f32 %v2030_v39, %v2029_v38  ;;  %v2850_v38 = vld [vmem:[#allocation23 + $0x80] sm:$0xff]  ;;  %v2851_v39 = vld [vmem:[#allocation23 + $0x88] sm:$0xff] }
 0x4a6   : > { %v2032_v41 = vrot.slane %v2031_v40, 2 }
 0x4a8   : > { %v2033_v44 = vadd.f32 %v2032_v41, %v2031_v40 }
 0x4aa   : > { %v2034_v47 = vrot.slane %v2033_v44, 1 }
 0x4ac   : > { %v2035_v50 = vadd.f32 %v2034_v47, %v2033_v44  ;;  %v2853_v47 = vld [vmem:[#allocation23 + $0x98] sm:$0xff] }
 0x4ae   : > { %v2120_v54 = vmul.f32 %v2035_v50, %v2035_v50  ;;  %v2123_v58 = vsub.f32 %v10801_v22, %v2035_v50  ;;  %v2124_v59 = vsub.f32 %v10803_v23, %v2035_v50  ;;  %v9531_v22 = vld [vmem:[#allocation14 + $0xd0] sm:$0xff]  }
 0x4af   : > { %v9530_v23 = vld [vmem:[#allocation14 + $0x90] sm:$0xff]  }
 0x4be   : > { %v7985_v42 = vpop.f32.mrb[12].mxu1 }
 0x4bf   : > { %v2104_v43 = vpop.f32.mrb[13].mxu1 }
 0x4c0   : > { %v2113_v45 = vadd.f32 %v7985_v42, %v2104_v43  ;;  %v8999_v42 = vpack.c.bf16 %v2851_v39, %v2850_v38 }
 0x4c2   : > { %v2114_v46 = vrot.slane %v2113_v45, 4 }
 0x4c4   : > { %v2115_v48 = vadd.f32 %v2114_v46, %v2113_v45  ;;  %v2852_v46 = vld [vmem:[#allocation23 + $0x90] sm:$0xff] }
 0x4c6   : > { %v2116_v49 = vrot.slane %v2115_v48, 2 }
 0x4c8   : > { %v2117_v51 = vadd.f32 %v2116_v49, %v2115_v48  ;;  %v9002_v49 = vpack.c.bf16 %v2853_v47, %v2852_v46 }
 0x4ca   : > { %v2118_v52 = vrot.slane %v2117_v51, 1 }
 0x4cc   : > { %v2119_v53 = vadd.f32 %v2118_v52, %v2117_v51  ;;  %v2854_v51 = vld [vmem:[#allocation23 + $0xa0] sm:$0xff]  ;;  %v2855_v52 = vld [vmem:[#allocation23 + $0xa8] sm:$0xff] }
 0x4ce   : > { %v2121_v55 = vsub.f32 %v2119_v53, %v2120_v54  ;;  %v9005_v53 = vpack.c.bf16 %v2855_v52, %v2854_v51  ;;  %v2856_v54 = vld [vmem:[#allocation23 + $0xb0] sm:$0xff]  ;;  %v9545_v51 = vld [vmem:[#allocation16 + $0x48] sm:$0xff]  }
 0x4cf   : > { %v9547_v52 = vld [vmem:[#allocation16 + $0x50] sm:$0xff]  }
 0x4d0   : > { %v2122_v56 = vmax.f32 %v2121_v55, 0.0  ;;  %v2857_v55 = vld [vmem:[#allocation23 + $0xb8] sm:$0xff] }
 0x4d2   : > { %v2125_v57 = vadd.f32 1e-05, %v2122_v56  ;;  %v9008_v56 = vpack.c.bf16 %v2857_v55, %v2856_v54  ;;  %v9551_v54 = vld [vmem:[#allocation16 + $0x60] sm:$0xff]   ;;  %v9553_v55 = vld [vmem:[#allocation16 + $0x68] sm:$0xff]  }
 0x4d4   : > { %9670 = vrsqrt.f32 %v2125_v57  ;;  %v2858_v57 = vld [vmem:[#allocation23 + $0xc0] sm:$0xff] }
 0x4de   : > { %v9671_v60 = vpop.eup %9670 }
 0x4df   : > { %v2127_v61 = vmul.f32 %v9671_v60, %v2123_v58  ;;  %v2128_v62 = vmul.f32 %v9671_v60, %v2124_v59  ;;  %v2859_v58 = vld [vmem:[#allocation23 + $0xc8] sm:$0xff]  ;;  %v2860_v60 = vld [vmem:[#allocation23 + $0xd0] sm:$0xff] }
 0x4e0   : > { %v9011_v59 = vpack.c.bf16 %v2859_v58, %v2858_v57  ;;  %v9557_v57 = vld [vmem:[#allocation16 + $0x78] sm:$0xff]  }
 0x4e1   : > { %v2129_v63 = vmax.f32 %v2127_v61, 0.0  ;;  %v2130_v0 = vmax.f32 %v2128_v62, 0.0  ;;  %v2861_v61 = vld [vmem:[#allocation23 + $0xd8] sm:$0xff] }
 0x4e2   : > { %v9014_v62 = vpack.c.bf16 %v2861_v61, %v2860_v60  ;;  %v3562_v60 = vld [vmem:[#allocation8 + $0xc] sm:$0xf] }
 0x4e3   : > { %v8987_v1 = vpack.c.bf16 %v2130_v0, %v2129_v63  ;;  %v2862_v63 = vld [vmem:[#allocation23 + $0xe0] sm:$0xff]  ;;  %v2863_v0 = vld [vmem:[#allocation23 + $0xe8] sm:$0xff] }
 0x4e4   : > { %v9559_v61 = vld [vmem:[#allocation16 + $0xc0] sm:$0xff]  }
 0x4e5   : > { %8988 = vmatpush3.bf16.msra.mxu1 %v8987_v1 }
 0x4e6   : > { %8989 = vmatprep.subr.bf16.mxu1 %v10192_v26 }
 0x4e8   : > { %7991 = vmatmul.mubr.msk.f32.vlgmr.msra.gmra.mrb[14].mxu1 %vm761_vm0, %v2131_v2  ;;  %v2864_v2 = vld [vmem:[#allocation23 + $0xf0] sm:$0xff] }
 0x4e9   : > { %8991 = vmatpush3.bf16.msra.mxu1 %v8987_v1  ;;  %7997 = vmatprep.mubr.msk.f32.mxu1 %vm10193_vm2, %v10194_v27 }
 0x4ea   : > { %8000 = vmatprep.subr.bf16.mxu1 %v10194_v27 }
 0x4ec   : > { %7998 = vmatmul.mubr.msk.f32.vlgmr.msra.gmra.mrb[16].mxu1 %vm761_vm0, %v2222_v3  ;;  %v2865_v3 = vld [vmem:[#allocation23 + $0xf8] sm:$0xff] }
 0x4ed   : > { %8001 = vmatpush3.bf16.msra.mxu1 %v9511_v4  ;;  %8016 = vmatprep.mubr.msk.f32.mxu1 %vm10193_vm2, %v10194_v27  ;;  %v9020_v4 = vpack.c.bf16 %v2865_v3, %v2864_v2  ;;  %v9561_v2 = vld [vmem:[#allocation16 + $0xc8] sm:$0xff]  }
 0x4ee   : > { %8002 = vmatprep.subr.bf16.mxu1 %v10194_v27  ;;  %v9560_v3 = vld [vmem:[#allocation16 + $0x88] sm:$0xff]  }
 0x4f1   : > { %8003 = vmatpush3.bf16.msra.mxu1 %v9513_v5 }
 0x4f2   : > { %8004 = vmatprep.subr.bf16.mxu1 %v10194_v27 }
 0x4f5   : > { %8005 = vmatpush3.bf16.msra.mxu1 %v9515_v6 }
 0x4f6   : > { %8006 = vmatprep.subr.bf16.mxu1 %v10194_v27 }
 0x4f9   : > { %8007 = vmatpush3.bf16.msra.mxu1 %v9517_v7 }
 0x4fa   : > { %8008 = vmatprep.subr.bf16.mxu1 %v10194_v27 }
 0x4fd   : > { %8009 = vmatpush3.bf16.msra.mxu1 %v9519_v8 }
 0x4fe   : > { %8010 = vmatprep.subr.bf16.mxu1 %v10194_v27 }
 0x501   : > { %8011 = vmatpush3.bf16.msra.mxu1 %v9521_v9 }
 0x502   : > { %8012 = vmatprep.subr.bf16.mxu1 %v10194_v27 }
 0x505   : > { %8013 = vmatpush3.bf16.msra.mxu1 %v9523_v10  ;;  %v7085_v10 = vld [vmem:[%s11541_s17 + $0x1] ss:$0 sm:$0xff] }
 0x506   : > { %8014 = vmatprep.subr.bf16.mxu1 %v10194_v27 }
 0x509   : > { %8015 = vmatpush3.bf16.msra.mxu1 %v9525_v11 }
 0x50a   : > { %8992 = vmatprep.subr.bf16.mxu1 %v10192_v26 }
 0x5bb   : > { %v2201_v12 = vpop.f32.mrb[14].mxu1 }
 0x5bc   : > { %v7992_v13 = vpop.f32.mrb[15].mxu1  ;;  %8036 = vmatmul.mubr.f32.vlgmr.msra.gmra.mrb[6].mxu0 %v2201_v12 }
 0x5bd   : > { %8997 = vmatpush3.bf16.msra.mxu0 %v8987_v1  ;;  %8068 = vmatprep.mubr.msk.f32.mxu0 %vm10193_vm2, %v10194_v27 }
 0x5be   : > { %8071 = vmatprep.subr.bf16.mxu0 %v10194_v27 }
 0x5bf   : > { %v2292_v16 = vpop.f32.mrb[16].mxu1 }
 0x5c0   : > { %v7999_v17 = vpop.f32.mrb[17].mxu1  ;;  %8017 = vmatmul.mubr.f32.vlgmr.msra.gmra.mrb[18].mxu1 %v2292_v16  ;;  %8069 = vmatmul.mubr.msk.f32.vlgmr.msra.gmra.mrb[8].mxu0 %vm761_vm0, %v2665_v14  ;;  %v9542_v14 = vld [vmem:[#allocation16] sm:$0xff]   ;;  %v9546_v16 = vld [vmem:[#allocation16 + $0x10] sm:$0xff]  }
 0x5c1   : > { %8994 = vmatpush3.bf16.msra.mxu1 %v8987_v1  ;;  %8042 = vmatprep.mubr.msk.f32.mxu1 %vm10193_vm2, %v10194_v27  ;;  %v9017_v1 = vpack.c.bf16 %v2863_v0, %v2862_v63  ;;  %v9548_v17 = vld [vmem:[#allocation16 + $0x18] sm:$0xff]   ;;  %v3383_v0 = vld [vmem:[#allocation8 + $0x8] sm:$0xf] }
 0x5c2   : > { %8045 = vmatprep.subr.bf16.mxu1 %v10194_v27  ;;  %8072 = vmatpush3.bf16.msra.mxu0 %v9527_v15  ;;  %v9544_v15 = vld [vmem:[#allocation16 + $0x8] sm:$0xff]  }
 0x5c3   : > { %8073 = vmatprep.subr.bf16.mxu0 %v10194_v27  ;;  %8087 = vmatprep.mubr.msk.f32.mxu0 %vm10193_vm2, %v10194_v27 }
 0x5c4   : > { %8043 = vmatmul.mubr.msk.f32.vlgmr.msra.gmra.mrb[20].mxu1 %vm761_vm0, %v2486_v18  ;;  %v9550_v18 = vld [vmem:[#allocation16 + $0x20] sm:$0xff]  }
 0x5c5   : > { %8046 = vmatpush3.bf16.msra.mxu1 %v9526_v19  ;;  %8061 = vmatprep.mubr.msk.f32.mxu1 %vm10193_vm2, %v10194_v27  ;;  %v9552_v19 = vld [vmem:[#allocation16 + $0x28] sm:$0xff]  }
 0x5c6   : > { %8047 = vmatprep.subr.bf16.mxu1 %v10194_v27  ;;  %8074 = vmatpush3.bf16.msra.mxu0 %v9529_v20  ;;  %v9554_v20 = vld [vmem:[#allocation16 + $0x30] sm:$0xff]  }
 0x5c7   : > { %8075 = vmatprep.subr.bf16.mxu0 %v10194_v27 }
 0x5c9   : > { %8048 = vmatpush3.bf16.msra.mxu1 %v9528_v21  ;;  %v9556_v21 = vld [vmem:[#allocation16 + $0x38] sm:$0xff]  }
 0x5ca   : > { %8049 = vmatprep.subr.bf16.mxu1 %v10194_v27  ;;  %8076 = vmatpush3.bf16.msra.mxu0 %v9531_v22 }
 0x5cb   : > { %8077 = vmatprep.subr.bf16.mxu0 %v10194_v27 }
 0x5cd   : > { %8050 = vmatpush3.bf16.msra.mxu1 %v9530_v23 }
 0x5ce   : > { %8051 = vmatprep.subr.bf16.mxu1 %v10194_v27  ;;  %8078 = vmatpush3.bf16.msra.mxu0 %v9533_v24 }
 0x5cf   : > { %8079 = vmatprep.subr.bf16.mxu0 %v10194_v27 }
 0x5d1   : > { %8052 = vmatpush3.bf16.msra.mxu1 %v9532_v25 }
 0x5d2   : > { %8053 = vmatprep.subr.bf16.mxu1 %v10194_v27  ;;  %8080 = vmatpush3.bf16.msra.mxu0 %v9535_v28 }
 0x5d3   : > { %8081 = vmatprep.subr.bf16.mxu0 %v10194_v27 }
 0x5d5   : > { %8054 = vmatpush3.bf16.msra.mxu1 %v9534_v29 }
 0x5d6   : > { %8055 = vmatprep.subr.bf16.mxu1 %v10194_v27  ;;  %8082 = vmatpush3.bf16.msra.mxu0 %v9537_v30 }
 0x5d7   : > { %8083 = vmatprep.subr.bf16.mxu0 %v10194_v27 }
 0x5d9   : > { %8056 = vmatpush3.bf16.msra.mxu1 %v9536_v31 }
 0x5da   : > { %8057 = vmatprep.subr.bf16.mxu1 %v10194_v27  ;;  %8084 = vmatpush3.bf16.msra.mxu0 %v9539_v33 }
 0x5db   : > { %8085 = vmatprep.subr.bf16.mxu0 %v10194_v27 }
 0x5dd   : > { %8058 = vmatpush3.bf16.msra.mxu1 %v9538_v32 }
 0x5de   : > { %8059 = vmatprep.subr.bf16.mxu1 %v10194_v27  ;;  %8086 = vmatpush3.bf16.msra.mxu0 %v9541_v35 }
 0x5df   : > { %9022 = vmatprep.subr.bf16.mxu0 %v10192_v26 }
 0x5e1   : > { %8060 = vmatpush3.bf16.msra.mxu1 %v9540_v34 }
 0x5e2   : > { %8998 = vmatprep.subr.bf16.mxu1 %v10192_v26 }
 0x68f   : > { %v2481_v36 = vpop.f32.mrb[6].mxu0 }
 0x690   : > { %v8037_v37 = vpop.f32.mrb[7].mxu0 }
 0x693   : > { %v2395_v40 = vpop.f32.mrb[18].mxu1  ;;  %v2735_v41 = vpop.f32.mrb[8].mxu0 }
 0x694   : > { %v10884_v43 = vadd.f32 %v2481_v36, %v2395_v40  ;;  %v8018_v44 = vpop.f32.mrb[19].mxu1  ;;  %v8070_v45 = vpop.f32.mrb[9].mxu0  ;;  %8088 = vmatmul.mubr.f32.vlgmr.msra.gmra.mrb[10].mxu0 %v2735_v41 }
 0x695   : > { %9024 = vmatpush3.bf16.msra.mxu0 %v8999_v42  ;;  %8157 = vmatprep.mubr.msk.f32.mxu0 %vm10193_vm2, %v10194_v27 }
 0x696   : > { %9025 = vmatprep.subr.bf16.mxu0 %v10192_v26 }
 0x697   : > { %v2556_v48 = vpop.f32.mrb[20].mxu1 }
 0x698   : > { %v8044_v50 = vpop.f32.mrb[21].mxu1  ;;  %8062 = vmatmul.mubr.f32.vlgmr.msra.gmra.mrb[22].mxu1 %v2556_v48  ;;  %v3027_v48 = vld [vmem:[#allocation8] sm:$0xf] }
 0x699   : > { %9000 = vmatpush3.bf16.msra.mxu1 %v8999_v42  ;;  %9027 = vmatpush3.bf16.msra.mxu0 %v9002_v49  ;;  %v9543_v50 = vld [vmem:[#allocation16 + $0x40] sm:$0xff]  }
 0x69a   : > { %9001 = vmatprep.subr.bf16.mxu1 %v10192_v26  ;;  %9028 = vmatprep.subr.bf16.mxu0 %v10192_v26 }
 0x69b   : > { %8122 = vmatprep.mubr.msk.f32.mxu1 %vm10193_vm2, %v10194_v27 }
 0x69d   : > { %9003 = vmatpush3.bf16.msra.mxu1 %v9002_v49  ;;  %9030 = vmatpush3.bf16.msra.mxu0 %v9005_v53  ;;  %v3119_v49 = vld [vmem:[#allocation8 + $0x4] sm:$0xf] }
 0x69e   : > { %9004 = vmatprep.subr.bf16.mxu1 %v10192_v26  ;;  %9031 = vmatprep.subr.bf16.mxu0 %v10192_v26 }
 0x6a1   : > { %9006 = vmatpush3.bf16.msra.mxu1 %v9005_v53  ;;  %9033 = vmatpush3.bf16.msra.mxu0 %v9008_v56  ;;  %v9549_v53 = vld [vmem:[#allocation16 + $0x58] sm:$0xff]  }
 0x6a2   : > { %9007 = vmatprep.subr.bf16.mxu1 %v10192_v26  ;;  %9034 = vmatprep.subr.bf16.mxu0 %v10192_v26 }
 0x6a5   : > { %9009 = vmatpush3.bf16.msra.mxu1 %v9008_v56  ;;  %9036 = vmatpush3.bf16.msra.mxu0 %v9011_v59  ;;  %v9555_v56 = vld [vmem:[#allocation16 + $0x70] sm:$0xff]  }
 0x6a6   : > { %9010 = vmatprep.subr.bf16.mxu1 %v10192_v26  ;;  %9037 = vmatprep.subr.bf16.mxu0 %v10192_v26 }
 0x6a9   : > { %9012 = vmatpush3.bf16.msra.mxu1 %v9011_v59  ;;  %9039 = vmatpush3.bf16.msra.mxu0 %v9014_v62 }
 0x6aa   : > { %9013 = vmatprep.subr.bf16.mxu1 %v10192_v26  ;;  %9040 = vmatprep.subr.bf16.mxu0 %v10192_v26 }
 0x6ad   : > { %9015 = vmatpush3.bf16.msra.mxu1 %v9014_v62  ;;  %9042 = vmatpush3.bf16.msra.mxu0 %v9017_v1 }
 0x6ae   : > { %9016 = vmatprep.subr.bf16.mxu1 %v10192_v26  ;;  %9043 = vmatprep.subr.bf16.mxu0 %v10192_v26 }
 0x6b1   : > { %9018 = vmatpush3.bf16.msra.mxu1 %v9017_v1  ;;  %9045 = vmatpush3.bf16.msra.mxu0 %v9020_v4  ;;  %v9558_v1 = vld [vmem:[#allocation16 + $0x80] sm:$0xff]  }
 0x6b2   : > { %9019 = vmatprep.subr.bf16.mxu1 %v10192_v26  ;;  %8189 = vmatprep.subr.bf16.mxu0 %v10194_v27 }
 0x6b5   : > { %9021 = vmatpush3.bf16.msra.mxu1 %v9020_v4  ;;  %v9563_v4 = vld [vmem:[#allocation16 + $0xd0] sm:$0xff]  }
 0x6b6   : > { %8160 = vmatprep.subr.mxu1 %v10194_v27 }
 0x767   : > { %v2838_v5 = vpop.f32.mrb[10].mxu0 }
 0x768   : > { %v8089_v6 = vpop.f32.mrb[11].mxu0 }
 0x769   : > { %v9565_v6 = vld [vmem:[#allocation16 + $0xd8] sm:$0xff]  }
 0x76b   : > { %v2659_v7 = vpop.f32.mrb[22].mxu1 }
 0x76c   : > { %v2663_v8 = vadd.f32 %v2659_v7, %v10884_v43  ;;  %v8063_v9 = vpop.f32.mrb[23].mxu1  ;;  %v9564_v7 = vld [vmem:[#allocation16 + $0x98] sm:$0xff]  }
 0x76d   : > { %v9566_v9 = vld [vmem:[#allocation16 + $0xa0] sm:$0xff]  }
 0x76e   : > { %v2842_v11 = vadd.f32 %v2838_v5, %v2663_v8  ;;  %v9562_v5 = vld [vmem:[#allocation16 + $0x90] sm:$0xff]   ;;  %v9567_v8 = vld [vmem:[#allocation16 + $0xe0] sm:$0xff]  }
 0x770   : > { %v2848_v12 = vadd.f32 %v7085_v10, %v2842_v11  ;;  %v9569_v10 = vld [vmem:[#allocation16 + $0xe8] sm:$0xff]  }
 0x771   : > { %v9568_v11 = vld [vmem:[#allocation16 + $0xa8] sm:$0xff]  }
 0x772   : > { %v2942_v13 = vmul.f32 %v2848_v12, %v2848_v12  ;;  %8123 = vmatmul.mubr.f32.vlgmr.msra.gmra.mrb[24].mxu1 %v2848_v12 }
 0x773   : > { %8162 = vmatprep.mubr.msk.f32.mxu1 %vm10193_vm2, %v10194_v27 }
 0x774   : > { %8158 = vmatmul.mubr.f32.vlgmr.msra.gmra.mrb[12].mxu0 %v2942_v13  ;;  %v9571_v13 = vld [vmem:[#allocation16 + $0xf0] sm:$0xff]  }
 0x775   : > { %8205 = vmatprep.mubr.msk.f32.mxu0 %vm10193_vm2, %v10194_v27  ;;  %8190 = vmatpush3.bf16.msra.mxu0 %v9542_v14  ;;  %v9572_v14 = vld [vmem:[#allocation16 + $0xb8] sm:$0xff]  }
 0x776   : > { %8191 = vmatprep.subr.bf16.mxu0 %v10194_v27 }
 0x779   : > { %8192 = vmatpush3.bf16.msra.mxu0 %v9544_v15  ;;  %v9573_v15 = vld [vmem:[#allocation16 + $0xf8] sm:$0xff]  }
 0x77a   : > { %8193 = vmatprep.subr.bf16.mxu0 %v10194_v27 }
 0x77d   : > { %8194 = vmatpush3.bf16.msra.mxu0 %v9546_v16 }
 0x77e   : > { %8195 = vmatprep.subr.bf16.mxu0 %v10194_v27 }
 0x781   : > { %8196 = vmatpush3.bf16.msra.mxu0 %v9548_v17 }
 0x782   : > { %8197 = vmatprep.subr.bf16.mxu0 %v10194_v27 }
 0x785   : > { %8198 = vmatpush3.bf16.msra.mxu0 %v9550_v18  ;;  %v3747_v18 = vld [vmem:[#allocation23 + $0x100] sm:$0xff] }
 0x786   : > { %8199 = vmatprep.subr.bf16.mxu0 %v10194_v27 }
 0x789   : > { %8200 = vmatpush3.bf16.msra.mxu0 %v9552_v19  ;;  %v3748_v19 = vld [vmem:[#allocation23 + $0x108] sm:$0xff] }
 0x78a   : > { %8201 = vmatprep.subr.bf16.mxu0 %v10194_v27 }
 0x78d   : > { %8202 = vmatpush3.bf16.msra.mxu0 %v9554_v20 }
 0x78e   : > { %8203 = vmatprep.subr.bf16.mxu0 %v10194_v27 }
 0x791   : > { %8204 = vmatpush3.bf16.msra.mxu0 %v9556_v21 }
 0x792   : > { %8232 = vmatprep.subr.mxu0 %v10194_v27 }
 0x845   : > { %v2932_v22 = vpop.f32.mrb[24].mxu1 }
 0x846   : > { %v2936_v23 = vrot.slane %v2932_v22, 4  ;;  %v8124_v24 = vpop.f32.mrb[25].mxu1 }
 0x847   : > { %v3009_v25 = vpop.f32.mrb[12].mxu0 }
 0x848   : > { %v2937_v28 = vadd.f32 %v2936_v23, %v2932_v22  ;;  %v3013_v29 = vrot.slane %v3009_v25, 4  ;;  %v8159_v30 = vpop.f32.mrb[13].mxu0  ;;  %v10966_v22 = vpack.c.bf16 %v3748_v19, %v3747_v18 }
 0x84a   : > { %v2938_v31 = vrot.slane %v2937_v28, 2  ;;  %v3014_v32 = vadd.f32 %v3013_v29, %v3009_v25  ;;  %v3750_v29 = vld [vmem:[#allocation23 + $0x118] sm:$0xff] }
 0x84c   : > { %v2939_v33 = vadd.f32 %v2938_v31, %v2937_v28  ;;  %v3015_v34 = vrot.slane %v3014_v32, 2  ;;  %v3749_v28 = vld [vmem:[#allocation23 + $0x110] sm:$0xff] }
 0x84d   : > { %v10974_v31 = vpack.c.bf16 %v3750_v29, %v3749_v28 }
 0x84e   : > { %v2940_v35 = vrot.slane %v2939_v33, 1  ;;  %v3016_v36 = vadd.f32 %v3015_v34, %v3014_v32  ;;  %v3752_v34 = vld [vmem:[#allocation23 + $0x128] sm:$0xff] }
 0x850   : > { %v2941_v37 = vadd.f32 %v2940_v35, %v2939_v33  ;;  %v3017_v38 = vrot.slane %v3016_v36, 1  ;;  %v3751_v33 = vld [vmem:[#allocation23 + $0x120] sm:$0xff] }
 0x851   : > { %v10980_v35 = vpack.c.bf16 %v3752_v34, %v3751_v33  ;;  %v3927_v34 = vld [vmem:[%s11542_s21] sm:$0xf] }
 0x852   : > { %v3019_v39 = vmul.f32 %v2941_v37, %v2941_v37  ;;  %v3018_v40 = vadd.f32 %v3017_v38, %v3016_v36  ;;  %v3022_v44 = vsub.f32 %v2848_v12, %v2941_v37  ;;  %v9570_v12 = vld [vmem:[#allocation16 + $0xb0] sm:$0xff]   ;;  %v3754_v37 = vld [vmem:[#allocation23 + $0x138] sm:$0xff] }
 0x853   : > { %v3753_v36 = vld [vmem:[#allocation23 + $0x130] sm:$0xff] }
 0x854   : > { %v3020_v41 = vsub.f32 %v3018_v40, %v3019_v39  ;;  %v10988_v38 = vpack.c.bf16 %v3754_v37, %v3753_v36  ;;  %v3755_v39 = vld [vmem:[#allocation23 + $0x140] sm:$0xff]  ;;  %v3756_v40 = vld [vmem:[#allocation23 + $0x148] sm:$0xff] }
 0x855   : > { %v7125_v36 = vld [vmem:[%s11542_s21 + $0x4] sm:$0xf]  ;;  %v9575_v37 = vld [vmem:[#allocation17 + $0x40] sm:$0xff]  }
 0x856   : > { %v3021_v42 = vmax.f32 %v3020_v41, 0.0  ;;  %v10994_v41 = vpack.c.bf16 %v3756_v40, %v3755_v39  ;;  %v9577_v39 = vld [vmem:[#allocation17 + $0x48] sm:$0xff]   ;;  %v9579_v40 = vld [vmem:[#allocation17 + $0x50] sm:$0xff]  }
 0x858   : > { %v3023_v43 = vadd.f32 1e-05, %v3021_v42  ;;  %v3757_v42 = vld [vmem:[#allocation23 + $0x150] sm:$0xff] }
 0x85a   : > { %9672 = vrsqrt.f32 %v3023_v43  ;;  %v3758_v43 = vld [vmem:[#allocation23 + $0x158] sm:$0xff] }
 0x864   : > { %v9673_v45 = vpop.eup %9672 }
 0x865   : > { %v3025_v46 = vmul.f32 %v9673_v45, %v3022_v44  ;;  %v11000_v44 = vpack.c.bf16 %v3758_v43, %v3757_v42  ;;  %v3759_v45 = vld [vmem:[#allocation23 + $0x160] sm:$0xff]  ;;  %v9581_v42 = vld [vmem:[#allocation17 + $0x58] sm:$0xff]  }
 0x866   : > { %v9583_v43 = vld [vmem:[#allocation17 + $0x60] sm:$0xff]  }
 0x867   : > { %v3026_v47 = vmax.f32 %v3025_v46, 0.0  ;;  %v3760_v46 = vld [vmem:[#allocation23 + $0x168] sm:$0xff] }
 0x869   : > { %8161 = vmatpush3.msra.mxu1 %v3026_v47 }
 0x86a   : > { %8163 = vmatmul.mubr.msk.f32.vlgmr.msra.gmra.mrb[26].mxu1 %vm3028_vm3, %v3027_v48  ;;  %8165 = vmatprep.subr.mxu1 %v10194_v27  ;;  %v3761_v48 = vld [vmem:[#allocation23 + $0x170] sm:$0xff] }
 0x86b   : > { %8166 = vmatpush3.msra.mxu1 %v3026_v47  ;;  %8167 = vmatprep.mubr.msk.f32.mxu1 %vm10193_vm2, %v10194_v27 }
 0x86c   : > { %8170 = vmatprep.subr.bf16.mxu1 %v10194_v27 }
 0x86e   : > { %8168 = vmatmul.mubr.msk.f32.vlgmr.msra.gmra.mrb[28].mxu1 %vm3028_vm3, %v3119_v49  ;;  %v3762_v49 = vld [vmem:[#allocation23 + $0x178] sm:$0xff] }
 0x86f   : > { %8171 = vmatpush3.bf16.msra.mxu1 %v9543_v50  ;;  %8186 = vmatprep.mubr.msk.f32.mxu1 %vm10193_vm2, %v10194_v27  ;;  %v11014_v50 = vpack.c.bf16 %v3762_v49, %v3761_v48  ;;  %v9589_v48 = vld [vmem:[#allocation17 + $0x78] sm:$0xff]   ;;  %v9590_v49 = vld [vmem:[#allocation17 + $0x80] sm:$0xff]  }
 0x870   : > { %8172 = vmatprep.subr.bf16.mxu1 %v10194_v27 }
 0x873   : > { %8173 = vmatpush3.bf16.msra.mxu1 %v9545_v51 }
 0x874   : > { %8174 = vmatprep.subr.bf16.mxu1 %v10194_v27 }
 0x877   : > { %8175 = vmatpush3.bf16.msra.mxu1 %v9547_v52 }
 0x878   : > { %8176 = vmatprep.subr.bf16.mxu1 %v10194_v27 }
 0x87b   : > { %8177 = vmatpush3.bf16.msra.mxu1 %v9549_v53 }
 0x87c   : > { %8178 = vmatprep.subr.bf16.mxu1 %v10194_v27 }
 0x87f   : > { %8179 = vmatpush3.bf16.msra.mxu1 %v9551_v54 }
 0x880   : > { %8180 = vmatprep.subr.bf16.mxu1 %v10194_v27 }
 0x883   : > { %8181 = vmatpush3.bf16.msra.mxu1 %v9553_v55 }
 0x884   : > { %8182 = vmatprep.subr.bf16.mxu1 %v10194_v27 }
 0x887   : > { %8183 = vmatpush3.bf16.msra.mxu1 %v9555_v56  ;;  %v7122_v56 = vld [vmem:[%s11541_s17 + $0x2] ss:$0 sm:$0xff] }
 0x888   : > { %8184 = vmatprep.subr.bf16.mxu1 %v10194_v27 }
 0x88b   : > { %8185 = vmatpush3.bf16.msra.mxu1 %v9557_v57 }
 0x88c   : > { %8208 = vmatprep.subr.mxu1 %v10194_v27 }
 0x93d   : > { %v3098_v58 = vpop.f32.mrb[26].mxu1 }
 0x93e   : > { %v8164_v59 = vpop.f32.mrb[27].mxu1  ;;  %8206 = vmatmul.mubr.f32.vlgmr.msra.gmra.mrb[14].mxu0 %v3098_v58 }
 0x93f   : > { %8233 = vmatpush3.msra.mxu0 %v3026_v47  ;;  %8234 = vmatprep.mubr.msk.f32.mxu0 %vm10193_vm2, %v10194_v27 }
 0x940   : > { %8237 = vmatprep.subr.bf16.mxu0 %v10194_v27 }
 0x941   : > { %v3189_v62 = vpop.f32.mrb[28].mxu1 }
 0x942   : > { %v8169_v63 = vpop.f32.mrb[29].mxu1  ;;  %8187 = vmatmul.mubr.f32.vlgmr.msra.gmra.mrb[30].mxu1 %v3189_v62  ;;  %8235 = vmatmul.mubr.msk.f32.vlgmr.msra.gmra.mrb[16].mxu0 %vm3028_vm3, %v3562_v60  ;;  %v9574_v60 = vld [vmem:[#allocation17] sm:$0xff]   ;;  %v9578_v62 = vld [vmem:[#allocation17 + $0x10] sm:$0xff]  }
 0x943   : > { %8209 = vmatpush3.msra.mxu1 %v3026_v47  ;;  %8210 = vmatprep.mubr.msk.f32.mxu1 %vm10193_vm2, %v10194_v27  ;;  %v11008_v47 = vpack.c.bf16 %v3760_v46, %v3759_v45  ;;  %v9580_v63 = vld [vmem:[#allocation17 + $0x18] sm:$0xff]   ;;  %v9585_v45 = vld [vmem:[#allocation17 + $0x68] sm:$0xff]   ;;  %v9587_v46 = vld [vmem:[#allocation17 + $0x70] sm:$0xff]  }
 0x944   : > { %8213 = vmatprep.subr.bf16.mxu1 %v10194_v27  ;;  %8238 = vmatpush3.bf16.msra.mxu0 %v9559_v61  ;;  %v9576_v61 = vld [vmem:[#allocation17 + $0x8] sm:$0xff]  }
 0x945   : > { %8239 = vmatprep.subr.bf16.mxu0 %v10194_v27  ;;  %8253 = vmatprep.mubr.msk.f32.mxu0 %vm10193_vm2, %v10194_v27 }
 0x946   : > { %8211 = vmatmul.mubr.msk.f32.vlgmr.msra.gmra.mrb[32].mxu1 %vm3028_vm3, %v3383_v0  ;;  %v9582_v0 = vld [vmem:[#allocation17 + $0x20] sm:$0xff]  }
 0x947   : > { %8214 = vmatpush3.bf16.msra.mxu1 %v9558_v1  ;;  %8229 = vmatprep.mubr.msk.f32.mxu1 %vm10193_vm2, %v10194_v27  ;;  %v9584_v1 = vld [vmem:[#allocation17 + $0x28] sm:$0xff]  }
 0x948   : > { %8215 = vmatprep.subr.bf16.mxu1 %v10194_v27  ;;  %8240 = vmatpush3.bf16.msra.mxu0 %v9561_v2  ;;  %v9586_v2 = vld [vmem:[#allocation17 + $0x30] sm:$0xff]  }
 0x949   : > { %8241 = vmatprep.subr.bf16.mxu0 %v10194_v27 }
 0x94b   : > { %8216 = vmatpush3.bf16.msra.mxu1 %v9560_v3  ;;  %v9588_v3 = vld [vmem:[#allocation17 + $0x38] sm:$0xff]  }
 0x94c   : > { %8217 = vmatprep.subr.bf16.mxu1 %v10194_v27  ;;  %8242 = vmatpush3.bf16.msra.mxu0 %v9563_v4 }
 0x94d   : > { %8243 = vmatprep.subr.bf16.mxu0 %v10194_v27 }
 0x94f   : > { %8218 = vmatpush3.bf16.msra.mxu1 %v9562_v5 }
 0x950   : > { %8219 = vmatprep.subr.bf16.mxu1 %v10194_v27  ;;  %8244 = vmatpush3.bf16.msra.mxu0 %v9565_v6 }
 0x951   : > { %8245 = vmatprep.subr.bf16.mxu0 %v10194_v27 }
 0x953   : > { %8220 = vmatpush3.bf16.msra.mxu1 %v9564_v7 }
 0x954   : > { %8221 = vmatprep.subr.bf16.mxu1 %v10194_v27  ;;  %8246 = vmatpush3.bf16.msra.mxu0 %v9567_v8 }
 0x955   : > { %8247 = vmatprep.subr.bf16.mxu0 %v10194_v27 }
 0x957   : > { %8222 = vmatpush3.bf16.msra.mxu1 %v9566_v9 }
 0x958   : > { %8223 = vmatprep.subr.bf16.mxu1 %v10194_v27  ;;  %8248 = vmatpush3.bf16.msra.mxu0 %v9569_v10 }
 0x959   : > { %8249 = vmatprep.subr.bf16.mxu0 %v10194_v27 }
 0x95b   : > { %8224 = vmatpush3.bf16.msra.mxu1 %v9568_v11 }
 0x95c   : > { %8225 = vmatprep.subr.bf16.mxu1 %v10194_v27  ;;  %8250 = vmatpush3.bf16.msra.mxu0 %v9571_v13 }
 0x95d   : > { %8251 = vmatprep.subr.bf16.mxu0 %v10194_v27 }
 0x95f   : > { %8226 = vmatpush3.bf16.msra.mxu1 %v9570_v12 }
 0x960   : > { %8227 = vmatprep.subr.bf16.mxu1 %v10194_v27  ;;  %8252 = vmatpush3.bf16.msra.mxu0 %v9573_v15 }
 0x961   : > { %9070 = vmatprep.subr.bf16.mxu0 %v10192_v26 }
 0x963   : > { %8228 = vmatpush3.bf16.msra.mxu1 %v9572_v14 }
 0x964   : > { %9046 = vmatprep.subr.bf16.mxu1 %v10192_v26 }
 0xa11   : > { %v3378_v16 = vpop.f32.mrb[14].mxu0 }
 0xa12   : > { %v8207_v17 = vpop.f32.mrb[15].mxu0 }
 0xa15   : > { %v3292_v20 = vpop.f32.mrb[30].mxu1  ;;  %v3632_v21 = vpop.f32.mrb[16].mxu0 }
 0xa16   : > { %v10968_v23 = vadd.f32 %v3378_v16, %v3292_v20  ;;  %v8188_v24 = vpop.f32.mrb[31].mxu1  ;;  %v8236_v25 = vpop.f32.mrb[17].mxu0  ;;  %8254 = vmatmul.mubr.f32.vlgmr.msra.gmra.mrb[18].mxu0 %v3632_v21 }
 0xa17   : > { %9072 = vmatpush3.bf16.msra.mxu0 %v10966_v22  ;;  %8323 = vmatprep.mubr.msk.f32.mxu0 %vm10193_vm2, %v10194_v27 }
 0xa18   : > { %9073 = vmatprep.subr.bf16.mxu0 %v10192_v26 }
 0xa19   : > { %v3453_v30 = vpop.f32.mrb[32].mxu1 }
 0xa1a   : > { %v8212_v32 = vpop.f32.mrb[33].mxu1  ;;  %8230 = vmatmul.mubr.f32.vlgmr.msra.gmra.mrb[34].mxu1 %v3453_v30 }
 0xa1b   : > { %9048 = vmatpush3.bf16.msra.mxu1 %v10966_v22  ;;  %9075 = vmatpush3.bf16.msra.mxu0 %v10974_v31 }
 0xa1c   : > { %9049 = vmatprep.subr.bf16.mxu1 %v10192_v26  ;;  %9076 = vmatprep.subr.bf16.mxu0 %v10192_v26 }
 0xa1d   : > { %8288 = vmatprep.mubr.msk.f32.mxu1 %vm10193_vm2, %v10194_v27 }
 0xa1f   : > { %9051 = vmatpush3.bf16.msra.mxu1 %v10974_v31  ;;  %9078 = vmatpush3.bf16.msra.mxu0 %v10980_v35 }
 0xa20   : > { %9052 = vmatprep.subr.bf16.mxu1 %v10192_v26  ;;  %9079 = vmatprep.subr.bf16.mxu0 %v10192_v26 }
 0xa23   : > { %9054 = vmatpush3.bf16.msra.mxu1 %v10980_v35  ;;  %9081 = vmatpush3.bf16.msra.mxu0 %v10988_v38 }
 0xa24   : > { %9055 = vmatprep.subr.bf16.mxu1 %v10192_v26  ;;  %9082 = vmatprep.subr.bf16.mxu0 %v10192_v26 }
 0xa27   : > { %9057 = vmatpush3.bf16.msra.mxu1 %v10988_v38  ;;  %9084 = vmatpush3.bf16.msra.mxu0 %v10994_v41 }
 0xa28   : > { %9058 = vmatprep.subr.bf16.mxu1 %v10192_v26  ;;  %9085 = vmatprep.subr.bf16.mxu0 %v10192_v26 }
 0xa2b   : > { %9060 = vmatpush3.bf16.msra.mxu1 %v10994_v41  ;;  %9087 = vmatpush3.bf16.msra.mxu0 %v11000_v44 }
 0xa2c   : > { %9061 = vmatprep.subr.bf16.mxu1 %v10192_v26  ;;  %9088 = vmatprep.subr.bf16.mxu0 %v10192_v26 }
 0xa2f   : > { %9063 = vmatpush3.bf16.msra.mxu1 %v11000_v44  ;;  %9090 = vmatpush3.bf16.msra.mxu0 %v11008_v47 }
 0xa30   : > { %9064 = vmatprep.subr.bf16.mxu1 %v10192_v26  ;;  %9091 = vmatprep.subr.bf16.mxu0 %v10192_v26 }
 0xa33   : > { %9066 = vmatpush3.bf16.msra.mxu1 %v11008_v47  ;;  %9093 = vmatpush3.bf16.msra.mxu0 %v11014_v50 }
 0xa34   : > { %9067 = vmatprep.subr.bf16.mxu1 %v10192_v26  ;;  %8355 = vmatprep.subr.bf16.mxu0 %v10194_v27 }
 0xa37   : > { %9069 = vmatpush3.bf16.msra.mxu1 %v11014_v50 }
 0xa38   : > { %8326 = vmatprep.subr.mxu1 %v10194_v27 }
 0xae9   : > { %v3735_v51 = vpop.f32.mrb[18].mxu0 }
 0xaea   : > { %v8255_v52 = vpop.f32.mrb[19].mxu0 }
 0xaed   : > { %v3556_v53 = vpop.f32.mrb[34].mxu1 }
 0xaee   : > { %v3560_v54 = vadd.f32 %v3556_v53, %v10968_v23  ;;  %v8231_v55 = vpop.f32.mrb[35].mxu1  ;;  %v9591_v53 = vld [vmem:[#allocation17 + $0x88] sm:$0xff]  }
 0xaf0   : > { %v3739_v57 = vadd.f32 %v3735_v51, %v3560_v54 }
 0xaf2   : > { %v3745_v58 = vadd.f32 %v7122_v56, %v3739_v57  ;;  %v7144_v56 = vld [vmem:[%s11542_s21 + $0x8] sm:$0xf] }
 0xaf3   : > { %v9592_v57 = vld [vmem:[#allocation17 + $0x90] sm:$0xff]  }
 0xaf4   : > { %v3841_v59 = vmul.f32 %v3745_v58, %v3745_v58  ;;  %8289 = vmatmul.mubr.f32.vlgmr.msra.gmra.mrb[36].mxu1 %v3745_v58 }
 0xaf5   : > { %8328 = vmatprep.mubr.msk.f32.mxu1 %vm10193_vm2, %v10194_v27 }
 0xaf6   : > { %8324 = vmatmul.mubr.f32.vlgmr.msra.gmra.mrb[20].mxu0 %v3841_v59  ;;  %v9594_v59 = vld [vmem:[#allocation17 + $0xa0] sm:$0xff]  }
 0xaf7   : > { %8371 = vmatprep.mubr.msk.f32.mxu0 %vm10193_vm2, %v10194_v27  ;;  %8356 = vmatpush3.bf16.msra.mxu0 %v9574_v60  ;;  %v9595_v60 = vld [vmem:[#allocation17 + $0xa8] sm:$0xff]  }
 0xaf8   : > { %8357 = vmatprep.subr.bf16.mxu0 %v10194_v27 }
 0xafb   : > { %8358 = vmatpush3.bf16.msra.mxu0 %v9576_v61  ;;  %v9596_v61 = vld [vmem:[#allocation17 + $0xb0] sm:$0xff]  }
 0xafc   : > { %8359 = vmatprep.subr.bf16.mxu0 %v10194_v27 }
 0xaff   : > { %8360 = vmatpush3.bf16.msra.mxu0 %v9578_v62  ;;  %v9597_v62 = vld [vmem:[#allocation17 + $0xb8] sm:$0xff]  }
 0xb00   : > { %8361 = vmatprep.subr.bf16.mxu0 %v10194_v27 }
 0xb03   : > { %8362 = vmatpush3.bf16.msra.mxu0 %v9580_v63 }
 0xb04   : > { %8363 = vmatprep.subr.bf16.mxu0 %v10194_v27 }
 0xb07   : > { %8364 = vmatpush3.bf16.msra.mxu0 %v9582_v0 }
 0xb08   : > { %8365 = vmatprep.subr.bf16.mxu0 %v10194_v27 }
 0xb0b   : > { %8366 = vmatpush3.bf16.msra.mxu0 %v9584_v1 }
 0xb0c   : > { %8367 = vmatprep.subr.bf16.mxu0 %v10194_v27 }
 0xb0f   : > { %8368 = vmatpush3.bf16.msra.mxu0 %v9586_v2 }
 0xb10   : > { %8369 = vmatprep.subr.bf16.mxu0 %v10194_v27 }
 0xb13   : > { %8370 = vmatpush3.bf16.msra.mxu0 %v9588_v3 }
 0xb14   : > { %8379 = vmatprep.subr.bf16.mxu0 %v10194_v27 }
 0xbc7   : > { %v3829_v4 = vpop.f32.mrb[36].mxu1 }
 0xbc8   : > { %v3834_v5 = vsel %vm3833_vm4, %v3829_v4, 0.0  ;;  %v8290_v6 = vpop.f32.mrb[37].mxu1 }
 0xbc9   : > { %v3835_v7 = vrot.slane %v3834_v5, 4  ;;  %v3908_v8 = vpop.f32.mrb[20].mxu0 }
 0xbca   : > { %v3912_v9 = vsel %vm3833_vm4, %v3908_v8, 0.0  ;;  %v8325_v10 = vpop.f32.mrb[21].mxu0 }
 0xbcb   : > { %v3836_v11 = vadd.f32 %v3835_v7, %v3834_v5  ;;  %v3913_v12 = vrot.slane %v3912_v9, 4  ;;  %v7155_v7 = vld [vmem:[%s11541_s17 + $0x3] ss:$0 sm:$0xff] }
 0xbcd   : > { %v3837_v13 = vrot.slane %v3836_v11, 2  ;;  %v3914_v14 = vadd.f32 %v3913_v12, %v3912_v9  ;;  %v9598_v12 = vld [vmem:[#allocation19] sm:$0xff]  }
 0xbcf   : > { %v3838_v15 = vadd.f32 %v3837_v13, %v3836_v11  ;;  %v3915_v16 = vrot.slane %v3914_v14, 2  ;;  %v9600_v13 = vld [vmem:[#allocation19 + $0x8] sm:$0xff]  }
 0xbd1   : > { %v3839_v17 = vrot.slane %v3838_v15, 1  ;;  %v3916_v18 = vadd.f32 %v3915_v16, %v3914_v14  ;;  %v9602_v14 = vld [vmem:[#allocation19 + $0x10] sm:$0xff]   ;;  %v9606_v16 = vld [vmem:[#allocation19 + $0x20] sm:$0xff]  }
 0xbd3   : > { %v3840_v19 = vadd.f32 %v3839_v17, %v3838_v15  ;;  %v3917_v20 = vrot.slane %v3916_v18, 1  ;;  %v9604_v15 = vld [vmem:[#allocation19 + $0x18] sm:$0xff]   ;;  %v9608_v17 = vld [vmem:[#allocation19 + $0x28] sm:$0xff]  }
 0xbd5   : > { %v3919_v21 = vmul.f32 %v3840_v19, %v3840_v19  ;;  %v3918_v23 = vadd.f32 %v3917_v20, %v3916_v18  ;;  %v3922_v29 = vsub.f32 %v3745_v58, %v3840_v19  ;;  %v9593_v58 = vld [vmem:[#allocation17 + $0x98] sm:$0xff]   ;;  %v9610_v18 = vld [vmem:[#allocation19 + $0x30] sm:$0xff]  }
 0xbd6   : > { %v9612_v19 = vld [vmem:[#allocation19 + $0x38] sm:$0xff]  }
 0xbd7   : > { %v3920_v24 = vsub.f32 %v3918_v23, %v3919_v21 }
 0xbd9   : > { %v3921_v25 = vmax.f32 %v3920_v24, 0.0 }
 0xbdb   : > { %v3923_v28 = vadd.f32 1e-05, %v3921_v25 }
 0xbdd   : > { %9674 = vrsqrt.f32 %v3923_v28 }
 0xbe7   : > { %v9675_v30 = vpop.eup %9674 }
 0xbe8   : > { %v3925_v32 = vmul.f32 %v9675_v30, %v3922_v29 }
 0xbea   : > { %v11038_v33 = vmax.f32 %v3925_v32, 0.0 }
 0xbec   : > { %8327 = vmatpush3.msk.msra.mxu1 %vm3833_vm4, %v11038_v33 }
 0xbed   : > { %8329 = vmatmul.mubr.msk.f32.vlgmr.msra.gmra.mrb[38].mxu1 %vm3928_vm5, %v3927_v34  ;;  %8331 = vmatprep.subr.mxu1 %v10194_v27 }
 0xbee   : > { %8332 = vmatpush3.msk.msra.mxu1 %vm3833_vm4, %v11038_v33  ;;  %8333 = vmatprep.mubr.msk.f32.mxu1 %vm10193_vm2, %v10194_v27 }
 0xbef   : > { %8336 = vmatprep.subr.bf16.mxu1 %v10194_v27 }
 0xbf1   : > { %8334 = vmatmul.mubr.msk.f32.vlgmr.msra.gmra.mrb[40].mxu1 %vm3928_vm5, %v7125_v36 }
 0xbf2   : > { %8337 = vmatpush3.bf16.msra.mxu1 %v9575_v37  ;;  %8352 = vmatprep.mubr.msk.f32.mxu1 %vm10193_vm2, %v10194_v27 }
 0xbf3   : > { %8338 = vmatprep.subr.bf16.mxu1 %v10194_v27 }
 0xbf6   : > { %8339 = vmatpush3.bf16.msra.mxu1 %v9577_v39 }
 0xbf7   : > { %8340 = vmatprep.subr.bf16.mxu1 %v10194_v27 }
 0xbfa   : > { %8341 = vmatpush3.bf16.msra.mxu1 %v9579_v40 }
 0xbfb   : > { %8342 = vmatprep.subr.bf16.mxu1 %v10194_v27 }
 0xbfe   : > { %8343 = vmatpush3.bf16.msra.mxu1 %v9581_v42 }
 0xbff   : > { %8344 = vmatprep.subr.bf16.mxu1 %v10194_v27 }
 0xc02   : > { %8345 = vmatpush3.bf16.msra.mxu1 %v9583_v43 }
 0xc03   : > { %8346 = vmatprep.subr.bf16.mxu1 %v10194_v27 }
 0xc06   : > { %8347 = vmatpush3.bf16.msra.mxu1 %v9585_v45 }
 0xc07   : > { %8348 = vmatprep.subr.bf16.mxu1 %v10194_v27 }
 0xc0a   : > { %8349 = vmatpush3.bf16.msra.mxu1 %v9587_v46 }
 0xc0b   : > { %8350 = vmatprep.subr.bf16.mxu1 %v10194_v27 }
 0xc0e   : > { %8351 = vmatpush3.bf16.msra.mxu1 %v9589_v48 }
 0xc0f   : > { %8374 = vmatprep.subr.mxu1 %v10194_v27 }
 0xcc0   : > { %v4001_v51 = vpop.f32.mrb[38].mxu1 }
 0xcc1   : > { %v8330_v52 = vpop.f32.mrb[39].mxu1  ;;  %8372 = vmatmul.mubr.f32.vlgmr.msra.gmra.mrb[22].mxu0 %v4001_v51 }
 0xcc2   : > { %8380 = vmatpush3.bf16.msra.mxu0 %v9590_v49  ;;  %8395 = vmatprep.mubr.msk.f32.mxu0 %vm10193_vm2, %v10194_v27 }
 0xcc3   : > { %8381 = vmatprep.subr.bf16.mxu0 %v10194_v27 }
 0xcc4   : > { %v4092_v54 = vpop.f32.mrb[40].mxu1 }
 0xcc5   : > { %v8335_v55 = vpop.f32.mrb[41].mxu1  ;;  %8353 = vmatmul.mubr.f32.vlgmr.msra.gmra.mrb[42].mxu1 %v4092_v54 }
 0xcc6   : > { %8375 = vmatpush3.msk.msra.mxu1 %vm3833_vm4, %v11038_v33  ;;  %8376 = vmatprep.mubr.msk.f32.mxu1 %vm10193_vm2, %v10194_v27 }
 0xcc7   : > { %8382 = vmatpush3.bf16.msra.mxu0 %v9591_v53  ;;  %9094 = vmatprep.subr.bf16.mxu1 %v10192_v26 }
 0xcc8   : > { %8383 = vmatprep.subr.bf16.mxu0 %v10194_v27 }
 0xcc9   : > { %8377 = vmatmul.mubr.msk.f32.vlgmr.msra.gmra.mrb[44].mxu1 %vm3928_vm5, %v7144_v56 }
 0xcca   : > { %9096 = vmatpush3.bf16.msra.mxu1 %v10966_v22  ;;  %8430 = vmatprep.mubr.msk.f32.mxu1 %vm10193_vm2, %v10194_v27 }
 0xccb   : > { %8384 = vmatpush3.bf16.msra.mxu0 %v9592_v57  ;;  %9097 = vmatprep.subr.bf16.mxu1 %v10192_v26  ;;  %v4633_v57 = vld [vmem:[#allocation10] sm:$0xf] }
 0xccc   : > { %8385 = vmatprep.subr.bf16.mxu0 %v10194_v27 }
 0xcce   : > { %9099 = vmatpush3.bf16.msra.mxu1 %v10974_v31 }
 0xccf   : > { %8386 = vmatpush3.bf16.msra.mxu0 %v9593_v58  ;;  %9100 = vmatprep.subr.bf16.mxu1 %v10192_v26  ;;  %v4727_v58 = vld [vmem:[#allocation10 + $0x4] sm:$0xf] }
 0xcd0   : > { %8387 = vmatprep.subr.bf16.mxu0 %v10194_v27 }
 0xcd2   : > { %9102 = vmatpush3.bf16.msra.mxu1 %v10980_v35 }
 0xcd3   : > { %8388 = vmatpush3.bf16.msra.mxu0 %v9594_v59  ;;  %9103 = vmatprep.subr.bf16.mxu1 %v10192_v26  ;;  %v9599_v59 = vld [vmem:[#allocation19 + $0x40] sm:$0xff]  }
 0xcd4   : > { %8389 = vmatprep.subr.bf16.mxu0 %v10194_v27 }
 0xcd6   : > { %9105 = vmatpush3.bf16.msra.mxu1 %v10988_v38 }
 0xcd7   : > { %8390 = vmatpush3.bf16.msra.mxu0 %v9595_v60  ;;  %9106 = vmatprep.subr.bf16.mxu1 %v10192_v26  ;;  %v9601_v60 = vld [vmem:[#allocation19 + $0x48] sm:$0xff]  }
 0xcd8   : > { %8391 = vmatprep.subr.bf16.mxu0 %v10194_v27 }
 0xcda   : > { %9108 = vmatpush3.bf16.msra.mxu1 %v10994_v41 }
 0xcdb   : > { %9109 = vmatprep.subr.bf16.mxu1 %v10192_v26  ;;  %8392 = vmatpush3.bf16.msra.mxu0 %v9596_v61  ;;  %v9603_v61 = vld [vmem:[#allocation19 + $0x50] sm:$0xff]  }
 0xcdc   : > { %8393 = vmatprep.subr.bf16.mxu0 %v10194_v27 }
 0xcde   : > { %9111 = vmatpush3.bf16.msra.mxu1 %v11000_v44 }
 0xcdf   : > { %9112 = vmatprep.subr.bf16.mxu1 %v10192_v26  ;;  %8394 = vmatpush3.bf16.msra.mxu0 %v9597_v62  ;;  %v9605_v62 = vld [vmem:[#allocation19 + $0x58] sm:$0xff]  }
 0xce0   : > { %9118 = vmatprep.subr.bf16.mxu0 %v10192_v26 }
 0xce2   : > { %9114 = vmatpush3.bf16.msra.mxu1 %v11008_v47 }
 0xce3   : > { %9115 = vmatprep.subr.bf16.mxu1 %v10192_v26 }
 0xce6   : > { %9117 = vmatpush3.bf16.msra.mxu1 %v11014_v50 }
 0xce7   : > { %8468 = vmatprep.subr.mxu1 %v10194_v27 }
 0xd94   : > { %v4281_v63 = vpop.f32.mrb[22].mxu0 }
 0xd95   : > { %v8373_v0 = vpop.f32.mrb[23].mxu0 }
 0xd96   : > { %v9609_v0 = vld [vmem:[#allocation19 + $0x68] sm:$0xff]  }
 0xd98   : > { %v4195_v1 = vpop.f32.mrb[42].mxu1 }
 0xd99   : > { %v4282_v2 = vadd.f32 %v4281_v63, %v4195_v1  ;;  %v8354_v3 = vpop.f32.mrb[43].mxu1  ;;  %v9607_v63 = vld [vmem:[#allocation19 + $0x60] sm:$0xff]   ;;  %v9611_v1 = vld [vmem:[#allocation19 + $0x70] sm:$0xff]  }
 0xd9c   : > { %v4356_v4 = vpop.f32.mrb[44].mxu1 }
 0xd9d   : > { %v8378_v5 = vpop.f32.mrb[45].mxu1  ;;  %8396 = vmatmul.mubr.f32.vlgmr.msra.gmra.mrb[24].mxu0 %v4356_v4 }
 0xd9e   : > { %9120 = vmatpush3.bf16.msra.mxu0 %v10966_v22  ;;  %8465 = vmatprep.mubr.msk.f32.mxu0 %vm10193_vm2, %v10194_v27 }
 0xd9f   : > { %9121 = vmatprep.subr.bf16.mxu0 %v10192_v26 }
 0xda2   : > { %9123 = vmatpush3.bf16.msra.mxu0 %v10974_v31 }
 0xda3   : > { %9124 = vmatprep.subr.bf16.mxu0 %v10192_v26 }
 0xda6   : > { %9126 = vmatpush3.bf16.msra.mxu0 %v10980_v35 }
 0xda7   : > { %9127 = vmatprep.subr.bf16.mxu0 %v10192_v26 }
 0xdaa   : > { %9129 = vmatpush3.bf16.msra.mxu0 %v10988_v38 }
 0xdab   : > { %9130 = vmatprep.subr.bf16.mxu0 %v10192_v26 }
 0xdae   : > { %9132 = vmatpush3.bf16.msra.mxu0 %v10994_v41 }
 0xdaf   : > { %9133 = vmatprep.subr.bf16.mxu0 %v10192_v26 }
 0xdb2   : > { %9135 = vmatpush3.bf16.msra.mxu0 %v11000_v44 }
 0xdb3   : > { %9136 = vmatprep.subr.bf16.mxu0 %v10192_v26 }
 0xdb6   : > { %9138 = vmatpush3.bf16.msra.mxu0 %v11008_v47 }
 0xdb7   : > { %9139 = vmatprep.subr.bf16.mxu0 %v10192_v26 }
 0xdba   : > { %9141 = vmatpush3.bf16.msra.mxu0 %v11014_v50 }
 0xdbb   : > { %8497 = vmatprep.subr.bf16.mxu0 %v10194_v27 }
 0xe70   : > { %v4459_v6 = vpop.f32.mrb[24].mxu0 }
 0xe71   : > { %v4463_v8 = vadd.f32 %v4459_v6, %v4282_v2  ;;  %v8397_v9 = vpop.f32.mrb[25].mxu0  ;;  %v9613_v2 = vld [vmem:[#allocation19 + $0x78] sm:$0xff]  }
 0xe72   : > { %v9615_v9 = vld [vmem:[#allocation19 + $0x88] sm:$0xff]  }
 0xe73   : > { %v4469_v10 = vadd.f32 %v7155_v7, %v4463_v8  ;;  %v4991_v7 = vld [vmem:[#allocation10 + $0x8] sm:$0xf]  ;;  %v9614_v8 = vld [vmem:[#allocation19 + $0x80] sm:$0xff]  }
 0xe75   : > { %v4547_v11 = vmul.f32 %v4469_v10, %v4469_v10  ;;  %8431 = vmatmul.mubr.f32.vlgmr.msra.gmra.mrb[46].mxu1 %v4469_v10 }
 0xe76   : > { %8470 = vmatprep.mubr.msk.f32.mxu1 %vm10193_vm2, %v10194_v27 }
 0xe77   : > { %8466 = vmatmul.mubr.f32.vlgmr.msra.gmra.mrb[26].mxu0 %v4547_v11  ;;  %v9617_v11 = vld [vmem:[#allocation19 + $0x98] sm:$0xff]  }
 0xe78   : > { %8513 = vmatprep.mubr.msk.f32.mxu0 %vm10193_vm2, %v10194_v27  ;;  %8498 = vmatpush3.bf16.msra.mxu0 %v9598_v12  ;;  %v9618_v12 = vld [vmem:[#allocation19 + $0xa0] sm:$0xff]  }
 0xe79   : > { %8499 = vmatprep.subr.bf16.mxu0 %v10194_v27 }
 0xe7c   : > { %8500 = vmatpush3.bf16.msra.mxu0 %v9600_v13  ;;  %v9619_v13 = vld [vmem:[#allocation19 + $0xa8] sm:$0xff]  }
 0xe7d   : > { %8501 = vmatprep.subr.bf16.mxu0 %v10194_v27 }
 0xe80   : > { %8502 = vmatpush3.bf16.msra.mxu0 %v9602_v14  ;;  %v9620_v14 = vld [vmem:[#allocation19 + $0xb0] sm:$0xff]  }
 0xe81   : > { %8503 = vmatprep.subr.bf16.mxu0 %v10194_v27 }
 0xe84   : > { %8504 = vmatpush3.bf16.msra.mxu0 %v9604_v15  ;;  %v9621_v15 = vld [vmem:[#allocation19 + $0xb8] sm:$0xff]  }
 0xe85   : > { %8505 = vmatprep.subr.bf16.mxu0 %v10194_v27 }
 0xe88   : > { %8506 = vmatpush3.bf16.msra.mxu0 %v9606_v16 }
 0xe89   : > { %8507 = vmatprep.subr.bf16.mxu0 %v10194_v27 }
 0xe8c   : > { %8508 = vmatpush3.bf16.msra.mxu0 %v9608_v17 }
 0xe8d   : > { %8509 = vmatprep.subr.bf16.mxu0 %v10194_v27 }
 0xe90   : > { %8510 = vmatpush3.bf16.msra.mxu0 %v9610_v18 }
 0xe91   : > { %8511 = vmatprep.subr.bf16.mxu0 %v10194_v27 }
 0xe94   : > { %8512 = vmatpush3.bf16.msra.mxu0 %v9612_v19 }
 0xe95   : > { %9142 = vmatprep.subr.bf16.mxu0 %v10192_v26 }
 0xf48   : > { %v4536_v20 = vpop.f32.mrb[46].mxu1 }
 0xf49   : > { %v4540_v21 = vsel %vm3833_vm4, %v4536_v20, 0.0  ;;  %v8432_v23 = vpop.f32.mrb[47].mxu1 }
 0xf4a   : > { %v4541_v24 = vrot.slane %v4540_v21, 4  ;;  %v4614_v25 = vpop.f32.mrb[26].mxu0 }
 0xf4b   : > { %v4618_v28 = vsel %vm3833_vm4, %v4614_v25, 0.0  ;;  %v8467_v29 = vpop.f32.mrb[27].mxu0  ;;  %v7186_v25 = vld [vmem:[%s11541_s17 + $0x4] ss:$0 sm:$0xff] }
 0xf4c   : > { %v4542_v30 = vadd.f32 %v4541_v24, %v4540_v21  ;;  %v4619_v32 = vrot.slane %v4618_v28, 4 }
 0xf4e   : > { %v4543_v34 = vrot.slane %v4542_v30, 2  ;;  %v4620_v36 = vadd.f32 %v4619_v32, %v4618_v28 }
 0xf50   : > { %v4544_v37 = vadd.f32 %v4543_v34, %v4542_v30  ;;  %v4621_v39 = vrot.slane %v4620_v36, 2  ;;  %v9622_v34 = vld [vmem:[#allocation20] sm:$0xff]  }
 0xf52   : > { %v4545_v40 = vrot.slane %v4544_v37, 1  ;;  %v4622_v42 = vadd.f32 %v4621_v39, %v4620_v36  ;;  %v9624_v36 = vld [vmem:[#allocation20 + $0x8] sm:$0xff]   ;;  %v9628_v39 = vld [vmem:[#allocation20 + $0x18] sm:$0xff]  }
 0xf54   : > { %v4546_v43 = vadd.f32 %v4545_v40, %v4544_v37  ;;  %v4623_v45 = vrot.slane %v4622_v42, 1  ;;  %v9626_v37 = vld [vmem:[#allocation20 + $0x10] sm:$0xff]   ;;  %v9630_v40 = vld [vmem:[#allocation20 + $0x20] sm:$0xff]  }
 0xf56   : > { %v4625_v46 = vmul.f32 %v4546_v43, %v4546_v43  ;;  %v4624_v48 = vadd.f32 %v4623_v45, %v4622_v42  ;;  %v4628_v53 = vsub.f32 %v4469_v10, %v4546_v43  ;;  %v9616_v10 = vld [vmem:[#allocation19 + $0x90] sm:$0xff]   ;;  %v9632_v42 = vld [vmem:[#allocation20 + $0x28] sm:$0xff]   ;;  %v9636_v45 = vld [vmem:[#allocation20 + $0x38] sm:$0xff]  }
 0xf57   : > { %v9634_v43 = vld [vmem:[#allocation20 + $0x30] sm:$0xff]  }
 0xf58   : > { %v4626_v49 = vsub.f32 %v4624_v48, %v4625_v46 }
 0xf5a   : > { %v4627_v51 = vmax.f32 %v4626_v49, 0.0 }
 0xf5c   : > { %v4629_v52 = vadd.f32 1e-05, %v4627_v51 }
 0xf5e   : > { %9676 = vrsqrt.f32 %v4629_v52 }
 0xf68   : > { %v9677_v54 = vpop.eup %9676 }
 0xf69   : > { %v4631_v55 = vmul.f32 %v9677_v54, %v4628_v53 }
 0xf6b   : > { %v4632_v56 = vmax.f32 %v4631_v55, 0.0 }
 0xf6d   : > { %8469 = vmatpush3.msk.msra.mxu1 %vm3833_vm4, %v4632_v56 }
 0xf6e   : > { %8471 = vmatmul.mubr.msk.f32.vlgmr.msra.gmra.mrb[48].mxu1 %vm3928_vm5, %v4633_v57  ;;  %8473 = vmatprep.subr.mxu1 %v10194_v27 }
 0xf6f   : > { %8474 = vmatpush3.msk.msra.mxu1 %vm3833_vm4, %v4632_v56  ;;  %8475 = vmatprep.mubr.msk.f32.mxu1 %vm10193_vm2, %v10194_v27 }
 0xf70   : > { %8478 = vmatprep.subr.bf16.mxu1 %v10194_v27 }
 0xf72   : > { %8476 = vmatmul.mubr.msk.f32.vlgmr.msra.gmra.mrb[50].mxu1 %vm3928_vm5, %v4727_v58 }
 0xf73   : > { %8479 = vmatpush3.bf16.msra.mxu1 %v9599_v59  ;;  %8494 = vmatprep.mubr.msk.f32.mxu1 %vm10193_vm2, %v10194_v27 }
 0xf74   : > { %8480 = vmatprep.subr.bf16.mxu1 %v10194_v27 }
 0xf77   : > { %8481 = vmatpush3.bf16.msra.mxu1 %v9601_v60 }
 0xf78   : > { %8482 = vmatprep.subr.bf16.mxu1 %v10194_v27 }
 0xf7b   : > { %8483 = vmatpush3.bf16.msra.mxu1 %v9603_v61 }
 0xf7c   : > { %8484 = vmatprep.subr.bf16.mxu1 %v10194_v27 }
 0xf7f   : > { %8485 = vmatpush3.bf16.msra.mxu1 %v9605_v62 }
 0xf80   : > { %8486 = vmatprep.subr.bf16.mxu1 %v10194_v27 }
 0xf83   : > { %8487 = vmatpush3.bf16.msra.mxu1 %v9607_v63 }
 0xf84   : > { %8488 = vmatprep.subr.bf16.mxu1 %v10194_v27 }
 0xf87   : > { %8489 = vmatpush3.bf16.msra.mxu1 %v9609_v0 }
 0xf88   : > { %8490 = vmatprep.subr.bf16.mxu1 %v10194_v27 }
 0xf8b   : > { %8491 = vmatpush3.bf16.msra.mxu1 %v9611_v1 }
 0xf8c   : > { %8492 = vmatprep.subr.bf16.mxu1 %v10194_v27 }
 0xf8f   : > { %8493 = vmatpush3.bf16.msra.mxu1 %v9613_v2 }
 0xf90   : > { %8516 = vmatprep.subr.mxu1 %v10194_v27 }
0x1041   : > { %v4706_v3 = vpop.f32.mrb[48].mxu1 }
0x1042   : > { %v8472_v4 = vpop.f32.mrb[49].mxu1  ;;  %8514 = vmatmul.mubr.f32.vlgmr.msra.gmra.mrb[28].mxu0 %v4706_v3 }
0x1043   : > { %9144 = vmatpush3.bf16.msra.mxu0 %v10966_v22  ;;  %8572 = vmatprep.mubr.msk.f32.mxu0 %vm10193_vm2, %v10194_v27 }
0x1044   : > { %9145 = vmatprep.subr.bf16.mxu0 %v10192_v26 }
0x1045   : > { %v4797_v5 = vpop.f32.mrb[50].mxu1 }
0x1046   : > { %v8477_v6 = vpop.f32.mrb[51].mxu1  ;;  %8495 = vmatmul.mubr.f32.vlgmr.msra.gmra.mrb[52].mxu1 %v4797_v5 }
0x1047   : > { %8517 = vmatpush3.msk.msra.mxu1 %vm3833_vm4, %v4632_v56  ;;  %8518 = vmatprep.mubr.msk.f32.mxu1 %vm10193_vm2, %v10194_v27 }
0x1048   : > { %8521 = vmatprep.subr.bf16.mxu1 %v10194_v27  ;;  %9147 = vmatpush3.bf16.msra.mxu0 %v10974_v31 }
0x1049   : > { %9148 = vmatprep.subr.bf16.mxu0 %v10192_v26 }
0x104a   : > { %8519 = vmatmul.mubr.msk.f32.vlgmr.msra.gmra.mrb[54].mxu1 %vm3928_vm5, %v4991_v7 }
0x104b   : > { %8522 = vmatpush3.bf16.msra.mxu1 %v9614_v8  ;;  %8537 = vmatprep.mubr.msk.f32.mxu1 %vm10193_vm2, %v10194_v27 }
0x104c   : > { %8523 = vmatprep.subr.bf16.mxu1 %v10194_v27  ;;  %9150 = vmatpush3.bf16.msra.mxu0 %v10980_v35 }
0x104d   : > { %9151 = vmatprep.subr.bf16.mxu0 %v10192_v26 }
0x104f   : > { %8524 = vmatpush3.bf16.msra.mxu1 %v9615_v9 }
0x1050   : > { %8525 = vmatprep.subr.bf16.mxu1 %v10194_v27  ;;  %9153 = vmatpush3.bf16.msra.mxu0 %v10988_v38 }
0x1051   : > { %9154 = vmatprep.subr.bf16.mxu0 %v10192_v26 }
0x1053   : > { %8526 = vmatpush3.bf16.msra.mxu1 %v9616_v10  ;;  %v5338_v10 = vld [vmem:[#allocation11] sm:$0xf] }
0x1054   : > { %8527 = vmatprep.subr.bf16.mxu1 %v10194_v27  ;;  %9156 = vmatpush3.bf16.msra.mxu0 %v10994_v41 }
0x1055   : > { %9157 = vmatprep.subr.bf16.mxu0 %v10192_v26 }
0x1057   : > { %8528 = vmatpush3.bf16.msra.mxu1 %v9617_v11  ;;  %v5432_v11 = vld [vmem:[#allocation11 + $0x4] sm:$0xf] }
0x1058   : > { %8529 = vmatprep.subr.bf16.mxu1 %v10194_v27  ;;  %9159 = vmatpush3.bf16.msra.mxu0 %v11000_v44 }
0x1059   : > { %9160 = vmatprep.subr.bf16.mxu0 %v10192_v26 }
0x105b   : > { %8530 = vmatpush3.bf16.msra.mxu1 %v9618_v12  ;;  %v9623_v12 = vld [vmem:[#allocation20 + $0x40] sm:$0xff]  }
0x105c   : > { %8531 = vmatprep.subr.bf16.mxu1 %v10194_v27  ;;  %9162 = vmatpush3.bf16.msra.mxu0 %v11008_v47 }
0x105d   : > { %9163 = vmatprep.subr.bf16.mxu0 %v10192_v26 }
0x105f   : > { %8532 = vmatpush3.bf16.msra.mxu1 %v9619_v13  ;;  %v9627_v13 = vld [vmem:[#allocation20 + $0x50] sm:$0xff]  }
0x1060   : > { %8533 = vmatprep.subr.bf16.mxu1 %v10194_v27  ;;  %9165 = vmatpush3.bf16.msra.mxu0 %v11014_v50 }
0x1061   : > { %8610 = vmatprep.subr.mxu0 %v10194_v27 }
0x1063   : > { %8534 = vmatpush3.bf16.msra.mxu1 %v9620_v14  ;;  %v9629_v14 = vld [vmem:[#allocation20 + $0x58] sm:$0xff]  }
0x1064   : > { %8535 = vmatprep.subr.bf16.mxu1 %v10194_v27 }
0x1067   : > { %8536 = vmatpush3.bf16.msra.mxu1 %v9621_v15  ;;  %v9631_v15 = vld [vmem:[#allocation20 + $0x60] sm:$0xff]  }
0x1068   : > { %9166 = vmatprep.subr.bf16.mxu1 %v10192_v26 }
0x1115   : > { %v4986_v16 = vpop.f32.mrb[28].mxu0 }
0x1116   : > { %v8515_v17 = vpop.f32.mrb[29].mxu0 }
0x1117   : > { %v9635_v17 = vld [vmem:[#allocation20 + $0x70] sm:$0xff]  }
0x1119   : > { %v4900_v18 = vpop.f32.mrb[52].mxu1 }
0x111a   : > { %v4987_v19 = vadd.f32 %v4986_v16, %v4900_v18  ;;  %v8496_v20 = vpop.f32.mrb[53].mxu1  ;;  %v9633_v16 = vld [vmem:[#allocation20 + $0x68] sm:$0xff]   ;;  %v9637_v18 = vld [vmem:[#allocation20 + $0x78] sm:$0xff]  }
0x111d   : > { %v5061_v21 = vpop.f32.mrb[54].mxu1 }
0x111e   : > { %v8520_v23 = vpop.f32.mrb[55].mxu1  ;;  %8538 = vmatmul.mubr.f32.vlgmr.msra.gmra.mrb[56].mxu1 %v5061_v21 }
0x111f   : > { %9168 = vmatpush3.bf16.msra.mxu1 %v10966_v22  ;;  %8607 = vmatprep.mubr.msk.f32.mxu1 %vm10193_vm2, %v10194_v27 }
0x1120   : > { %9169 = vmatprep.subr.bf16.mxu1 %v10192_v26 }
0x1123   : > { %9171 = vmatpush3.bf16.msra.mxu1 %v10974_v31 }
0x1124   : > { %9172 = vmatprep.subr.bf16.mxu1 %v10192_v26 }
0x1127   : > { %9174 = vmatpush3.bf16.msra.mxu1 %v10980_v35 }
0x1128   : > { %9175 = vmatprep.subr.bf16.mxu1 %v10192_v26 }
0x112b   : > { %9177 = vmatpush3.bf16.msra.mxu1 %v10988_v38 }
0x112c   : > { %9178 = vmatprep.subr.bf16.mxu1 %v10192_v26 }
0x112f   : > { %9180 = vmatpush3.bf16.msra.mxu1 %v10994_v41 }
0x1130   : > { %9181 = vmatprep.subr.bf16.mxu1 %v10192_v26 }
0x1133   : > { %9183 = vmatpush3.bf16.msra.mxu1 %v11000_v44 }
0x1134   : > { %9184 = vmatprep.subr.bf16.mxu1 %v10192_v26 }
0x1137   : > { %9186 = vmatpush3.bf16.msra.mxu1 %v11008_v47 }
0x1138   : > { %9187 = vmatprep.subr.bf16.mxu1 %v10192_v26 }
0x113b   : > { %9189 = vmatpush3.bf16.msra.mxu1 %v11014_v50 }
0x113c   : > { %8639 = vmatprep.subr.bf16.mxu1 %v10194_v27 }
0x11f1   : > { %v5164_v24 = vpop.f32.mrb[56].mxu1 }
0x11f2   : > { %v5168_v28 = vadd.f32 %v5164_v24, %v4987_v19  ;;  %v8539_v29 = vpop.f32.mrb[57].mxu1  ;;  %v5696_v24 = vld [vmem:[#allocation11 + $0x8] sm:$0xf] }
0x11f3   : > { %v9640_v29 = vld [vmem:[#allocation20 + $0x90] sm:$0xff]  }
0x11f4   : > { %v5174_v30 = vadd.f32 %v7186_v25, %v5168_v28  ;;  %v9638_v25 = vld [vmem:[#allocation20 + $0x80] sm:$0xff]   ;;  %v9639_v28 = vld [vmem:[#allocation20 + $0x88] sm:$0xff]  }
0x11f6   : > { %v5252_v32 = vmul.f32 %v5174_v30, %v5174_v30  ;;  %8573 = vmatmul.mubr.f32.vlgmr.msra.gmra.mrb[30].mxu0 %v5174_v30 }
0x11f7   : > { %8612 = vmatprep.mubr.msk.f32.mxu0 %vm10193_vm2, %v10194_v27 }
0x11f8   : > { %8608 = vmatmul.mubr.f32.vlgmr.msra.gmra.mrb[58].mxu1 %v5252_v32  ;;  %v9642_v32 = vld [vmem:[#allocation20 + $0xa0] sm:$0xff]  }
0x11f9   : > { %8655 = vmatprep.mubr.msk.f32.mxu1 %vm10193_vm2, %v10194_v27  ;;  %8640 = vmatpush3.bf16.msra.mxu1 %v9622_v34  ;;  %v9643_v34 = vld [vmem:[#allocation20 + $0xa8] sm:$0xff]  }
0x11fa   : > { %8641 = vmatprep.subr.bf16.mxu1 %v10194_v27 }
0x11fd   : > { %8642 = vmatpush3.bf16.msra.mxu1 %v9624_v36  ;;  %v9644_v36 = vld [vmem:[#allocation20 + $0xb0] sm:$0xff]  }
0x11fe   : > { %8643 = vmatprep.subr.bf16.mxu1 %v10194_v27 }
0x1201   : > { %8644 = vmatpush3.bf16.msra.mxu1 %v9626_v37  ;;  %v9645_v37 = vld [vmem:[#allocation20 + $0xb8] sm:$0xff]  }
0x1202   : > { %8645 = vmatprep.subr.bf16.mxu1 %v10194_v27 }
0x1205   : > { %8646 = vmatpush3.bf16.msra.mxu1 %v9628_v39 }
0x1206   : > { %8647 = vmatprep.subr.bf16.mxu1 %v10194_v27 }
0x1209   : > { %8648 = vmatpush3.bf16.msra.mxu1 %v9630_v40 }
0x120a   : > { %8649 = vmatprep.subr.bf16.mxu1 %v10194_v27 }
0x120d   : > { %8650 = vmatpush3.bf16.msra.mxu1 %v9632_v42 }
0x120e   : > { %8651 = vmatprep.subr.bf16.mxu1 %v10194_v27 }
0x1211   : > { %8652 = vmatpush3.bf16.msra.mxu1 %v9634_v43 }
0x1212   : > { %8653 = vmatprep.subr.bf16.mxu1 %v10194_v27 }
0x1215   : > { %8654 = vmatpush3.bf16.msra.mxu1 %v9636_v45 }
0x1216   : > { %9190 = vmatprep.subr.bf16.mxu1 %v10192_v26 }
0x12c9   : > { %v5241_v46 = vpop.f32.mrb[30].mxu0 }
0x12ca   : > { %v5245_v48 = vsel %vm3833_vm4, %v5241_v46, 0.0  ;;  %v8574_v49 = vpop.f32.mrb[31].mxu0 }
0x12cb   : > { %v5246_v51 = vrot.slane %v5245_v48, 4  ;;  %v5319_v52 = vpop.f32.mrb[58].mxu1 }
0x12cc   : > { %v5323_v53 = vsel %vm3833_vm4, %v5319_v52, 0.0  ;;  %v8609_v54 = vpop.f32.mrb[59].mxu1 }
0x12cd   : > { %v5247_v55 = vadd.f32 %v5246_v51, %v5245_v48  ;;  %v5324_v56 = vrot.slane %v5323_v53, 4  ;;  %v7217_v51 = vld [vmem:[%s11541_s17 + $0x5] ss:$0 sm:$0xff] }
0x12cf   : > { %v5248_v57 = vrot.slane %v5247_v55, 2  ;;  %v5325_v58 = vadd.f32 %v5324_v56, %v5323_v53  ;;  %v9646_v56 = vld [vmem:[#allocation22] sm:$0xff]  }
0x12d1   : > { %v5249_v59 = vadd.f32 %v5248_v57, %v5247_v55  ;;  %v5326_v60 = vrot.slane %v5325_v58, 2  ;;  %v9648_v57 = vld [vmem:[#allocation22 + $0x8] sm:$0xff]  }
0x12d3   : > { %v5250_v61 = vrot.slane %v5249_v59, 1  ;;  %v5327_v62 = vadd.f32 %v5326_v60, %v5325_v58  ;;  %v9650_v58 = vld [vmem:[#allocation22 + $0x10] sm:$0xff]   ;;  %v9654_v60 = vld [vmem:[#allocation22 + $0x20] sm:$0xff]  }
0x12d5   : > { %v5251_v63 = vadd.f32 %v5250_v61, %v5249_v59  ;;  %v5328_v0 = vrot.slane %v5327_v62, 1  ;;  %v9652_v59 = vld [vmem:[#allocation22 + $0x18] sm:$0xff]   ;;  %v9656_v61 = vld [vmem:[#allocation22 + $0x28] sm:$0xff]  }
0x12d7   : > { %v5330_v1 = vmul.f32 %v5251_v63, %v5251_v63  ;;  %v5329_v2 = vadd.f32 %v5328_v0, %v5327_v62  ;;  %v5333_v6 = vsub.f32 %v5174_v30, %v5251_v63  ;;  %v9641_v30 = vld [vmem:[#allocation20 + $0x98] sm:$0xff]   ;;  %v9658_v62 = vld [vmem:[#allocation22 + $0x30] sm:$0xff]  }
0x12d8   : > { %v9660_v63 = vld [vmem:[#allocation22 + $0x38] sm:$0xff]  }
0x12d9   : > { %v5331_v3 = vsub.f32 %v5329_v2, %v5330_v1 }
0x12db   : > { %v5332_v4 = vmax.f32 %v5331_v3, 0.0 }
0x12dd   : > { %v5334_v5 = vadd.f32 1e-05, %v5332_v4 }
0x12df   : > { %9678 = vrsqrt.f32 %v5334_v5 }
0x12e9   : > { %v9679_v7 = vpop.eup %9678 }
0x12ea   : > { %v5336_v8 = vmul.f32 %v9679_v7, %v5333_v6 }
0x12ec   : > { %v11225_v9 = vadd.f32 %v5336_v8, %v11038_v33  ;;  %v9625_v33 = vld [vmem:[#allocation20 + $0x48] sm:$0xff]  }
0x12ee   : > { %8611 = vmatpush3.msk.msra.mxu0 %vm3833_vm4, %v11225_v9 }
0x12ef   : > { %8613 = vmatmul.mubr.msk.f32.vlgmr.msra.gmra.mrb[32].mxu0 %vm3928_vm5, %v5338_v10  ;;  %8615 = vmatprep.subr.mxu0 %v10194_v27 }
0x12f0   : > { %8616 = vmatpush3.msk.msra.mxu0 %vm3833_vm4, %v11225_v9  ;;  %8617 = vmatprep.mubr.msk.f32.mxu0 %vm10193_vm2, %v10194_v27 }
0x12f1   : > { %8620 = vmatprep.subr.bf16.mxu0 %v10194_v27 }
0x12f3   : > { %8618 = vmatmul.mubr.msk.f32.vlgmr.msra.gmra.mrb[34].mxu0 %vm3928_vm5, %v5432_v11 }
0x12f4   : > { %8621 = vmatpush3.bf16.msra.mxu0 %v9623_v12  ;;  %8636 = vmatprep.mubr.msk.f32.mxu0 %vm10193_vm2, %v10194_v27 }
0x12f5   : > { %8622 = vmatprep.subr.bf16.mxu0 %v10194_v27 }
0x12f8   : > { %8623 = vmatpush3.bf16.msra.mxu0 %v9625_v33 }
0x12f9   : > { %8624 = vmatprep.subr.bf16.mxu0 %v10194_v27 }
0x12fc   : > { %8625 = vmatpush3.bf16.msra.mxu0 %v9627_v13 }
0x12fd   : > { %8626 = vmatprep.subr.bf16.mxu0 %v10194_v27 }
0x1300   : > { %8627 = vmatpush3.bf16.msra.mxu0 %v9629_v14 }
0x1301   : > { %8628 = vmatprep.subr.bf16.mxu0 %v10194_v27 }
0x1304   : > { %8629 = vmatpush3.bf16.msra.mxu0 %v9631_v15 }
0x1305   : > { %8630 = vmatprep.subr.bf16.mxu0 %v10194_v27 }
0x1308   : > { %8631 = vmatpush3.bf16.msra.mxu0 %v9633_v16 }
0x1309   : > { %8632 = vmatprep.subr.bf16.mxu0 %v10194_v27 }
0x130c   : > { %8633 = vmatpush3.bf16.msra.mxu0 %v9635_v17 }
0x130d   : > { %8634 = vmatprep.subr.bf16.mxu0 %v10194_v27 }
0x1310   : > { %8635 = vmatpush3.bf16.msra.mxu0 %v9637_v18 }
0x1311   : > { %8658 = vmatprep.subr.mxu0 %v10194_v27 }
0x13c2   : > { %v5411_v19 = vpop.f32.mrb[32].mxu0 }
0x13c3   : > { %v8614_v20 = vpop.f32.mrb[33].mxu0  ;;  %8656 = vmatmul.mubr.f32.vlgmr.msra.gmra.mrb[60].mxu1 %v5411_v19 }
0x13c4   : > { %9192 = vmatpush3.bf16.msra.mxu1 %v10966_v22  ;;  %8714 = vmatprep.mubr.msk.f32.mxu1 %vm10193_vm2, %v10194_v27 }
0x13c5   : > { %9193 = vmatprep.subr.bf16.mxu1 %v10192_v26 }
0x13c6   : > { %v5502_v21 = vpop.f32.mrb[34].mxu0 }
0x13c7   : > { %v8619_v23 = vpop.f32.mrb[35].mxu0  ;;  %8637 = vmatmul.mubr.f32.vlgmr.msra.gmra.mrb[36].mxu0 %v5502_v21 }
0x13c8   : > { %8659 = vmatpush3.msk.msra.mxu0 %vm3833_vm4, %v11225_v9  ;;  %8660 = vmatprep.mubr.msk.f32.mxu0 %vm10193_vm2, %v10194_v27 }
0x13c9   : > { %8663 = vmatprep.subr.bf16.mxu0 %v10194_v27  ;;  %9195 = vmatpush3.bf16.msra.mxu1 %v10974_v31 }
0x13ca   : > { %9196 = vmatprep.subr.bf16.mxu1 %v10192_v26 }
0x13cb   : > { %8661 = vmatmul.mubr.msk.f32.vlgmr.msra.gmra.mrb[38].mxu0 %vm3928_vm5, %v5696_v24 }
0x13cc   : > { %8664 = vmatpush3.bf16.msra.mxu0 %v9638_v25  ;;  %8679 = vmatprep.mubr.msk.f32.mxu0 %vm10193_vm2, %v10194_v27 }
0x13cd   : > { %8665 = vmatprep.subr.bf16.mxu0 %v10194_v27  ;;  %9198 = vmatpush3.bf16.msra.mxu1 %v10980_v35 }
0x13ce   : > { %9199 = vmatprep.subr.bf16.mxu1 %v10192_v26 }
0x13d0   : > { %8666 = vmatpush3.bf16.msra.mxu0 %v9639_v28 }
0x13d1   : > { %8667 = vmatprep.subr.bf16.mxu0 %v10194_v27  ;;  %9201 = vmatpush3.bf16.msra.mxu1 %v10988_v38 }
0x13d2   : > { %9202 = vmatprep.subr.bf16.mxu1 %v10192_v26 }
0x13d4   : > { %8668 = vmatpush3.bf16.msra.mxu0 %v9640_v29  ;;  %v6043_v29 = vld [vmem:[%s11543_s15] sm:$0xf] }
0x13d5   : > { %8669 = vmatprep.subr.bf16.mxu0 %v10194_v27  ;;  %9204 = vmatpush3.bf16.msra.mxu1 %v10994_v41 }
0x13d6   : > { %9205 = vmatprep.subr.bf16.mxu1 %v10192_v26 }
0x13d8   : > { %8670 = vmatpush3.bf16.msra.mxu0 %v9641_v30  ;;  %v7220_v30 = vld [vmem:[%s11543_s15 + $0x4] sm:$0xf] }
0x13d9   : > { %8671 = vmatprep.subr.bf16.mxu0 %v10194_v27  ;;  %9207 = vmatpush3.bf16.msra.mxu1 %v11000_v44 }
0x13da   : > { %9208 = vmatprep.subr.bf16.mxu1 %v10192_v26 }
0x13dc   : > { %8672 = vmatpush3.bf16.msra.mxu0 %v9642_v32  ;;  %v9647_v32 = vld [vmem:[#allocation22 + $0x40] sm:$0xff]  }
0x13dd   : > { %8673 = vmatprep.subr.bf16.mxu0 %v10194_v27  ;;  %9210 = vmatpush3.bf16.msra.mxu1 %v11008_v47 }
0x13de   : > { %9211 = vmatprep.subr.bf16.mxu1 %v10192_v26 }
0x13e0   : > { %8674 = vmatpush3.bf16.msra.mxu0 %v9643_v34  ;;  %v9649_v34 = vld [vmem:[#allocation22 + $0x48] sm:$0xff]  }
0x13e1   : > { %8675 = vmatprep.subr.bf16.mxu0 %v10194_v27  ;;  %9213 = vmatpush3.bf16.msra.mxu1 %v11014_v50 }
0x13e2   : > { %8752 = vmatprep.subr.mxu1 %v10194_v27 }
0x13e4   : > { %8676 = vmatpush3.bf16.msra.mxu0 %v9644_v36  ;;  %v9651_v36 = vld [vmem:[#allocation22 + $0x50] sm:$0xff]  }
0x13e5   : > { %8677 = vmatprep.subr.bf16.mxu0 %v10194_v27 }
0x13e8   : > { %8678 = vmatpush3.bf16.msra.mxu0 %v9645_v37  ;;  %v9653_v37 = vld [vmem:[#allocation22 + $0x58] sm:$0xff]  }
0x13e9   : > { %9214 = vmatprep.subr.bf16.mxu0 %v10192_v26 }
0x1496   : > { %v5691_v39 = vpop.f32.mrb[60].mxu1 }
0x1497   : > { %v8657_v40 = vpop.f32.mrb[61].mxu1 }
0x1498   : > { %v9657_v40 = vld [vmem:[#allocation22 + $0x68] sm:$0xff]  }
0x149a   : > { %v5605_v42 = vpop.f32.mrb[36].mxu0 }
0x149b   : > { %v5692_v43 = vadd.f32 %v5691_v39, %v5605_v42  ;;  %v8638_v45 = vpop.f32.mrb[37].mxu0  ;;  %v9655_v39 = vld [vmem:[#allocation22 + $0x60] sm:$0xff]   ;;  %v9659_v42 = vld [vmem:[#allocation22 + $0x70] sm:$0xff]  }
0x149e   : > { %v5766_v46 = vpop.f32.mrb[38].mxu0 }
0x149f   : > { %v8662_v48 = vpop.f32.mrb[39].mxu0  ;;  %8680 = vmatmul.mubr.f32.vlgmr.msra.gmra.mrb[40].mxu0 %v5766_v46 }
0x14a0   : > { %9216 = vmatpush3.bf16.msra.mxu0 %v10966_v22  ;;  %8749 = vmatprep.mubr.msk.f32.mxu0 %vm10193_vm2, %v10194_v27 }
0x14a1   : > { %9217 = vmatprep.subr.bf16.mxu0 %v10192_v26 }
0x14a4   : > { %9219 = vmatpush3.bf16.msra.mxu0 %v10974_v31 }
0x14a5   : > { %9220 = vmatprep.subr.bf16.mxu0 %v10192_v26 }
0x14a8   : > { %9222 = vmatpush3.bf16.msra.mxu0 %v10980_v35 }
0x14a9   : > { %9223 = vmatprep.subr.bf16.mxu0 %v10192_v26 }
0x14ac   : > { %9225 = vmatpush3.bf16.msra.mxu0 %v10988_v38 }
0x14ad   : > { %9226 = vmatprep.subr.bf16.mxu0 %v10192_v26 }
0x14b0   : > { %9228 = vmatpush3.bf16.msra.mxu0 %v10994_v41 }
0x14b1   : > { %9229 = vmatprep.subr.bf16.mxu0 %v10192_v26 }
0x14b4   : > { %9231 = vmatpush3.bf16.msra.mxu0 %v11000_v44 }
0x14b5   : > { %9232 = vmatprep.subr.bf16.mxu0 %v10192_v26 }
0x14b8   : > { %9234 = vmatpush3.bf16.msra.mxu0 %v11008_v47 }
0x14b9   : > { %9235 = vmatprep.subr.bf16.mxu0 %v10192_v26 }
0x14bc   : > { %9237 = vmatpush3.bf16.msra.mxu0 %v11014_v50 }
0x14bd   : > { %8781 = vmatprep.subr.bf16.mxu0 %v10194_v27 }
0x1572   : > { %v5869_v49 = vpop.f32.mrb[40].mxu0 }
0x1573   : > { %v5873_v52 = vadd.f32 %v5869_v49, %v5692_v43  ;;  %v8681_v53 = vpop.f32.mrb[41].mxu0  ;;  %v9661_v43 = vld [vmem:[#allocation22 + $0x78] sm:$0xff]  }
0x1574   : > { %v9663_v53 = vld [vmem:[#allocation22 + $0x88] sm:$0xff]  }
0x1575   : > { %v5879_v54 = vadd.f32 %v7217_v51, %v5873_v52  ;;  %v7239_v51 = vld [vmem:[%s11543_s15 + $0x8] sm:$0xf]  ;;  %v9662_v52 = vld [vmem:[#allocation22 + $0x80] sm:$0xff]  }
0x1577   : > { %v5957_v55 = vmul.f32 %v5879_v54, %v5879_v54  ;;  %8715 = vmatmul.mubr.f32.vlgmr.msra.gmra.mrb[62].mxu1 %v5879_v54 }
0x1578   : > { %8754 = vmatprep.mubr.msk.f32.mxu1 %vm10193_vm2, %v10194_v27 }
0x1579   : > { %8750 = vmatmul.mubr.f32.vlgmr.msra.gmra.mrb[42].mxu0 %v5957_v55  ;;  %v9665_v55 = vld [vmem:[#allocation22 + $0x98] sm:$0xff]  }
0x157a   : > { %8797 = vmatprep.mubr.msk.f32.mxu0 %vm10193_vm2, %v10194_v27  ;;  %8782 = vmatpush3.bf16.msra.mxu0 %v9646_v56  ;;  %v9666_v56 = vld [vmem:[#allocation22 + $0xa0] sm:$0xff]  }
0x157b   : > { %8783 = vmatprep.subr.bf16.mxu0 %v10194_v27 }
0x157e   : > { %8784 = vmatpush3.bf16.msra.mxu0 %v9648_v57  ;;  %v9667_v57 = vld [vmem:[#allocation22 + $0xa8] sm:$0xff]  }
0x157f   : > { %8785 = vmatprep.subr.bf16.mxu0 %v10194_v27 }
0x1582   : > { %8786 = vmatpush3.bf16.msra.mxu0 %v9650_v58  ;;  %v9668_v58 = vld [vmem:[#allocation22 + $0xb0] sm:$0xff]  }
0x1583   : > { %8787 = vmatprep.subr.bf16.mxu0 %v10194_v27 }
0x1586   : > { %8788 = vmatpush3.bf16.msra.mxu0 %v9652_v59  ;;  %v9669_v59 = vld [vmem:[#allocation22 + $0xb8] sm:$0xff]  }
0x1587   : > { %8789 = vmatprep.subr.bf16.mxu0 %v10194_v27 }
0x158a   : > { %8790 = vmatpush3.bf16.msra.mxu0 %v9654_v60 }
0x158b   : > { %8791 = vmatprep.subr.bf16.mxu0 %v10194_v27 }
0x158e   : > { %8792 = vmatpush3.bf16.msra.mxu0 %v9656_v61 }
0x158f   : > { %8793 = vmatprep.subr.bf16.mxu0 %v10194_v27 }
0x1592   : > { %8794 = vmatpush3.bf16.msra.mxu0 %v9658_v62 }
0x1593   : > { %8795 = vmatprep.subr.bf16.mxu0 %v10194_v27 }
0x1596   : > { %8796 = vmatpush3.bf16.msra.mxu0 %v9660_v63 }
0x1597   : > { %9238 = vmatprep.subr.bf16.mxu0 %v10192_v26 }
0x164a   : > { %v5946_v0 = vpop.f32.mrb[62].mxu1 }
0x164b   : > { %v5950_v1 = vsel %vm3833_vm4, %v5946_v0, 0.0  ;;  %v8716_v2 = vpop.f32.mrb[63].mxu1 }
0x164c   : > { %v5951_v3 = vrot.slane %v5950_v1, 4  ;;  %v6024_v4 = vpop.f32.mrb[42].mxu0 }
0x164d   : > { %v6028_v5 = vsel %vm3833_vm4, %v6024_v4, 0.0  ;;  %v8751_v6 = vpop.f32.mrb[43].mxu0 }
0x164e   : > { %v5952_v7 = vadd.f32 %v5951_v3, %v5950_v1  ;;  %v6029_v8 = vrot.slane %v6028_v5, 4 }
0x1650   : > { %v5953_v10 = vrot.slane %v5952_v7, 2  ;;  %v6030_v11 = vadd.f32 %v6029_v8, %v6028_v5 }
0x1652   : > { %v5954_v12 = vadd.f32 %v5953_v10, %v5952_v7  ;;  %v6031_v33 = vrot.slane %v6030_v11, 2 }
0x1654   : > { %v5955_v13 = vrot.slane %v5954_v12, 1  ;;  %v6032_v14 = vadd.f32 %v6031_v33, %v6030_v11 }
0x1656   : > { %v5956_v15 = vadd.f32 %v5955_v13, %v5954_v12  ;;  %v6033_v16 = vrot.slane %v6032_v14, 1 }
0x1658   : > { %v6035_v17 = vmul.f32 %v5956_v15, %v5956_v15  ;;  %v6034_v18 = vadd.f32 %v6033_v16, %v6032_v14  ;;  %v6038_v23 = vsub.f32 %v5879_v54, %v5956_v15  ;;  %v9664_v54 = vld [vmem:[#allocation22 + $0x90] sm:$0xff]  }
0x165a   : > { %v6036_v19 = vsub.f32 %v6034_v18, %v6035_v17 }
0x165c   : > { %v6037_v20 = vmax.f32 %v6036_v19, 0.0 }
0x165e   : > { %v6039_v21 = vadd.f32 1e-05, %v6037_v20 }
0x1660   : > { %9680 = vrsqrt.f32 %v6039_v21 }
0x166a   : > { %v9681_v24 = vpop.eup %9680 }
0x166b   : > { %v6041_v25 = vmul.f32 %v9681_v24, %v6038_v23 }
0x166d   : > { %v6042_v28 = vmax.f32 %v6041_v25, 0.0 }
0x166f   : > { %8753 = vmatpush3.msk.msra.mxu1 %vm3833_vm4, %v6042_v28 }
0x1670   : > { %8755 = vmatmul.mubr.msk.f32.vlgmr.msra.gmra.mrb[64].mxu1 %vm3928_vm5, %v6043_v29  ;;  %8757 = vmatprep.subr.mxu1 %v10194_v27 }
0x1671   : > { %8758 = vmatpush3.msk.msra.mxu1 %vm3833_vm4, %v6042_v28  ;;  %8759 = vmatprep.mubr.msk.f32.mxu1 %vm10193_vm2, %v10194_v27 }
0x1672   : > { %8762 = vmatprep.subr.bf16.mxu1 %v10194_v27 }
0x1674   : > { %8760 = vmatmul.mubr.msk.f32.vlgmr.msra.gmra.mrb[66].mxu1 %vm3928_vm5, %v7220_v30 }
0x1675   : > { %8763 = vmatpush3.bf16.msra.mxu1 %v9647_v32  ;;  %8778 = vmatprep.mubr.msk.f32.mxu1 %vm10193_vm2, %v10194_v27 }
0x1676   : > { %8764 = vmatprep.subr.bf16.mxu1 %v10194_v27 }
0x1679   : > { %8765 = vmatpush3.bf16.msra.mxu1 %v9649_v34 }
0x167a   : > { %8766 = vmatprep.subr.bf16.mxu1 %v10194_v27 }
0x167d   : > { %8767 = vmatpush3.bf16.msra.mxu1 %v9651_v36 }
0x167e   : > { %8768 = vmatprep.subr.bf16.mxu1 %v10194_v27 }
0x1681   : > { %8769 = vmatpush3.bf16.msra.mxu1 %v9653_v37 }
0x1682   : > { %8770 = vmatprep.subr.bf16.mxu1 %v10194_v27 }
0x1685   : > { %8771 = vmatpush3.bf16.msra.mxu1 %v9655_v39 }
0x1686   : > { %8772 = vmatprep.subr.bf16.mxu1 %v10194_v27 }
0x1689   : > { %8773 = vmatpush3.bf16.msra.mxu1 %v9657_v40 }
0x168a   : > { %8774 = vmatprep.subr.bf16.mxu1 %v10194_v27 }
0x168d   : > { %8775 = vmatpush3.bf16.msra.mxu1 %v9659_v42 }
0x168e   : > { %8776 = vmatprep.subr.bf16.mxu1 %v10194_v27 }
0x1691   : > { %8777 = vmatpush3.bf16.msra.mxu1 %v9661_v43 }
0x1692   : > { %8800 = vmatprep.subr.mxu1 %v10194_v27 }
0x1743   : > { %v6116_v45 = vpop.f32.mrb[64].mxu1 }
0x1744   : > { %v8756_v46 = vpop.f32.mrb[65].mxu1  ;;  %8798 = vmatmul.mubr.f32.vlgmr.msra.gmra.mrb[44].mxu0 %v6116_v45 }
0x1745   : > { %9240 = vmatpush3.bf16.msra.mxu0 %v10966_v22  ;;  %8856 = vmatprep.mubr.msk.f32.mxu0 %vm10193_vm2, %v10194_v27 }
0x1746   : > { %9241 = vmatprep.subr.bf16.mxu0 %v10192_v26 }
0x1747   : > { %v6207_v48 = vpop.f32.mrb[66].mxu1 }
0x1748   : > { %8779 = vmatmul.mubr.f32.vlgmr.msra.gmra.mrb[68].mxu1 %v6207_v48  ;;  %v8761_v49 = vpop.f32.mrb[67].mxu1 }
0x1749   : > { %8801 = vmatpush3.msk.msra.mxu1 %vm3833_vm4, %v6042_v28  ;;  %8802 = vmatprep.mubr.msk.f32.mxu1 %vm10193_vm2, %v10194_v27 }
0x174a   : > { %8805 = vmatprep.subr.bf16.mxu1 %v10194_v27  ;;  %9243 = vmatpush3.bf16.msra.mxu0 %v10974_v31 }
0x174b   : > { %9244 = vmatprep.subr.bf16.mxu0 %v10192_v26 }
0x174c   : > { %8803 = vmatmul.mubr.msk.f32.vlgmr.msra.gmra.mrb[70].mxu1 %vm3928_vm5, %v7239_v51 }
0x174d   : > { %8806 = vmatpush3.bf16.msra.mxu1 %v9662_v52  ;;  %8821 = vmatprep.mubr.msk.f32.mxu1 %vm10193_vm2, %v10194_v27 }
0x174e   : > { %8807 = vmatprep.subr.bf16.mxu1 %v10194_v27  ;;  %9246 = vmatpush3.bf16.msra.mxu0 %v10980_v35 }
0x174f   : > { %9247 = vmatprep.subr.bf16.mxu0 %v10192_v26 }
0x1751   : > { %8808 = vmatpush3.bf16.msra.mxu1 %v9663_v53 }
0x1752   : > { %8809 = vmatprep.subr.bf16.mxu1 %v10194_v27  ;;  %9249 = vmatpush3.bf16.msra.mxu0 %v10988_v38 }
0x1753   : > { %9250 = vmatprep.subr.bf16.mxu0 %v10192_v26 }
0x1755   : > { %8810 = vmatpush3.bf16.msra.mxu1 %v9664_v54 }
0x1756   : > { %8811 = vmatprep.subr.bf16.mxu1 %v10194_v27  ;;  %9252 = vmatpush3.bf16.msra.mxu0 %v10994_v41 }
0x1757   : > { %9253 = vmatprep.subr.bf16.mxu0 %v10192_v26 }
0x1759   : > { %8812 = vmatpush3.bf16.msra.mxu1 %v9665_v55 }
0x175a   : > { %8813 = vmatprep.subr.bf16.mxu1 %v10194_v27  ;;  %9255 = vmatpush3.bf16.msra.mxu0 %v11000_v44 }
0x175b   : > { %9256 = vmatprep.subr.bf16.mxu0 %v10192_v26 }
0x175d   : > { %8814 = vmatpush3.bf16.msra.mxu1 %v9666_v56 }
0x175e   : > { %8815 = vmatprep.subr.bf16.mxu1 %v10194_v27  ;;  %9258 = vmatpush3.bf16.msra.mxu0 %v11008_v47 }
0x175f   : > { %9259 = vmatprep.subr.bf16.mxu0 %v10192_v26 }
0x1761   : > { %8816 = vmatpush3.bf16.msra.mxu1 %v9667_v57 }
0x1762   : > { %8817 = vmatprep.subr.bf16.mxu1 %v10194_v27  ;;  %9261 = vmatpush3.bf16.msra.mxu0 %v11014_v50 }
0x1765   : > { %8818 = vmatpush3.bf16.msra.mxu1 %v9668_v58 }
0x1766   : > { %8819 = vmatprep.subr.bf16.mxu1 %v10194_v27 }
0x1769   : > { %8820 = vmatpush3.bf16.msra.mxu1 %v9669_v59 }
0x176a   : > { %9262 = vmatprep.subr.bf16.mxu1 %v10192_v26 }
0x1817   : > { %v6396_v60 = vpop.f32.mrb[44].mxu0 }
0x1818   : > { %v8799_v61 = vpop.f32.mrb[45].mxu0 }
0x181b   : > { %v6310_v62 = vpop.f32.mrb[68].mxu1 }
0x181c   : > { %v6397_v63 = vadd.f32 %v6396_v60, %v6310_v62  ;;  %v8780_v0 = vpop.f32.mrb[69].mxu1 }
0x181f   : > { %v6471_v1 = vpop.f32.mrb[70].mxu1 }
0x1820   : > { %8822 = vmatmul.mubr.f32.vlgmr.msra.gmra.mrb[72].mxu1 %v6471_v1  ;;  %v8804_v2 = vpop.f32.mrb[71].mxu1 }
0x1821   : > { %9264 = vmatpush3.bf16.msra.mxu1 %v10966_v22  ;;  %8891 = vmatprep.mubr.msk.f32.mxu1 %vm10193_vm2, %v10194_v27  ;;  %v7250_v22 = vld [vmem:[%s11541_s17 + $0x6] ss:$0 sm:$0xff] }
0x1822   : > { %9265 = vmatprep.subr.bf16.mxu1 %v10192_v26 }
0x1825   : > { %9267 = vmatpush3.bf16.msra.mxu1 %v10974_v31 }
0x1826   : > { %9268 = vmatprep.subr.bf16.mxu1 %v10192_v26 }
0x1829   : > { %9270 = vmatpush3.bf16.msra.mxu1 %v10980_v35 }
0x182a   : > { %9271 = vmatprep.subr.bf16.mxu1 %v10192_v26 }
0x182d   : > { %9273 = vmatpush3.bf16.msra.mxu1 %v10988_v38 }
0x182e   : > { %9274 = vmatprep.subr.bf16.mxu1 %v10192_v26 }
0x1831   : > { %9276 = vmatpush3.bf16.msra.mxu1 %v10994_v41 }
0x1832   : > { %9277 = vmatprep.subr.bf16.mxu1 %v10192_v26 }
0x1835   : > { %9279 = vmatpush3.bf16.msra.mxu1 %v11000_v44 }
0x1836   : > { %9280 = vmatprep.subr.bf16.mxu1 %v10192_v26 }
0x1839   : > { %9282 = vmatpush3.bf16.msra.mxu1 %v11008_v47 }
0x183a   : > { %9283 = vmatprep.subr.bf16.mxu1 %v10192_v26 }
0x183d   : > { %9285 = vmatpush3.bf16.msra.mxu1 %v11014_v50 }
0x18f3   : > { %v6574_v27 = vpop.f32.mrb[72].mxu1 }
0x18f4   : > { %v6578_v31 = vadd.f32 %v6574_v27, %v6397_v63  ;;  %v8823_v35 = vpop.f32.mrb[73].mxu1 }
0x18f6   : > { %v6584_v38 = vadd.f32 %v7250_v22, %v6578_v31 }
0x18f8   : > { %v6662_v41 = vmul.f32 %v6584_v38, %v6584_v38  ;;  %8857 = vmatmul.mubr.f32.vlgmr.msra.gmra.mrb[46].mxu0 %v6584_v38 }
0x18fa   : > { %8892 = vmatmul.mubr.f32.vlgmr.msra.gmra.mrb[74].mxu1 %v6662_v41 }
0x19cb   : > { %v6651_v44 = vpop.f32.mrb[46].mxu0 }
0x19cc   : > { %v6655_v3 = vsel %vm3833_vm4, %v6651_v44, 0.0  ;;  %v8858_v4 = vpop.f32.mrb[47].mxu0 }
0x19cd   : > { %v6656_v47 = vrot.slane %v6655_v3, 4  ;;  %v6729_v5 = vpop.f32.mrb[74].mxu1 }
0x19ce   : > { %v6733_v26 = vsel %vm3833_vm4, %v6729_v5, 0.0  ;;  %v8893_v50 = vpop.f32.mrb[75].mxu1 }
0x19cf   : > { %v6657_v6 = vadd.f32 %v6656_v47, %v6655_v3  ;;  %v6734_v7 = vrot.slane %v6733_v26, 4 }
0x19d1   : > { %v6658_v8 = vrot.slane %v6657_v6, 2  ;;  %v6735_v10 = vadd.f32 %v6734_v7, %v6733_v26 }
0x19d3   : > { %v6659_v11 = vadd.f32 %v6658_v8, %v6657_v6  ;;  %v6736_v12 = vrot.slane %v6735_v10, 2 }
0x19d5   : > { %v6660_v33 = vrot.slane %v6659_v11, 1  ;;  %v6737_v13 = vadd.f32 %v6736_v12, %v6735_v10 }
0x19d7   : > { %v6661_v14 = vadd.f32 %v6660_v33, %v6659_v11  ;;  %v6738_v15 = vrot.slane %v6737_v13, 1 }
0x19d9   : > { %v6740_v16 = vmul.f32 %v6661_v14, %v6661_v14  ;;  %v6739_v17 = vadd.f32 %v6738_v15, %v6737_v13  ;;  %v6743_v21 = vsub.f32 %v6584_v38, %v6661_v14 }
0x19db   : > { %v6741_v18 = vsub.f32 %v6739_v17, %v6740_v16 }
0x19dd   : > { %v6742_v19 = vmax.f32 %v6741_v18, 0.0 }
0x19df   : > { %v6744_v20 = vadd.f32 1e-05, %v6742_v19 }
0x19e1   : > { %9682 = vrsqrt.f32 %v6744_v20 }
0x19eb   : > { %v9683_v23 = vpop.eup %9682 }
0x19ec   : > { %v6746_v24 = vmul.f32 %v9683_v23, %v6743_v21 }
0x19ee   : > { %v6747_v25 = vadd.f32 %v6746_v24, %v11225_v9 }
0x19f0   : > { %6748 = vst [vmem:[%s755_s22] sm:$0xf] %v6747_v25 }
0x19f1   : > { %10091 = shalt.err (!%p10088_p7)
}
0x19f2   : > { %s10092_s5 = scalar_lea.hbm %s11403_s0, 64  ;;  %s10096_s18 = scalar_lea.hbm %s11544_s2, 128 }
0x19f3   : > { %p10093_p10 = scmp.ne.s32.totalorder %s11403_s0, %s10092_s5  ;;  %p10097_p12 = scmp.lt.u32.totalorder %s11403_s0, %s11544_s2 }
0x19f4   : > { %p10098_p13 = scmp.lt.u32.totalorder %s10096_s18, %s10092_s5  ;;  %p10100_p6 = scmp.lt.u32.totalorder %s10092_s5, %s11403_s0 }
0x19f5   : > { %p10094_p1 = pnand %p10093_p10, %p11545_p9 }
0x19f6   : > { %p10099_p8 = por %p10098_p13, %p10097_p12 }
0x19f7   : > { %p10095_p11 = pneg %p10094_p1 }
0x19f8   : > { %p10101_p4 = por %p10100_p6, %p10099_p8 }
0x19fa   : > { %p10102_p3 = pnand %p10101_p4, %p10095_p11 }
0x19fc   : > { %10105 = shalt.err (!%p10102_p3)
}
0x19fd   : > { %9352 = dma.vmem_to_hbm [thread:$0]  (%p11545_p9), %s11405_s23, 64, %s11403_s0, %s6750_s7  }
0x19fe PF: > { %s11546_s6 = sld [smem:[#allocation35_spill]]  ;;  %p11547_p0 = scmp.ne.s32.totalorder %s11520_s30, 0 }
0x19ff   : > { %p11548_p5 = scmp.ge.s32.totalorder %s10172_s27, 2 }
0x1a01   : > { %p9399_p2 = pnand %p11548_p5, %p11547_p0 }
0x1a04   : > { %s6775_s3 = sand.u32 1, %s11546_s6  }
0x1a05   : > { %s6776_s29 = scalar_lea.sflag [#allocation4], %s6775_s3 }
0x1a06   : > { %10155 = dma.done.wait (!%p9399_p2), %s6776_s29, 64  }
0x1a07   : > { %10157 = vsyncadd (!%p9399_p2), %s6776_s29, 4294967232  ;;  %s11549_s24 = sld [smem:[#allocation36_spill]]  ;;  %s11550_s5 = smov %s10635_s25 }
0x1a08   : > { %p37_p7 = scmp.ge.s32.totalorder %s10623_s4, 4   ;;  %s11551_s25 = smov %s10168_s26 }
0x1a09   : > { %s11552_s26 = smov %s11550_s5  ;;  %s11553_s27 = smov %s10623_s4 }
0x1a0a   :  { %39 = sbr.rel (!%p37_p7) target bundleno = 23 (0x17), region = 227 }
0x1a11   :  { %6781 = vsyncpa [#allocation3], 1 }
0x1a12   :  { %6783 = vsyncpa [#allocation3 + $0x1], 1 }
0x1a13   :  { %6784 = vsyncpa [#allocation6], 1 }
0x1a14   :  { %6785 = vsyncpa [#allocation9], 1 }
0x1a15   :  { %6786 = vsyncpa [#allocation12], 1 }
0x1a16   :  { %6787 = vsyncpa [#allocation15], 1 }
0x1a17   :  { %6788 = vsyncpa [#allocation18], 1 }
0x1a18   :  { %6789 = vsyncpa [#allocation21], 1 }
0x1a19   :  { %6790 = vsyncpa [#allocation24], 1 }
0x1a1a   :  { %6791 = vsyncpa [#allocation4], 1 }
0x1a1b   :  { %6793 = vsyncpa [#allocation4 + $0x1], 1 }

</bundles_post_ra>
